<compile_context>
chip_gen: v6e
topology: v6e:2x2x1
jax: 0.10.0
libtpu: 0.0.40
codegen_flags: <defaults>
</compile_context>

<pallas_src>
import functools

import jax
import jax.numpy as jnp
from jax.experimental import pallas as pl
from jax.experimental.pallas import tpu as pltpu


OUT_PAD = 128  # lane-dense classifier head width (real outputs = 2)


def _round_up(x, m):
    return ((x + m - 1) // m) * m


def _weight_slab_layout(node_in, edge_in, H, He, out_pad):
    """Row offsets of each weight matrix inside the packed bf16 slab."""
    order = (
        ("w0", (node_in, H)),
        ("we1", (edge_in, He)),
        ("we2", (He, H * H)),
        ("root", (H, H)),
        ("wy", (H, out_pad)),
    )
    entries = {}
    row = 0
    for name, (r, c) in order:
        entries[name] = (row, r, c)
        row = _round_up(row + r, 8)
    total_rows = _round_up(row, 8)
    width = _round_up(max(c for (_, _, c) in entries.values()), 128)
    return entries, total_rows, width


def mpnn_kernel(x_ref, ea_ref, src_ref, dst_ref, w_ref, bias_ref, out_ref,
                *, H, He, num_steps, out_pad):
    dot = functools.partial(jnp.dot, preferred_element_type=jnp.float32)
    bf16 = jnp.bfloat16
    N, node_in = x_ref.shape
    E, edge_in = ea_ref.shape
    entries, _, _ = _weight_slab_layout(node_in, edge_in, H, He, out_pad)

    def wslice(name):
        row, r, c = entries[name]
        return w_ref[row:row + r, :c]

    # bias slab rows: b0, be1, be2, bconv, gamma, beta, by
    b0 = bias_ref[0:1, :H]
    be1 = bias_ref[1:2, :He]
    be2 = bias_ref[2:3, :H * H]
    bconv = bias_ref[3:4, :H]
    gamma = bias_ref[4:5, :H]
    beta = bias_ref[5:6, :H]
    by = bias_ref[6:7, :out_pad]

    # ---- out = relu(lin0(x)) : bf16 MXU operands, f32 accumulation/elementwise
    h = jnp.maximum(dot(x_ref[...].astype(bf16), wslice("w0")) + b0, 0.0)          # (N, H)

    # ---- edge network (Linear -> Dropout(p=0) -> ReLU -> Linear), loop invariant
    e1 = jnp.maximum(dot(ea_ref[...].astype(bf16), wslice("we1")) + be1, 0.0)      # (E, He)
    w_flat = dot(e1.astype(bf16), wslice("we2")) + be2                             # (E, H*H) f32
    # TODO(synk): at production E keep w_flat bf16 / recompute per edge tile (v7x VMEM budget).

    # ---- gather / scatter selectors built in-kernel from the edge indices
    # gat[e, n] = 1 if src[e] == n ;  sct[n, e] = 1 if dst[e] == n   ("add" aggregator)
    gat = jnp.where(
        jax.lax.broadcasted_iota(jnp.int32, (E, N), 1) == src_ref[...], 1.0, 0.0
    ).astype(bf16)                                                                  # (E, N)
    sct = jnp.where(
        jax.lax.broadcasted_iota(jnp.int32, (N, E), 0) == dst_ref[...], 1.0, 0.0
    ).astype(bf16)                                                                  # (N, E)

    root = wslice("root")
    bconv_full = jnp.broadcast_to(bconv, (N, H))   # hoisted (1,H) -> (N,H) broadcast

    # num_steps is tiny and static -> static unroll is fine here.
    # TODO(synk): switch to lax.fori_loop(..., unroll=True) when N/E/H grow.
    for _ in range(num_steps):
        hb = h.astype(bf16)
        # gather source node features: (E, N) @ (N, H) -> (E, H)
        x_src = dot(gat, hb)
        # per-edge matvec  msgs[e, o] = sum_k x_src[e, k] * w_flat[e, k*H + o]
        # (flat layout matches NNConv weight.view(-1, in, out)); static per-k
        # broadcast-multiply-accumulate = exactly E*H^2 of real work, no H^3 term.
        msgs = jnp.zeros((E, H), jnp.float32)
        for k in range(H):
            msgs = msgs + x_src[:, k:k + 1] * w_flat[:, k * H:(k + 1) * H]
        # scatter-add: (N, E) @ (E, H) -> (N, H)
        agg = dot(sct, msgs.astype(bf16))
        # NNConv root weight + bias, relu ; gnn_dropout(p=0) -> identity
        h = jnp.maximum(agg + dot(hb, root) + bconv_full, 0.0)

    # ---- BatchNorm1d (batch stats, biased variance, eps=1e-5), centered two-pass
    mean = jnp.mean(h, axis=0, keepdims=True)
    ctr = h - mean
    var = jnp.mean(ctr * ctr, axis=0, keepdims=True)
    y_bn = gamma * ctr * jax.lax.rsqrt(var + 1e-5) + beta

    # ---- nn_dropout(p=0) -> identity ; lane-dense (N, 128) head, sigmoid
    logits = dot(y_bn.astype(bf16), wslice("wy")) + by                              # (N, out_pad)
    out_ref[...] = jax.nn.sigmoid(logits)


def pack_params(params, *, node_in_feats, edge_input_dim, node_hidden_dim,
                edge_hidden_dim, out_pad=OUT_PAD):
    """One-time parameter prep: pack weights into a bf16 slab, biases into an f32 slab."""
    H, He = node_hidden_dim, edge_hidden_dim
    entries, total_rows, width = _weight_slab_layout(
        node_in_feats, edge_input_dim, H, He, out_pad)

    wy_pad = jnp.zeros((H, out_pad), jnp.float32).at[:, :2].set(params["wy"])
    mats = {"w0": params["w0"], "we1": params["we1"], "we2": params["we2"],
            "root": params["root"], "wy": wy_pad}
    w_slab = jnp.zeros((total_rows, width), jnp.float32)
    for name, (row, r, c) in entries.items():
        w_slab = w_slab.at[row:row + r, :c].set(mats[name])
    w_slab = w_slab.astype(jnp.bfloat16)

    by_pad = jnp.zeros((1, out_pad), jnp.float32).at[:, :2].set(params["by"])
    bias_rows = [("b0", params["b0"]), ("be1", params["be1"]), ("be2", params["be2"]),
                 ("bconv", params["bconv"]), ("gamma", params["gamma"]),
                 ("beta", params["beta"]), ("by", by_pad)]
    bias_slab = jnp.zeros((8, width), jnp.float32)
    for i, (_, v) in enumerate(bias_rows):
        bias_slab = bias_slab.at[i:i + 1, :v.shape[1]].set(v)

    return w_slab, bias_slab


@functools.partial(jax.jit,
                   static_argnames=("node_hidden_dim", "edge_hidden_dim", "num_steps"))
def mpnn_forward(x, edge_index, edge_attr, w_slab, bias_slab, *,
                 node_hidden_dim, edge_hidden_dim, num_steps):
    N = x.shape[0]
    E = edge_attr.shape[0]

    src = edge_index[0].astype(jnp.int32).reshape(E, 1)   # (E, 1)
    dst = edge_index[1].astype(jnp.int32).reshape(1, E)   # (1, E)

    vmem = pl.BlockSpec(memory_space=pltpu.MemorySpace.VMEM)
    out = pl.pallas_call(
        functools.partial(mpnn_kernel, H=node_hidden_dim, He=edge_hidden_dim,
                          num_steps=num_steps, out_pad=OUT_PAD),
        out_shape=jax.ShapeDtypeStruct((N, OUT_PAD), jnp.float32),
        in_specs=[vmem] * 6,
        out_specs=vmem,
        compiler_params=pltpu.CompilerParams(vmem_limit_bytes=32 * 1024 * 1024),
    )(x, edge_attr, src, dst, w_slab, bias_slab)
    return out[:, :2]


def init_params(key, node_in_feats, node_hidden_dim, edge_input_dim, edge_hidden_dim):
    H, He = node_hidden_dim, edge_hidden_dim
    ks = jax.random.split(key, 8)
    f32 = jnp.float32

    def lin(k, fan_in, fan_out):
        return jax.random.normal(k, (fan_in, fan_out), f32) / jnp.sqrt(f32(fan_in))

    return {
        "w0":    lin(ks[0], node_in_feats, H),
        "b0":    jnp.zeros((1, H), f32),
        "we1":   lin(ks[1], edge_input_dim, He),
        "be1":   jnp.zeros((1, He), f32),
        "we2":   lin(ks[2], He, H * H),
        "be2":   jnp.zeros((1, H * H), f32),
        "root":  lin(ks[3], H, H),
        "bconv": jnp.zeros((1, H), f32),
        "gamma": jnp.ones((1, H), f32),
        "beta":  jnp.zeros((1, H), f32),
        "wy":    lin(ks[4], H, 2),
        "by":    jnp.zeros((1, 2), f32),
    }


if __name__ == "__main__":
    # small shapes implied by the module's forward
    N = 8                        # num nodes
    E = 16                       # num edges
    node_in_feats = 6
    node_hidden_dim = 32
    edge_input_dim = 5
    edge_hidden_dim = 16
    num_step_message_passing = 3

    key = jax.random.PRNGKey(0)
    k_x, k_ea, k_src, k_dst, k_p = jax.random.split(key, 5)

    x = jax.random.normal(k_x, (N, node_in_feats), jnp.float32)
    edge_attr = jax.random.normal(k_ea, (E, edge_input_dim), jnp.float32)
    edge_index = jnp.stack([
        jax.random.randint(k_src, (E,), 0, N),
        jax.random.randint(k_dst, (E,), 0, N),
    ])                           # (2, E)

    params = init_params(k_p, node_in_feats, node_hidden_dim,
                         edge_input_dim, edge_hidden_dim)

    # one-time parameter prep (packing + bf16 casts) outside the per-call path
    w_slab, bias_slab = pack_params(
        params, node_in_feats=node_in_feats, edge_input_dim=edge_input_dim,
        node_hidden_dim=node_hidden_dim, edge_hidden_dim=edge_hidden_dim)

    out = mpnn_forward(x, edge_index, edge_attr, w_slab, bias_slab,
                       node_hidden_dim=node_hidden_dim,
                       edge_hidden_dim=edge_hidden_dim,
                       num_steps=num_step_message_passing)
    out = jax.block_until_ready(out)
    assert out.shape == (N, 2)
    assert bool(jnp.all(jnp.isfinite(out)))
    assert bool(jnp.all((out >= 0.0) & (out <= 1.0)))
    print("KERNEL_OK")
</pallas_src>

<mosaic_0001>
module attributes {stable_mosaic.version = 11 : i64} {
  func.func @mpnn_kernel(%arg0: memref<8x6xf32, #tpu.memory_space<vmem>>, %arg1: memref<16x5xf32, #tpu.memory_space<vmem>>, %arg2: memref<16x1xi32, #tpu.memory_space<vmem>>, %arg3: memref<1x16xi32, #tpu.memory_space<vmem>>, %arg4: memref<96x1024xbf16, #tpu.memory_space<vmem>>, %arg5: memref<8x1024xf32, #tpu.memory_space<vmem>>, %arg6: memref<8x128xf32, #tpu.memory_space<vmem>>) attributes {dimension_semantics = [], scalar_prefetch = 0 : i64, scratch_operands = 0 : i64, tpu.core_type = #tpu.core_type<tc>} {
    %c0 = arith.constant 0 : index
    %c0_0 = arith.constant 0 : index
    %0 = vector.load %arg5[%c0, %c0_0] : memref<8x1024xf32, #tpu.memory_space<vmem>>, vector<1x32xf32>
    %c1 = arith.constant 1 : index
    %c0_1 = arith.constant 0 : index
    %1 = vector.load %arg5[%c1, %c0_1] : memref<8x1024xf32, #tpu.memory_space<vmem>>, vector<1x16xf32>
    %c2 = arith.constant 2 : index
    %c0_2 = arith.constant 0 : index
    %2 = vector.load %arg5[%c2, %c0_2] : memref<8x1024xf32, #tpu.memory_space<vmem>>, vector<1x1024xf32>
    %c3 = arith.constant 3 : index
    %c0_3 = arith.constant 0 : index
    %3 = vector.load %arg5[%c3, %c0_3] : memref<8x1024xf32, #tpu.memory_space<vmem>>, vector<1x32xf32>
    %c4 = arith.constant 4 : index
    %c0_4 = arith.constant 0 : index
    %4 = vector.load %arg5[%c4, %c0_4] : memref<8x1024xf32, #tpu.memory_space<vmem>>, vector<1x32xf32>
    %c5 = arith.constant 5 : index
    %c0_5 = arith.constant 0 : index
    %5 = vector.load %arg5[%c5, %c0_5] : memref<8x1024xf32, #tpu.memory_space<vmem>>, vector<1x32xf32>
    %c6 = arith.constant 6 : index
    %c0_6 = arith.constant 0 : index
    %6 = vector.load %arg5[%c6, %c0_6] : memref<8x1024xf32, #tpu.memory_space<vmem>>, vector<1x128xf32>
    %c0_7 = arith.constant 0 : index
    %c0_8 = arith.constant 0 : index
    %7 = vector.load %arg0[%c0_7, %c0_8] : memref<8x6xf32, #tpu.memory_space<vmem>>, vector<8x6xf32>
    %8 = arith.truncf %7 : vector<8x6xf32> to vector<8x6xbf16>
    %c0_9 = arith.constant 0 : index
    %c0_10 = arith.constant 0 : index
    %9 = vector.load %arg4[%c0_9, %c0_10] : memref<96x1024xbf16, #tpu.memory_space<vmem>>, vector<6x32xbf16>
    %cst = arith.constant dense<0.000000e+00> : vector<8x32xf32>
    %10 = tpu.matmul %8, %9, %cst {dimension_numbers = #tpu.dot_dimension_numbers<[1], [0], [0], [1], [0, 0, 1, 1], [], []>} : vector<8x6xbf16>, vector<6x32xbf16>, vector<8x32xf32> -> vector<8x32xf32>
    %11 = vector.broadcast %0 : vector<1x32xf32> to vector<8x32xf32>
    %12 = arith.addf %10, %11 : vector<8x32xf32>
    %cst_11 = arith.constant 0.000000e+00 : f32
    %13 = vector.broadcast %cst_11 : f32 to vector<8x32xf32>
    %14 = arith.maximumf %12, %13 : vector<8x32xf32>
    %c0_12 = arith.constant 0 : index
    %c0_13 = arith.constant 0 : index
    %15 = vector.load %arg1[%c0_12, %c0_13] : memref<16x5xf32, #tpu.memory_space<vmem>>, vector<16x5xf32>
    %16 = arith.truncf %15 : vector<16x5xf32> to vector<16x5xbf16>
    %c8 = arith.constant 8 : index
    %c0_14 = arith.constant 0 : index
    %17 = vector.load %arg4[%c8, %c0_14] : memref<96x1024xbf16, #tpu.memory_space<vmem>>, vector<5x16xbf16>
    %cst_15 = arith.constant dense<0.000000e+00> : vector<16x16xf32>
    %18 = tpu.matmul %16, %17, %cst_15 {dimension_numbers = #tpu.dot_dimension_numbers<[1], [0], [0], [1], [0, 0, 1, 1], [], []>} : vector<16x5xbf16>, vector<5x16xbf16>, vector<16x16xf32> -> vector<16x16xf32>
    %19 = vector.broadcast %1 : vector<1x16xf32> to vector<16x16xf32>
    %20 = arith.addf %18, %19 : vector<16x16xf32>
    %cst_16 = arith.constant 0.000000e+00 : f32
    %21 = vector.broadcast %cst_16 : f32 to vector<16x16xf32>
    %22 = arith.maximumf %20, %21 : vector<16x16xf32>
    %23 = arith.truncf %22 : vector<16x16xf32> to vector<16x16xbf16>
    %c16 = arith.constant 16 : index
    %c0_17 = arith.constant 0 : index
    %24 = vector.load %arg4[%c16, %c0_17] : memref<96x1024xbf16, #tpu.memory_space<vmem>>, vector<16x1024xbf16>
    %cst_18 = arith.constant dense<0.000000e+00> : vector<16x1024xf32>
    %25 = tpu.matmul %23, %24, %cst_18 {dimension_numbers = #tpu.dot_dimension_numbers<[1], [0], [0], [1], [0, 0, 1, 1], [], []>} : vector<16x16xbf16>, vector<16x1024xbf16>, vector<16x1024xf32> -> vector<16x1024xf32>
    %26 = vector.broadcast %2 : vector<1x1024xf32> to vector<16x1024xf32>
    %27 = arith.addf %25, %26 : vector<16x1024xf32>
    %28 = tpu.iota {dimensions = array<i32: 1>} : vector<16x8xi32>
    %c0_19 = arith.constant 0 : index
    %c0_20 = arith.constant 0 : index
    %29 = vector.load %arg2[%c0_19, %c0_20] : memref<16x1xi32, #tpu.memory_space<vmem>>, vector<16x1xi32>
    %30 = vector.broadcast %29 : vector<16x1xi32> to vector<16x8xi32>
    %31 = arith.cmpi eq, %28, %30 : vector<16x8xi32>
    %cst_21 = arith.constant 1.000000e+00 : f32
    %cst_22 = arith.constant 0.000000e+00 : f32
    %32 = vector.broadcast %cst_21 : f32 to vector<16x8xf32>
    %33 = vector.broadcast %cst_22 : f32 to vector<16x8xf32>
    %34 = arith.select %31, %32, %33 : vector<16x8xi1>, vector<16x8xf32>
    %35 = arith.truncf %34 : vector<16x8xf32> to vector<16x8xbf16>
    %36 = tpu.iota {dimensions = array<i32: 0>} : vector<8x16xi32>
    %c0_23 = arith.constant 0 : index
    %c0_24 = arith.constant 0 : index
    %37 = vector.load %arg3[%c0_23, %c0_24] : memref<1x16xi32, #tpu.memory_space<vmem>>, vector<1x16xi32>
    %38 = vector.broadcast %37 : vector<1x16xi32> to vector<8x16xi32>
    %39 = arith.cmpi eq, %36, %38 : vector<8x16xi32>
    %cst_25 = arith.constant 1.000000e+00 : f32
    %cst_26 = arith.constant 0.000000e+00 : f32
    %40 = vector.broadcast %cst_25 : f32 to vector<8x16xf32>
    %41 = vector.broadcast %cst_26 : f32 to vector<8x16xf32>
    %42 = arith.select %39, %40, %41 : vector<8x16xi1>, vector<8x16xf32>
    %43 = arith.truncf %42 : vector<8x16xf32> to vector<8x16xbf16>
    %c32 = arith.constant 32 : index
    %c0_27 = arith.constant 0 : index
    %44 = vector.load %arg4[%c32, %c0_27] : memref<96x1024xbf16, #tpu.memory_space<vmem>>, vector<32x32xbf16>
    %45 = vector.shape_cast %3 : vector<1x32xf32> to vector<1x32xf32>
    %46 = vector.broadcast %45 : vector<1x32xf32> to vector<8x32xf32>
    %47 = arith.truncf %14 : vector<8x32xf32> to vector<8x32xbf16>
    %cst_28 = arith.constant dense<0.000000e+00> : vector<16x32xf32>
    %48 = tpu.matmul %35, %47, %cst_28 {dimension_numbers = #tpu.dot_dimension_numbers<[1], [0], [0], [1], [0, 0, 1, 1], [], []>} : vector<16x8xbf16>, vector<8x32xbf16>, vector<16x32xf32> -> vector<16x32xf32>
    %cst_29 = arith.constant 0.000000e+00 : f32
    %49 = vector.broadcast %cst_29 : f32 to vector<16x32xf32>
    %50 = vector.extract_strided_slice %48 {offsets = [0, 0], sizes = [16, 1], strides = [1, 1]} : vector<16x32xf32> to vector<16x1xf32>
    %51 = vector.extract_strided_slice %27 {offsets = [0, 0], sizes = [16, 32], strides = [1, 1]} : vector<16x1024xf32> to vector<16x32xf32>
    %52 = vector.broadcast %50 : vector<16x1xf32> to vector<16x32xf32>
    %53 = arith.mulf %52, %51 : vector<16x32xf32>
    %54 = arith.addf %49, %53 : vector<16x32xf32>
    %55 = vector.extract_strided_slice %48 {offsets = [0, 1], sizes = [16, 1], strides = [1, 1]} : vector<16x32xf32> to vector<16x1xf32>
    %56 = vector.extract_strided_slice %27 {offsets = [0, 32], sizes = [16, 32], strides = [1, 1]} : vector<16x1024xf32> to vector<16x32xf32>
    %57 = vector.broadcast %55 : vector<16x1xf32> to vector<16x32xf32>
    %58 = arith.mulf %57, %56 : vector<16x32xf32>
    %59 = arith.addf %54, %58 : vector<16x32xf32>
    %60 = vector.extract_strided_slice %48 {offsets = [0, 2], sizes = [16, 1], strides = [1, 1]} : vector<16x32xf32> to vector<16x1xf32>
    %61 = vector.extract_strided_slice %27 {offsets = [0, 64], sizes = [16, 32], strides = [1, 1]} : vector<16x1024xf32> to vector<16x32xf32>
    %62 = vector.broadcast %60 : vector<16x1xf32> to vector<16x32xf32>
    %63 = arith.mulf %62, %61 : vector<16x32xf32>
    %64 = arith.addf %59, %63 : vector<16x32xf32>
    %65 = vector.extract_strided_slice %48 {offsets = [0, 3], sizes = [16, 1], strides = [1, 1]} : vector<16x32xf32> to vector<16x1xf32>
    %66 = vector.extract_strided_slice %27 {offsets = [0, 96], sizes = [16, 32], strides = [1, 1]} : vector<16x1024xf32> to vector<16x32xf32>
    %67 = vector.broadcast %65 : vector<16x1xf32> to vector<16x32xf32>
    %68 = arith.mulf %67, %66 : vector<16x32xf32>
    %69 = arith.addf %64, %68 : vector<16x32xf32>
    %70 = vector.extract_strided_slice %48 {offsets = [0, 4], sizes = [16, 1], strides = [1, 1]} : vector<16x32xf32> to vector<16x1xf32>
    %71 = vector.extract_strided_slice %27 {offsets = [0, 128], sizes = [16, 32], strides = [1, 1]} : vector<16x1024xf32> to vector<16x32xf32>
    %72 = vector.broadcast %70 : vector<16x1xf32> to vector<16x32xf32>
    %73 = arith.mulf %72, %71 : vector<16x32xf32>
    %74 = arith.addf %69, %73 : vector<16x32xf32>
    %75 = vector.extract_strided_slice %48 {offsets = [0, 5], sizes = [16, 1], strides = [1, 1]} : vector<16x32xf32> to vector<16x1xf32>
    %76 = vector.extract_strided_slice %27 {offsets = [0, 160], sizes = [16, 32], strides = [1, 1]} : vector<16x1024xf32> to vector<16x32xf32>
    %77 = vector.broadcast %75 : vector<16x1xf32> to vector<16x32xf32>
    %78 = arith.mulf %77, %76 : vector<16x32xf32>
    %79 = arith.addf %74, %78 : vector<16x32xf32>
    %80 = vector.extract_strided_slice %48 {offsets = [0, 6], sizes = [16, 1], strides = [1, 1]} : vector<16x32xf32> to vector<16x1xf32>
    %81 = vector.extract_strided_slice %27 {offsets = [0, 192], sizes = [16, 32], strides = [1, 1]} : vector<16x1024xf32> to vector<16x32xf32>
    %82 = vector.broadcast %80 : vector<16x1xf32> to vector<16x32xf32>
    %83 = arith.mulf %82, %81 : vector<16x32xf32>
    %84 = arith.addf %79, %83 : vector<16x32xf32>
    %85 = vector.extract_strided_slice %48 {offsets = [0, 7], sizes = [16, 1], strides = [1, 1]} : vector<16x32xf32> to vector<16x1xf32>
    %86 = vector.extract_strided_slice %27 {offsets = [0, 224], sizes = [16, 32], strides = [1, 1]} : vector<16x1024xf32> to vector<16x32xf32>
    %87 = vector.broadcast %85 : vector<16x1xf32> to vector<16x32xf32>
    %88 = arith.mulf %87, %86 : vector<16x32xf32>
    %89 = arith.addf %84, %88 : vector<16x32xf32>
    %90 = vector.extract_strided_slice %48 {offsets = [0, 8], sizes = [16, 1], strides = [1, 1]} : vector<16x32xf32> to vector<16x1xf32>
    %91 = vector.extract_strided_slice %27 {offsets = [0, 256], sizes = [16, 32], strides = [1, 1]} : vector<16x1024xf32> to vector<16x32xf32>
    %92 = vector.broadcast %90 : vector<16x1xf32> to vector<16x32xf32>
    %93 = arith.mulf %92, %91 : vector<16x32xf32>
    %94 = arith.addf %89, %93 : vector<16x32xf32>
    %95 = vector.extract_strided_slice %48 {offsets = [0, 9], sizes = [16, 1], strides = [1, 1]} : vector<16x32xf32> to vector<16x1xf32>
    %96 = vector.extract_strided_slice %27 {offsets = [0, 288], sizes = [16, 32], strides = [1, 1]} : vector<16x1024xf32> to vector<16x32xf32>
    %97 = vector.broadcast %95 : vector<16x1xf32> to vector<16x32xf32>
    %98 = arith.mulf %97, %96 : vector<16x32xf32>
    %99 = arith.addf %94, %98 : vector<16x32xf32>
    %100 = vector.extract_strided_slice %48 {offsets = [0, 10], sizes = [16, 1], strides = [1, 1]} : vector<16x32xf32> to vector<16x1xf32>
    %101 = vector.extract_strided_slice %27 {offsets = [0, 320], sizes = [16, 32], strides = [1, 1]} : vector<16x1024xf32> to vector<16x32xf32>
    %102 = vector.broadcast %100 : vector<16x1xf32> to vector<16x32xf32>
    %103 = arith.mulf %102, %101 : vector<16x32xf32>
    %104 = arith.addf %99, %103 : vector<16x32xf32>
    %105 = vector.extract_strided_slice %48 {offsets = [0, 11], sizes = [16, 1], strides = [1, 1]} : vector<16x32xf32> to vector<16x1xf32>
    %106 = vector.extract_strided_slice %27 {offsets = [0, 352], sizes = [16, 32], strides = [1, 1]} : vector<16x1024xf32> to vector<16x32xf32>
    %107 = vector.broadcast %105 : vector<16x1xf32> to vector<16x32xf32>
    %108 = arith.mulf %107, %106 : vector<16x32xf32>
    %109 = arith.addf %104, %108 : vector<16x32xf32>
    %110 = vector.extract_strided_slice %48 {offsets = [0, 12], sizes = [16, 1], strides = [1, 1]} : vector<16x32xf32> to vector<16x1xf32>
    %111 = vector.extract_strided_slice %27 {offsets = [0, 384], sizes = [16, 32], strides = [1, 1]} : vector<16x1024xf32> to vector<16x32xf32>
    %112 = vector.broadcast %110 : vector<16x1xf32> to vector<16x32xf32>
    %113 = arith.mulf %112, %111 : vector<16x32xf32>
    %114 = arith.addf %109, %113 : vector<16x32xf32>
    %115 = vector.extract_strided_slice %48 {offsets = [0, 13], sizes = [16, 1], strides = [1, 1]} : vector<16x32xf32> to vector<16x1xf32>
    %116 = vector.extract_strided_slice %27 {offsets = [0, 416], sizes = [16, 32], strides = [1, 1]} : vector<16x1024xf32> to vector<16x32xf32>
    %117 = vector.broadcast %115 : vector<16x1xf32> to vector<16x32xf32>
    %118 = arith.mulf %117, %116 : vector<16x32xf32>
    %119 = arith.addf %114, %118 : vector<16x32xf32>
    %120 = vector.extract_strided_slice %48 {offsets = [0, 14], sizes = [16, 1], strides = [1, 1]} : vector<16x32xf32> to vector<16x1xf32>
    %121 = vector.extract_strided_slice %27 {offsets = [0, 448], sizes = [16, 32], strides = [1, 1]} : vector<16x1024xf32> to vector<16x32xf32>
    %122 = vector.broadcast %120 : vector<16x1xf32> to vector<16x32xf32>
    %123 = arith.mulf %122, %121 : vector<16x32xf32>
    %124 = arith.addf %119, %123 : vector<16x32xf32>
    %125 = vector.extract_strided_slice %48 {offsets = [0, 15], sizes = [16, 1], strides = [1, 1]} : vector<16x32xf32> to vector<16x1xf32>
    %126 = vector.extract_strided_slice %27 {offsets = [0, 480], sizes = [16, 32], strides = [1, 1]} : vector<16x1024xf32> to vector<16x32xf32>
    %127 = vector.broadcast %125 : vector<16x1xf32> to vector<16x32xf32>
    %128 = arith.mulf %127, %126 : vector<16x32xf32>
    %129 = arith.addf %124, %128 : vector<16x32xf32>
    %130 = vector.extract_strided_slice %48 {offsets = [0, 16], sizes = [16, 1], strides = [1, 1]} : vector<16x32xf32> to vector<16x1xf32>
    %131 = vector.extract_strided_slice %27 {offsets = [0, 512], sizes = [16, 32], strides = [1, 1]} : vector<16x1024xf32> to vector<16x32xf32>
    %132 = vector.broadcast %130 : vector<16x1xf32> to vector<16x32xf32>
    %133 = arith.mulf %132, %131 : vector<16x32xf32>
    %134 = arith.addf %129, %133 : vector<16x32xf32>
    %135 = vector.extract_strided_slice %48 {offsets = [0, 17], sizes = [16, 1], strides = [1, 1]} : vector<16x32xf32> to vector<16x1xf32>
    %136 = vector.extract_strided_slice %27 {offsets = [0, 544], sizes = [16, 32], strides = [1, 1]} : vector<16x1024xf32> to vector<16x32xf32>
    %137 = vector.broadcast %135 : vector<16x1xf32> to vector<16x32xf32>
    %138 = arith.mulf %137, %136 : vector<16x32xf32>
    %139 = arith.addf %134, %138 : vector<16x32xf32>
    %140 = vector.extract_strided_slice %48 {offsets = [0, 18], sizes = [16, 1], strides = [1, 1]} : vector<16x32xf32> to vector<16x1xf32>
    %141 = vector.extract_strided_slice %27 {offsets = [0, 576], sizes = [16, 32], strides = [1, 1]} : vector<16x1024xf32> to vector<16x32xf32>
    %142 = vector.broadcast %140 : vector<16x1xf32> to vector<16x32xf32>
    %143 = arith.mulf %142, %141 : vector<16x32xf32>
    %144 = arith.addf %139, %143 : vector<16x32xf32>
    %145 = vector.extract_strided_slice %48 {offsets = [0, 19], sizes = [16, 1], strides = [1, 1]} : vector<16x32xf32> to vector<16x1xf32>
    %146 = vector.extract_strided_slice %27 {offsets = [0, 608], sizes = [16, 32], strides = [1, 1]} : vector<16x1024xf32> to vector<16x32xf32>
    %147 = vector.broadcast %145 : vector<16x1xf32> to vector<16x32xf32>
    %148 = arith.mulf %147, %146 : vector<16x32xf32>
    %149 = arith.addf %144, %148 : vector<16x32xf32>
    %150 = vector.extract_strided_slice %48 {offsets = [0, 20], sizes = [16, 1], strides = [1, 1]} : vector<16x32xf32> to vector<16x1xf32>
    %151 = vector.extract_strided_slice %27 {offsets = [0, 640], sizes = [16, 32], strides = [1, 1]} : vector<16x1024xf32> to vector<16x32xf32>
    %152 = vector.broadcast %150 : vector<16x1xf32> to vector<16x32xf32>
    %153 = arith.mulf %152, %151 : vector<16x32xf32>
    %154 = arith.addf %149, %153 : vector<16x32xf32>
    %155 = vector.extract_strided_slice %48 {offsets = [0, 21], sizes = [16, 1], strides = [1, 1]} : vector<16x32xf32> to vector<16x1xf32>
    %156 = vector.extract_strided_slice %27 {offsets = [0, 672], sizes = [16, 32], strides = [1, 1]} : vector<16x1024xf32> to vector<16x32xf32>
    %157 = vector.broadcast %155 : vector<16x1xf32> to vector<16x32xf32>
    %158 = arith.mulf %157, %156 : vector<16x32xf32>
    %159 = arith.addf %154, %158 : vector<16x32xf32>
    %160 = vector.extract_strided_slice %48 {offsets = [0, 22], sizes = [16, 1], strides = [1, 1]} : vector<16x32xf32> to vector<16x1xf32>
    %161 = vector.extract_strided_slice %27 {offsets = [0, 704], sizes = [16, 32], strides = [1, 1]} : vector<16x1024xf32> to vector<16x32xf32>
    %162 = vector.broadcast %160 : vector<16x1xf32> to vector<16x32xf32>
    %163 = arith.mulf %162, %161 : vector<16x32xf32>
    %164 = arith.addf %159, %163 : vector<16x32xf32>
    %165 = vector.extract_strided_slice %48 {offsets = [0, 23], sizes = [16, 1], strides = [1, 1]} : vector<16x32xf32> to vector<16x1xf32>
    %166 = vector.extract_strided_slice %27 {offsets = [0, 736], sizes = [16, 32], strides = [1, 1]} : vector<16x1024xf32> to vector<16x32xf32>
    %167 = vector.broadcast %165 : vector<16x1xf32> to vector<16x32xf32>
    %168 = arith.mulf %167, %166 : vector<16x32xf32>
    %169 = arith.addf %164, %168 : vector<16x32xf32>
    %170 = vector.extract_strided_slice %48 {offsets = [0, 24], sizes = [16, 1], strides = [1, 1]} : vector<16x32xf32> to vector<16x1xf32>
    %171 = vector.extract_strided_slice %27 {offsets = [0, 768], sizes = [16, 32], strides = [1, 1]} : vector<16x1024xf32> to vector<16x32xf32>
    %172 = vector.broadcast %170 : vector<16x1xf32> to vector<16x32xf32>
    %173 = arith.mulf %172, %171 : vector<16x32xf32>
    %174 = arith.addf %169, %173 : vector<16x32xf32>
    %175 = vector.extract_strided_slice %48 {offsets = [0, 25], sizes = [16, 1], strides = [1, 1]} : vector<16x32xf32> to vector<16x1xf32>
    %176 = vector.extract_strided_slice %27 {offsets = [0, 800], sizes = [16, 32], strides = [1, 1]} : vector<16x1024xf32> to vector<16x32xf32>
    %177 = vector.broadcast %175 : vector<16x1xf32> to vector<16x32xf32>
    %178 = arith.mulf %177, %176 : vector<16x32xf32>
    %179 = arith.addf %174, %178 : vector<16x32xf32>
    %180 = vector.extract_strided_slice %48 {offsets = [0, 26], sizes = [16, 1], strides = [1, 1]} : vector<16x32xf32> to vector<16x1xf32>
    %181 = vector.extract_strided_slice %27 {offsets = [0, 832], sizes = [16, 32], strides = [1, 1]} : vector<16x1024xf32> to vector<16x32xf32>
    %182 = vector.broadcast %180 : vector<16x1xf32> to vector<16x32xf32>
    %183 = arith.mulf %182, %181 : vector<16x32xf32>
    %184 = arith.addf %179, %183 : vector<16x32xf32>
    %185 = vector.extract_strided_slice %48 {offsets = [0, 27], sizes = [16, 1], strides = [1, 1]} : vector<16x32xf32> to vector<16x1xf32>
    %186 = vector.extract_strided_slice %27 {offsets = [0, 864], sizes = [16, 32], strides = [1, 1]} : vector<16x1024xf32> to vector<16x32xf32>
    %187 = vector.broadcast %185 : vector<16x1xf32> to vector<16x32xf32>
    %188 = arith.mulf %187, %186 : vector<16x32xf32>
    %189 = arith.addf %184, %188 : vector<16x32xf32>
    %190 = vector.extract_strided_slice %48 {offsets = [0, 28], sizes = [16, 1], strides = [1, 1]} : vector<16x32xf32> to vector<16x1xf32>
    %191 = vector.extract_strided_slice %27 {offsets = [0, 896], sizes = [16, 32], strides = [1, 1]} : vector<16x1024xf32> to vector<16x32xf32>
    %192 = vector.broadcast %190 : vector<16x1xf32> to vector<16x32xf32>
    %193 = arith.mulf %192, %191 : vector<16x32xf32>
    %194 = arith.addf %189, %193 : vector<16x32xf32>
    %195 = vector.extract_strided_slice %48 {offsets = [0, 29], sizes = [16, 1], strides = [1, 1]} : vector<16x32xf32> to vector<16x1xf32>
    %196 = vector.extract_strided_slice %27 {offsets = [0, 928], sizes = [16, 32], strides = [1, 1]} : vector<16x1024xf32> to vector<16x32xf32>
    %197 = vector.broadcast %195 : vector<16x1xf32> to vector<16x32xf32>
    %198 = arith.mulf %197, %196 : vector<16x32xf32>
    %199 = arith.addf %194, %198 : vector<16x32xf32>
    %200 = vector.extract_strided_slice %48 {offsets = [0, 30], sizes = [16, 1], strides = [1, 1]} : vector<16x32xf32> to vector<16x1xf32>
    %201 = vector.extract_strided_slice %27 {offsets = [0, 960], sizes = [16, 32], strides = [1, 1]} : vector<16x1024xf32> to vector<16x32xf32>
    %202 = vector.broadcast %200 : vector<16x1xf32> to vector<16x32xf32>
    %203 = arith.mulf %202, %201 : vector<16x32xf32>
    %204 = arith.addf %199, %203 : vector<16x32xf32>
    %205 = vector.extract_strided_slice %48 {offsets = [0, 31], sizes = [16, 1], strides = [1, 1]} : vector<16x32xf32> to vector<16x1xf32>
    %206 = vector.extract_strided_slice %27 {offsets = [0, 992], sizes = [16, 32], strides = [1, 1]} : vector<16x1024xf32> to vector<16x32xf32>
    %207 = vector.broadcast %205 : vector<16x1xf32> to vector<16x32xf32>
    %208 = arith.mulf %207, %206 : vector<16x32xf32>
    %209 = arith.addf %204, %208 : vector<16x32xf32>
    %210 = arith.truncf %209 : vector<16x32xf32> to vector<16x32xbf16>
    %cst_30 = arith.constant dense<0.000000e+00> : vector<8x32xf32>
    %211 = tpu.matmul %43, %210, %cst_30 {dimension_numbers = #tpu.dot_dimension_numbers<[1], [0], [0], [1], [0, 0, 1, 1], [], []>} : vector<8x16xbf16>, vector<16x32xbf16>, vector<8x32xf32> -> vector<8x32xf32>
    %cst_31 = arith.constant dense<0.000000e+00> : vector<8x32xf32>
    %212 = tpu.matmul %47, %44, %cst_31 {dimension_numbers = #tpu.dot_dimension_numbers<[1], [0], [0], [1], [0, 0, 1, 1], [], []>} : vector<8x32xbf16>, vector<32x32xbf16>, vector<8x32xf32> -> vector<8x32xf32>
    %213 = arith.addf %211, %212 : vector<8x32xf32>
    %214 = arith.addf %213, %46 : vector<8x32xf32>
    %cst_32 = arith.constant 0.000000e+00 : f32
    %215 = vector.broadcast %cst_32 : f32 to vector<8x32xf32>
    %216 = arith.maximumf %214, %215 : vector<8x32xf32>
    %217 = arith.truncf %216 : vector<8x32xf32> to vector<8x32xbf16>
    %cst_33 = arith.constant dense<0.000000e+00> : vector<16x32xf32>
    %218 = tpu.matmul %35, %217, %cst_33 {dimension_numbers = #tpu.dot_dimension_numbers<[1], [0], [0], [1], [0, 0, 1, 1], [], []>} : vector<16x8xbf16>, vector<8x32xbf16>, vector<16x32xf32> -> vector<16x32xf32>
    %cst_34 = arith.constant 0.000000e+00 : f32
    %219 = vector.broadcast %cst_34 : f32 to vector<16x32xf32>
    %220 = vector.extract_strided_slice %218 {offsets = [0, 0], sizes = [16, 1], strides = [1, 1]} : vector<16x32xf32> to vector<16x1xf32>
    %221 = vector.extract_strided_slice %27 {offsets = [0, 0], sizes = [16, 32], strides = [1, 1]} : vector<16x1024xf32> to vector<16x32xf32>
    %222 = vector.broadcast %220 : vector<16x1xf32> to vector<16x32xf32>
    %223 = arith.mulf %222, %221 : vector<16x32xf32>
    %224 = arith.addf %219, %223 : vector<16x32xf32>
    %225 = vector.extract_strided_slice %218 {offsets = [0, 1], sizes = [16, 1], strides = [1, 1]} : vector<16x32xf32> to vector<16x1xf32>
    %226 = vector.extract_strided_slice %27 {offsets = [0, 32], sizes = [16, 32], strides = [1, 1]} : vector<16x1024xf32> to vector<16x32xf32>
    %227 = vector.broadcast %225 : vector<16x1xf32> to vector<16x32xf32>
    %228 = arith.mulf %227, %226 : vector<16x32xf32>
    %229 = arith.addf %224, %228 : vector<16x32xf32>
    %230 = vector.extract_strided_slice %218 {offsets = [0, 2], sizes = [16, 1], strides = [1, 1]} : vector<16x32xf32> to vector<16x1xf32>
    %231 = vector.extract_strided_slice %27 {offsets = [0, 64], sizes = [16, 32], strides = [1, 1]} : vector<16x1024xf32> to vector<16x32xf32>
    %232 = vector.broadcast %230 : vector<16x1xf32> to vector<16x32xf32>
    %233 = arith.mulf %232, %231 : vector<16x32xf32>
    %234 = arith.addf %229, %233 : vector<16x32xf32>
    %235 = vector.extract_strided_slice %218 {offsets = [0, 3], sizes = [16, 1], strides = [1, 1]} : vector<16x32xf32> to vector<16x1xf32>
    %236 = vector.extract_strided_slice %27 {offsets = [0, 96], sizes = [16, 32], strides = [1, 1]} : vector<16x1024xf32> to vector<16x32xf32>
    %237 = vector.broadcast %235 : vector<16x1xf32> to vector<16x32xf32>
    %238 = arith.mulf %237, %236 : vector<16x32xf32>
    %239 = arith.addf %234, %238 : vector<16x32xf32>
    %240 = vector.extract_strided_slice %218 {offsets = [0, 4], sizes = [16, 1], strides = [1, 1]} : vector<16x32xf32> to vector<16x1xf32>
    %241 = vector.extract_strided_slice %27 {offsets = [0, 128], sizes = [16, 32], strides = [1, 1]} : vector<16x1024xf32> to vector<16x32xf32>
    %242 = vector.broadcast %240 : vector<16x1xf32> to vector<16x32xf32>
    %243 = arith.mulf %242, %241 : vector<16x32xf32>
    %244 = arith.addf %239, %243 : vector<16x32xf32>
    %245 = vector.extract_strided_slice %218 {offsets = [0, 5], sizes = [16, 1], strides = [1, 1]} : vector<16x32xf32> to vector<16x1xf32>
    %246 = vector.extract_strided_slice %27 {offsets = [0, 160], sizes = [16, 32], strides = [1, 1]} : vector<16x1024xf32> to vector<16x32xf32>
    %247 = vector.broadcast %245 : vector<16x1xf32> to vector<16x32xf32>
    %248 = arith.mulf %247, %246 : vector<16x32xf32>
    %249 = arith.addf %244, %248 : vector<16x32xf32>
    %250 = vector.extract_strided_slice %218 {offsets = [0, 6], sizes = [16, 1], strides = [1, 1]} : vector<16x32xf32> to vector<16x1xf32>
    %251 = vector.extract_strided_slice %27 {offsets = [0, 192], sizes = [16, 32], strides = [1, 1]} : vector<16x1024xf32> to vector<16x32xf32>
    %252 = vector.broadcast %250 : vector<16x1xf32> to vector<16x32xf32>
    %253 = arith.mulf %252, %251 : vector<16x32xf32>
    %254 = arith.addf %249, %253 : vector<16x32xf32>
    %255 = vector.extract_strided_slice %218 {offsets = [0, 7], sizes = [16, 1], strides = [1, 1]} : vector<16x32xf32> to vector<16x1xf32>
    %256 = vector.extract_strided_slice %27 {offsets = [0, 224], sizes = [16, 32], strides = [1, 1]} : vector<16x1024xf32> to vector<16x32xf32>
    %257 = vector.broadcast %255 : vector<16x1xf32> to vector<16x32xf32>
    %258 = arith.mulf %257, %256 : vector<16x32xf32>
    %259 = arith.addf %254, %258 : vector<16x32xf32>
    %260 = vector.extract_strided_slice %218 {offsets = [0, 8], sizes = [16, 1], strides = [1, 1]} : vector<16x32xf32> to vector<16x1xf32>
    %261 = vector.extract_strided_slice %27 {offsets = [0, 256], sizes = [16, 32], strides = [1, 1]} : vector<16x1024xf32> to vector<16x32xf32>
    %262 = vector.broadcast %260 : vector<16x1xf32> to vector<16x32xf32>
    %263 = arith.mulf %262, %261 : vector<16x32xf32>
    %264 = arith.addf %259, %263 : vector<16x32xf32>
    %265 = vector.extract_strided_slice %218 {offsets = [0, 9], sizes = [16, 1], strides = [1, 1]} : vector<16x32xf32> to vector<16x1xf32>
    %266 = vector.extract_strided_slice %27 {offsets = [0, 288], sizes = [16, 32], strides = [1, 1]} : vector<16x1024xf32> to vector<16x32xf32>
    %267 = vector.broadcast %265 : vector<16x1xf32> to vector<16x32xf32>
    %268 = arith.mulf %267, %266 : vector<16x32xf32>
    %269 = arith.addf %264, %268 : vector<16x32xf32>
    %270 = vector.extract_strided_slice %218 {offsets = [0, 10], sizes = [16, 1], strides = [1, 1]} : vector<16x32xf32> to vector<16x1xf32>
    %271 = vector.extract_strided_slice %27 {offsets = [0, 320], sizes = [16, 32], strides = [1, 1]} : vector<16x1024xf32> to vector<16x32xf32>
    %272 = vector.broadcast %270 : vector<16x1xf32> to vector<16x32xf32>
    %273 = arith.mulf %272, %271 : vector<16x32xf32>
    %274 = arith.addf %269, %273 : vector<16x32xf32>
    %275 = vector.extract_strided_slice %218 {offsets = [0, 11], sizes = [16, 1], strides = [1, 1]} : vector<16x32xf32> to vector<16x1xf32>
    %276 = vector.extract_strided_slice %27 {offsets = [0, 352], sizes = [16, 32], strides = [1, 1]} : vector<16x1024xf32> to vector<16x32xf32>
    %277 = vector.broadcast %275 : vector<16x1xf32> to vector<16x32xf32>
    %278 = arith.mulf %277, %276 : vector<16x32xf32>
    %279 = arith.addf %274, %278 : vector<16x32xf32>
    %280 = vector.extract_strided_slice %218 {offsets = [0, 12], sizes = [16, 1], strides = [1, 1]} : vector<16x32xf32> to vector<16x1xf32>
    %281 = vector.extract_strided_slice %27 {offsets = [0, 384], sizes = [16, 32], strides = [1, 1]} : vector<16x1024xf32> to vector<16x32xf32>
    %282 = vector.broadcast %280 : vector<16x1xf32> to vector<16x32xf32>
    %283 = arith.mulf %282, %281 : vector<16x32xf32>
    %284 = arith.addf %279, %283 : vector<16x32xf32>
    %285 = vector.extract_strided_slice %218 {offsets = [0, 13], sizes = [16, 1], strides = [1, 1]} : vector<16x32xf32> to vector<16x1xf32>
    %286 = vector.extract_strided_slice %27 {offsets = [0, 416], sizes = [16, 32], strides = [1, 1]} : vector<16x1024xf32> to vector<16x32xf32>
    %287 = vector.broadcast %285 : vector<16x1xf32> to vector<16x32xf32>
    %288 = arith.mulf %287, %286 : vector<16x32xf32>
    %289 = arith.addf %284, %288 : vector<16x32xf32>
    %290 = vector.extract_strided_slice %218 {offsets = [0, 14], sizes = [16, 1], strides = [1, 1]} : vector<16x32xf32> to vector<16x1xf32>
    %291 = vector.extract_strided_slice %27 {offsets = [0, 448], sizes = [16, 32], strides = [1, 1]} : vector<16x1024xf32> to vector<16x32xf32>
    %292 = vector.broadcast %290 : vector<16x1xf32> to vector<16x32xf32>
    %293 = arith.mulf %292, %291 : vector<16x32xf32>
    %294 = arith.addf %289, %293 : vector<16x32xf32>
    %295 = vector.extract_strided_slice %218 {offsets = [0, 15], sizes = [16, 1], strides = [1, 1]} : vector<16x32xf32> to vector<16x1xf32>
    %296 = vector.extract_strided_slice %27 {offsets = [0, 480], sizes = [16, 32], strides = [1, 1]} : vector<16x1024xf32> to vector<16x32xf32>
    %297 = vector.broadcast %295 : vector<16x1xf32> to vector<16x32xf32>
    %298 = arith.mulf %297, %296 : vector<16x32xf32>
    %299 = arith.addf %294, %298 : vector<16x32xf32>
    %300 = vector.extract_strided_slice %218 {offsets = [0, 16], sizes = [16, 1], strides = [1, 1]} : vector<16x32xf32> to vector<16x1xf32>
    %301 = vector.extract_strided_slice %27 {offsets = [0, 512], sizes = [16, 32], strides = [1, 1]} : vector<16x1024xf32> to vector<16x32xf32>
    %302 = vector.broadcast %300 : vector<16x1xf32> to vector<16x32xf32>
    %303 = arith.mulf %302, %301 : vector<16x32xf32>
    %304 = arith.addf %299, %303 : vector<16x32xf32>
    %305 = vector.extract_strided_slice %218 {offsets = [0, 17], sizes = [16, 1], strides = [1, 1]} : vector<16x32xf32> to vector<16x1xf32>
    %306 = vector.extract_strided_slice %27 {offsets = [0, 544], sizes = [16, 32], strides = [1, 1]} : vector<16x1024xf32> to vector<16x32xf32>
    %307 = vector.broadcast %305 : vector<16x1xf32> to vector<16x32xf32>
    %308 = arith.mulf %307, %306 : vector<16x32xf32>
    %309 = arith.addf %304, %308 : vector<16x32xf32>
    %310 = vector.extract_strided_slice %218 {offsets = [0, 18], sizes = [16, 1], strides = [1, 1]} : vector<16x32xf32> to vector<16x1xf32>
    %311 = vector.extract_strided_slice %27 {offsets = [0, 576], sizes = [16, 32], strides = [1, 1]} : vector<16x1024xf32> to vector<16x32xf32>
    %312 = vector.broadcast %310 : vector<16x1xf32> to vector<16x32xf32>
    %313 = arith.mulf %312, %311 : vector<16x32xf32>
    %314 = arith.addf %309, %313 : vector<16x32xf32>
    %315 = vector.extract_strided_slice %218 {offsets = [0, 19], sizes = [16, 1], strides = [1, 1]} : vector<16x32xf32> to vector<16x1xf32>
    %316 = vector.extract_strided_slice %27 {offsets = [0, 608], sizes = [16, 32], strides = [1, 1]} : vector<16x1024xf32> to vector<16x32xf32>
    %317 = vector.broadcast %315 : vector<16x1xf32> to vector<16x32xf32>
    %318 = arith.mulf %317, %316 : vector<16x32xf32>
    %319 = arith.addf %314, %318 : vector<16x32xf32>
    %320 = vector.extract_strided_slice %218 {offsets = [0, 20], sizes = [16, 1], strides = [1, 1]} : vector<16x32xf32> to vector<16x1xf32>
    %321 = vector.extract_strided_slice %27 {offsets = [0, 640], sizes = [16, 32], strides = [1, 1]} : vector<16x1024xf32> to vector<16x32xf32>
    %322 = vector.broadcast %320 : vector<16x1xf32> to vector<16x32xf32>
    %323 = arith.mulf %322, %321 : vector<16x32xf32>
    %324 = arith.addf %319, %323 : vector<16x32xf32>
    %325 = vector.extract_strided_slice %218 {offsets = [0, 21], sizes = [16, 1], strides = [1, 1]} : vector<16x32xf32> to vector<16x1xf32>
    %326 = vector.extract_strided_slice %27 {offsets = [0, 672], sizes = [16, 32], strides = [1, 1]} : vector<16x1024xf32> to vector<16x32xf32>
    %327 = vector.broadcast %325 : vector<16x1xf32> to vector<16x32xf32>
    %328 = arith.mulf %327, %326 : vector<16x32xf32>
    %329 = arith.addf %324, %328 : vector<16x32xf32>
    %330 = vector.extract_strided_slice %218 {offsets = [0, 22], sizes = [16, 1], strides = [1, 1]} : vector<16x32xf32> to vector<16x1xf32>
    %331 = vector.extract_strided_slice %27 {offsets = [0, 704], sizes = [16, 32], strides = [1, 1]} : vector<16x1024xf32> to vector<16x32xf32>
    %332 = vector.broadcast %330 : vector<16x1xf32> to vector<16x32xf32>
    %333 = arith.mulf %332, %331 : vector<16x32xf32>
    %334 = arith.addf %329, %333 : vector<16x32xf32>
    %335 = vector.extract_strided_slice %218 {offsets = [0, 23], sizes = [16, 1], strides = [1, 1]} : vector<16x32xf32> to vector<16x1xf32>
    %336 = vector.extract_strided_slice %27 {offsets = [0, 736], sizes = [16, 32], strides = [1, 1]} : vector<16x1024xf32> to vector<16x32xf32>
    %337 = vector.broadcast %335 : vector<16x1xf32> to vector<16x32xf32>
    %338 = arith.mulf %337, %336 : vector<16x32xf32>
    %339 = arith.addf %334, %338 : vector<16x32xf32>
    %340 = vector.extract_strided_slice %218 {offsets = [0, 24], sizes = [16, 1], strides = [1, 1]} : vector<16x32xf32> to vector<16x1xf32>
    %341 = vector.extract_strided_slice %27 {offsets = [0, 768], sizes = [16, 32], strides = [1, 1]} : vector<16x1024xf32> to vector<16x32xf32>
    %342 = vector.broadcast %340 : vector<16x1xf32> to vector<16x32xf32>
    %343 = arith.mulf %342, %341 : vector<16x32xf32>
    %344 = arith.addf %339, %343 : vector<16x32xf32>
    %345 = vector.extract_strided_slice %218 {offsets = [0, 25], sizes = [16, 1], strides = [1, 1]} : vector<16x32xf32> to vector<16x1xf32>
    %346 = vector.extract_strided_slice %27 {offsets = [0, 800], sizes = [16, 32], strides = [1, 1]} : vector<16x1024xf32> to vector<16x32xf32>
    %347 = vector.broadcast %345 : vector<16x1xf32> to vector<16x32xf32>
    %348 = arith.mulf %347, %346 : vector<16x32xf32>
    %349 = arith.addf %344, %348 : vector<16x32xf32>
    %350 = vector.extract_strided_slice %218 {offsets = [0, 26], sizes = [16, 1], strides = [1, 1]} : vector<16x32xf32> to vector<16x1xf32>
    %351 = vector.extract_strided_slice %27 {offsets = [0, 832], sizes = [16, 32], strides = [1, 1]} : vector<16x1024xf32> to vector<16x32xf32>
    %352 = vector.broadcast %350 : vector<16x1xf32> to vector<16x32xf32>
    %353 = arith.mulf %352, %351 : vector<16x32xf32>
    %354 = arith.addf %349, %353 : vector<16x32xf32>
    %355 = vector.extract_strided_slice %218 {offsets = [0, 27], sizes = [16, 1], strides = [1, 1]} : vector<16x32xf32> to vector<16x1xf32>
    %356 = vector.extract_strided_slice %27 {offsets = [0, 864], sizes = [16, 32], strides = [1, 1]} : vector<16x1024xf32> to vector<16x32xf32>
    %357 = vector.broadcast %355 : vector<16x1xf32> to vector<16x32xf32>
    %358 = arith.mulf %357, %356 : vector<16x32xf32>
    %359 = arith.addf %354, %358 : vector<16x32xf32>
    %360 = vector.extract_strided_slice %218 {offsets = [0, 28], sizes = [16, 1], strides = [1, 1]} : vector<16x32xf32> to vector<16x1xf32>
    %361 = vector.extract_strided_slice %27 {offsets = [0, 896], sizes = [16, 32], strides = [1, 1]} : vector<16x1024xf32> to vector<16x32xf32>
    %362 = vector.broadcast %360 : vector<16x1xf32> to vector<16x32xf32>
    %363 = arith.mulf %362, %361 : vector<16x32xf32>
    %364 = arith.addf %359, %363 : vector<16x32xf32>
    %365 = vector.extract_strided_slice %218 {offsets = [0, 29], sizes = [16, 1], strides = [1, 1]} : vector<16x32xf32> to vector<16x1xf32>
    %366 = vector.extract_strided_slice %27 {offsets = [0, 928], sizes = [16, 32], strides = [1, 1]} : vector<16x1024xf32> to vector<16x32xf32>
    %367 = vector.broadcast %365 : vector<16x1xf32> to vector<16x32xf32>
    %368 = arith.mulf %367, %366 : vector<16x32xf32>
    %369 = arith.addf %364, %368 : vector<16x32xf32>
    %370 = vector.extract_strided_slice %218 {offsets = [0, 30], sizes = [16, 1], strides = [1, 1]} : vector<16x32xf32> to vector<16x1xf32>
    %371 = vector.extract_strided_slice %27 {offsets = [0, 960], sizes = [16, 32], strides = [1, 1]} : vector<16x1024xf32> to vector<16x32xf32>
    %372 = vector.broadcast %370 : vector<16x1xf32> to vector<16x32xf32>
    %373 = arith.mulf %372, %371 : vector<16x32xf32>
    %374 = arith.addf %369, %373 : vector<16x32xf32>
    %375 = vector.extract_strided_slice %218 {offsets = [0, 31], sizes = [16, 1], strides = [1, 1]} : vector<16x32xf32> to vector<16x1xf32>
    %376 = vector.extract_strided_slice %27 {offsets = [0, 992], sizes = [16, 32], strides = [1, 1]} : vector<16x1024xf32> to vector<16x32xf32>
    %377 = vector.broadcast %375 : vector<16x1xf32> to vector<16x32xf32>
    %378 = arith.mulf %377, %376 : vector<16x32xf32>
    %379 = arith.addf %374, %378 : vector<16x32xf32>
    %380 = arith.truncf %379 : vector<16x32xf32> to vector<16x32xbf16>
    %cst_35 = arith.constant dense<0.000000e+00> : vector<8x32xf32>
    %381 = tpu.matmul %43, %380, %cst_35 {dimension_numbers = #tpu.dot_dimension_numbers<[1], [0], [0], [1], [0, 0, 1, 1], [], []>} : vector<8x16xbf16>, vector<16x32xbf16>, vector<8x32xf32> -> vector<8x32xf32>
    %cst_36 = arith.constant dense<0.000000e+00> : vector<8x32xf32>
    %382 = tpu.matmul %217, %44, %cst_36 {dimension_numbers = #tpu.dot_dimension_numbers<[1], [0], [0], [1], [0, 0, 1, 1], [], []>} : vector<8x32xbf16>, vector<32x32xbf16>, vector<8x32xf32> -> vector<8x32xf32>
    %383 = arith.addf %381, %382 : vector<8x32xf32>
    %384 = arith.addf %383, %46 : vector<8x32xf32>
    %cst_37 = arith.constant 0.000000e+00 : f32
    %385 = vector.broadcast %cst_37 : f32 to vector<8x32xf32>
    %386 = arith.maximumf %384, %385 : vector<8x32xf32>
    %387 = arith.truncf %386 : vector<8x32xf32> to vector<8x32xbf16>
    %cst_38 = arith.constant dense<0.000000e+00> : vector<16x32xf32>
    %388 = tpu.matmul %35, %387, %cst_38 {dimension_numbers = #tpu.dot_dimension_numbers<[1], [0], [0], [1], [0, 0, 1, 1], [], []>} : vector<16x8xbf16>, vector<8x32xbf16>, vector<16x32xf32> -> vector<16x32xf32>
    %cst_39 = arith.constant 0.000000e+00 : f32
    %389 = vector.broadcast %cst_39 : f32 to vector<16x32xf32>
    %390 = vector.extract_strided_slice %388 {offsets = [0, 0], sizes = [16, 1], strides = [1, 1]} : vector<16x32xf32> to vector<16x1xf32>
    %391 = vector.extract_strided_slice %27 {offsets = [0, 0], sizes = [16, 32], strides = [1, 1]} : vector<16x1024xf32> to vector<16x32xf32>
    %392 = vector.broadcast %390 : vector<16x1xf32> to vector<16x32xf32>
    %393 = arith.mulf %392, %391 : vector<16x32xf32>
    %394 = arith.addf %389, %393 : vector<16x32xf32>
    %395 = vector.extract_strided_slice %388 {offsets = [0, 1], sizes = [16, 1], strides = [1, 1]} : vector<16x32xf32> to vector<16x1xf32>
    %396 = vector.extract_strided_slice %27 {offsets = [0, 32], sizes = [16, 32], strides = [1, 1]} : vector<16x1024xf32> to vector<16x32xf32>
    %397 = vector.broadcast %395 : vector<16x1xf32> to vector<16x32xf32>
    %398 = arith.mulf %397, %396 : vector<16x32xf32>
    %399 = arith.addf %394, %398 : vector<16x32xf32>
    %400 = vector.extract_strided_slice %388 {offsets = [0, 2], sizes = [16, 1], strides = [1, 1]} : vector<16x32xf32> to vector<16x1xf32>
    %401 = vector.extract_strided_slice %27 {offsets = [0, 64], sizes = [16, 32], strides = [1, 1]} : vector<16x1024xf32> to vector<16x32xf32>
    %402 = vector.broadcast %400 : vector<16x1xf32> to vector<16x32xf32>
    %403 = arith.mulf %402, %401 : vector<16x32xf32>
    %404 = arith.addf %399, %403 : vector<16x32xf32>
    %405 = vector.extract_strided_slice %388 {offsets = [0, 3], sizes = [16, 1], strides = [1, 1]} : vector<16x32xf32> to vector<16x1xf32>
    %406 = vector.extract_strided_slice %27 {offsets = [0, 96], sizes = [16, 32], strides = [1, 1]} : vector<16x1024xf32> to vector<16x32xf32>
    %407 = vector.broadcast %405 : vector<16x1xf32> to vector<16x32xf32>
    %408 = arith.mulf %407, %406 : vector<16x32xf32>
    %409 = arith.addf %404, %408 : vector<16x32xf32>
    %410 = vector.extract_strided_slice %388 {offsets = [0, 4], sizes = [16, 1], strides = [1, 1]} : vector<16x32xf32> to vector<16x1xf32>
    %411 = vector.extract_strided_slice %27 {offsets = [0, 128], sizes = [16, 32], strides = [1, 1]} : vector<16x1024xf32> to vector<16x32xf32>
    %412 = vector.broadcast %410 : vector<16x1xf32> to vector<16x32xf32>
    %413 = arith.mulf %412, %411 : vector<16x32xf32>
    %414 = arith.addf %409, %413 : vector<16x32xf32>
    %415 = vector.extract_strided_slice %388 {offsets = [0, 5], sizes = [16, 1], strides = [1, 1]} : vector<16x32xf32> to vector<16x1xf32>
    %416 = vector.extract_strided_slice %27 {offsets = [0, 160], sizes = [16, 32], strides = [1, 1]} : vector<16x1024xf32> to vector<16x32xf32>
    %417 = vector.broadcast %415 : vector<16x1xf32> to vector<16x32xf32>
    %418 = arith.mulf %417, %416 : vector<16x32xf32>
    %419 = arith.addf %414, %418 : vector<16x32xf32>
    %420 = vector.extract_strided_slice %388 {offsets = [0, 6], sizes = [16, 1], strides = [1, 1]} : vector<16x32xf32> to vector<16x1xf32>
    %421 = vector.extract_strided_slice %27 {offsets = [0, 192], sizes = [16, 32], strides = [1, 1]} : vector<16x1024xf32> to vector<16x32xf32>
    %422 = vector.broadcast %420 : vector<16x1xf32> to vector<16x32xf32>
    %423 = arith.mulf %422, %421 : vector<16x32xf32>
    %424 = arith.addf %419, %423 : vector<16x32xf32>
    %425 = vector.extract_strided_slice %388 {offsets = [0, 7], sizes = [16, 1], strides = [1, 1]} : vector<16x32xf32> to vector<16x1xf32>
    %426 = vector.extract_strided_slice %27 {offsets = [0, 224], sizes = [16, 32], strides = [1, 1]} : vector<16x1024xf32> to vector<16x32xf32>
    %427 = vector.broadcast %425 : vector<16x1xf32> to vector<16x32xf32>
    %428 = arith.mulf %427, %426 : vector<16x32xf32>
    %429 = arith.addf %424, %428 : vector<16x32xf32>
    %430 = vector.extract_strided_slice %388 {offsets = [0, 8], sizes = [16, 1], strides = [1, 1]} : vector<16x32xf32> to vector<16x1xf32>
    %431 = vector.extract_strided_slice %27 {offsets = [0, 256], sizes = [16, 32], strides = [1, 1]} : vector<16x1024xf32> to vector<16x32xf32>
    %432 = vector.broadcast %430 : vector<16x1xf32> to vector<16x32xf32>
    %433 = arith.mulf %432, %431 : vector<16x32xf32>
    %434 = arith.addf %429, %433 : vector<16x32xf32>
    %435 = vector.extract_strided_slice %388 {offsets = [0, 9], sizes = [16, 1], strides = [1, 1]} : vector<16x32xf32> to vector<16x1xf32>
    %436 = vector.extract_strided_slice %27 {offsets = [0, 288], sizes = [16, 32], strides = [1, 1]} : vector<16x1024xf32> to vector<16x32xf32>
    %437 = vector.broadcast %435 : vector<16x1xf32> to vector<16x32xf32>
    %438 = arith.mulf %437, %436 : vector<16x32xf32>
    %439 = arith.addf %434, %438 : vector<16x32xf32>
    %440 = vector.extract_strided_slice %388 {offsets = [0, 10], sizes = [16, 1], strides = [1, 1]} : vector<16x32xf32> to vector<16x1xf32>
    %441 = vector.extract_strided_slice %27 {offsets = [0, 320], sizes = [16, 32], strides = [1, 1]} : vector<16x1024xf32> to vector<16x32xf32>
    %442 = vector.broadcast %440 : vector<16x1xf32> to vector<16x32xf32>
    %443 = arith.mulf %442, %441 : vector<16x32xf32>
    %444 = arith.addf %439, %443 : vector<16x32xf32>
    %445 = vector.extract_strided_slice %388 {offsets = [0, 11], sizes = [16, 1], strides = [1, 1]} : vector<16x32xf32> to vector<16x1xf32>
    %446 = vector.extract_strided_slice %27 {offsets = [0, 352], sizes = [16, 32], strides = [1, 1]} : vector<16x1024xf32> to vector<16x32xf32>
    %447 = vector.broadcast %445 : vector<16x1xf32> to vector<16x32xf32>
    %448 = arith.mulf %447, %446 : vector<16x32xf32>
    %449 = arith.addf %444, %448 : vector<16x32xf32>
    %450 = vector.extract_strided_slice %388 {offsets = [0, 12], sizes = [16, 1], strides = [1, 1]} : vector<16x32xf32> to vector<16x1xf32>
    %451 = vector.extract_strided_slice %27 {offsets = [0, 384], sizes = [16, 32], strides = [1, 1]} : vector<16x1024xf32> to vector<16x32xf32>
    %452 = vector.broadcast %450 : vector<16x1xf32> to vector<16x32xf32>
    %453 = arith.mulf %452, %451 : vector<16x32xf32>
    %454 = arith.addf %449, %453 : vector<16x32xf32>
    %455 = vector.extract_strided_slice %388 {offsets = [0, 13], sizes = [16, 1], strides = [1, 1]} : vector<16x32xf32> to vector<16x1xf32>
    %456 = vector.extract_strided_slice %27 {offsets = [0, 416], sizes = [16, 32], strides = [1, 1]} : vector<16x1024xf32> to vector<16x32xf32>
    %457 = vector.broadcast %455 : vector<16x1xf32> to vector<16x32xf32>
    %458 = arith.mulf %457, %456 : vector<16x32xf32>
    %459 = arith.addf %454, %458 : vector<16x32xf32>
    %460 = vector.extract_strided_slice %388 {offsets = [0, 14], sizes = [16, 1], strides = [1, 1]} : vector<16x32xf32> to vector<16x1xf32>
    %461 = vector.extract_strided_slice %27 {offsets = [0, 448], sizes = [16, 32], strides = [1, 1]} : vector<16x1024xf32> to vector<16x32xf32>
    %462 = vector.broadcast %460 : vector<16x1xf32> to vector<16x32xf32>
    %463 = arith.mulf %462, %461 : vector<16x32xf32>
    %464 = arith.addf %459, %463 : vector<16x32xf32>
    %465 = vector.extract_strided_slice %388 {offsets = [0, 15], sizes = [16, 1], strides = [1, 1]} : vector<16x32xf32> to vector<16x1xf32>
    %466 = vector.extract_strided_slice %27 {offsets = [0, 480], sizes = [16, 32], strides = [1, 1]} : vector<16x1024xf32> to vector<16x32xf32>
    %467 = vector.broadcast %465 : vector<16x1xf32> to vector<16x32xf32>
    %468 = arith.mulf %467, %466 : vector<16x32xf32>
    %469 = arith.addf %464, %468 : vector<16x32xf32>
    %470 = vector.extract_strided_slice %388 {offsets = [0, 16], sizes = [16, 1], strides = [1, 1]} : vector<16x32xf32> to vector<16x1xf32>
    %471 = vector.extract_strided_slice %27 {offsets = [0, 512], sizes = [16, 32], strides = [1, 1]} : vector<16x1024xf32> to vector<16x32xf32>
    %472 = vector.broadcast %470 : vector<16x1xf32> to vector<16x32xf32>
    %473 = arith.mulf %472, %471 : vector<16x32xf32>
    %474 = arith.addf %469, %473 : vector<16x32xf32>
    %475 = vector.extract_strided_slice %388 {offsets = [0, 17], sizes = [16, 1], strides = [1, 1]} : vector<16x32xf32> to vector<16x1xf32>
    %476 = vector.extract_strided_slice %27 {offsets = [0, 544], sizes = [16, 32], strides = [1, 1]} : vector<16x1024xf32> to vector<16x32xf32>
    %477 = vector.broadcast %475 : vector<16x1xf32> to vector<16x32xf32>
    %478 = arith.mulf %477, %476 : vector<16x32xf32>
    %479 = arith.addf %474, %478 : vector<16x32xf32>
    %480 = vector.extract_strided_slice %388 {offsets = [0, 18], sizes = [16, 1], strides = [1, 1]} : vector<16x32xf32> to vector<16x1xf32>
    %481 = vector.extract_strided_slice %27 {offsets = [0, 576], sizes = [16, 32], strides = [1, 1]} : vector<16x1024xf32> to vector<16x32xf32>
    %482 = vector.broadcast %480 : vector<16x1xf32> to vector<16x32xf32>
    %483 = arith.mulf %482, %481 : vector<16x32xf32>
    %484 = arith.addf %479, %483 : vector<16x32xf32>
    %485 = vector.extract_strided_slice %388 {offsets = [0, 19], sizes = [16, 1], strides = [1, 1]} : vector<16x32xf32> to vector<16x1xf32>
    %486 = vector.extract_strided_slice %27 {offsets = [0, 608], sizes = [16, 32], strides = [1, 1]} : vector<16x1024xf32> to vector<16x32xf32>
    %487 = vector.broadcast %485 : vector<16x1xf32> to vector<16x32xf32>
    %488 = arith.mulf %487, %486 : vector<16x32xf32>
    %489 = arith.addf %484, %488 : vector<16x32xf32>
    %490 = vector.extract_strided_slice %388 {offsets = [0, 20], sizes = [16, 1], strides = [1, 1]} : vector<16x32xf32> to vector<16x1xf32>
    %491 = vector.extract_strided_slice %27 {offsets = [0, 640], sizes = [16, 32], strides = [1, 1]} : vector<16x1024xf32> to vector<16x32xf32>
    %492 = vector.broadcast %490 : vector<16x1xf32> to vector<16x32xf32>
    %493 = arith.mulf %492, %491 : vector<16x32xf32>
    %494 = arith.addf %489, %493 : vector<16x32xf32>
    %495 = vector.extract_strided_slice %388 {offsets = [0, 21], sizes = [16, 1], strides = [1, 1]} : vector<16x32xf32> to vector<16x1xf32>
    %496 = vector.extract_strided_slice %27 {offsets = [0, 672], sizes = [16, 32], strides = [1, 1]} : vector<16x1024xf32> to vector<16x32xf32>
    %497 = vector.broadcast %495 : vector<16x1xf32> to vector<16x32xf32>
    %498 = arith.mulf %497, %496 : vector<16x32xf32>
    %499 = arith.addf %494, %498 : vector<16x32xf32>
    %500 = vector.extract_strided_slice %388 {offsets = [0, 22], sizes = [16, 1], strides = [1, 1]} : vector<16x32xf32> to vector<16x1xf32>
    %501 = vector.extract_strided_slice %27 {offsets = [0, 704], sizes = [16, 32], strides = [1, 1]} : vector<16x1024xf32> to vector<16x32xf32>
    %502 = vector.broadcast %500 : vector<16x1xf32> to vector<16x32xf32>
    %503 = arith.mulf %502, %501 : vector<16x32xf32>
    %504 = arith.addf %499, %503 : vector<16x32xf32>
    %505 = vector.extract_strided_slice %388 {offsets = [0, 23], sizes = [16, 1], strides = [1, 1]} : vector<16x32xf32> to vector<16x1xf32>
    %506 = vector.extract_strided_slice %27 {offsets = [0, 736], sizes = [16, 32], strides = [1, 1]} : vector<16x1024xf32> to vector<16x32xf32>
    %507 = vector.broadcast %505 : vector<16x1xf32> to vector<16x32xf32>
    %508 = arith.mulf %507, %506 : vector<16x32xf32>
    %509 = arith.addf %504, %508 : vector<16x32xf32>
    %510 = vector.extract_strided_slice %388 {offsets = [0, 24], sizes = [16, 1], strides = [1, 1]} : vector<16x32xf32> to vector<16x1xf32>
    %511 = vector.extract_strided_slice %27 {offsets = [0, 768], sizes = [16, 32], strides = [1, 1]} : vector<16x1024xf32> to vector<16x32xf32>
    %512 = vector.broadcast %510 : vector<16x1xf32> to vector<16x32xf32>
    %513 = arith.mulf %512, %511 : vector<16x32xf32>
    %514 = arith.addf %509, %513 : vector<16x32xf32>
    %515 = vector.extract_strided_slice %388 {offsets = [0, 25], sizes = [16, 1], strides = [1, 1]} : vector<16x32xf32> to vector<16x1xf32>
    %516 = vector.extract_strided_slice %27 {offsets = [0, 800], sizes = [16, 32], strides = [1, 1]} : vector<16x1024xf32> to vector<16x32xf32>
    %517 = vector.broadcast %515 : vector<16x1xf32> to vector<16x32xf32>
    %518 = arith.mulf %517, %516 : vector<16x32xf32>
    %519 = arith.addf %514, %518 : vector<16x32xf32>
    %520 = vector.extract_strided_slice %388 {offsets = [0, 26], sizes = [16, 1], strides = [1, 1]} : vector<16x32xf32> to vector<16x1xf32>
    %521 = vector.extract_strided_slice %27 {offsets = [0, 832], sizes = [16, 32], strides = [1, 1]} : vector<16x1024xf32> to vector<16x32xf32>
    %522 = vector.broadcast %520 : vector<16x1xf32> to vector<16x32xf32>
    %523 = arith.mulf %522, %521 : vector<16x32xf32>
    %524 = arith.addf %519, %523 : vector<16x32xf32>
    %525 = vector.extract_strided_slice %388 {offsets = [0, 27], sizes = [16, 1], strides = [1, 1]} : vector<16x32xf32> to vector<16x1xf32>
    %526 = vector.extract_strided_slice %27 {offsets = [0, 864], sizes = [16, 32], strides = [1, 1]} : vector<16x1024xf32> to vector<16x32xf32>
    %527 = vector.broadcast %525 : vector<16x1xf32> to vector<16x32xf32>
    %528 = arith.mulf %527, %526 : vector<16x32xf32>
    %529 = arith.addf %524, %528 : vector<16x32xf32>
    %530 = vector.extract_strided_slice %388 {offsets = [0, 28], sizes = [16, 1], strides = [1, 1]} : vector<16x32xf32> to vector<16x1xf32>
    %531 = vector.extract_strided_slice %27 {offsets = [0, 896], sizes = [16, 32], strides = [1, 1]} : vector<16x1024xf32> to vector<16x32xf32>
    %532 = vector.broadcast %530 : vector<16x1xf32> to vector<16x32xf32>
    %533 = arith.mulf %532, %531 : vector<16x32xf32>
    %534 = arith.addf %529, %533 : vector<16x32xf32>
    %535 = vector.extract_strided_slice %388 {offsets = [0, 29], sizes = [16, 1], strides = [1, 1]} : vector<16x32xf32> to vector<16x1xf32>
    %536 = vector.extract_strided_slice %27 {offsets = [0, 928], sizes = [16, 32], strides = [1, 1]} : vector<16x1024xf32> to vector<16x32xf32>
    %537 = vector.broadcast %535 : vector<16x1xf32> to vector<16x32xf32>
    %538 = arith.mulf %537, %536 : vector<16x32xf32>
    %539 = arith.addf %534, %538 : vector<16x32xf32>
    %540 = vector.extract_strided_slice %388 {offsets = [0, 30], sizes = [16, 1], strides = [1, 1]} : vector<16x32xf32> to vector<16x1xf32>
    %541 = vector.extract_strided_slice %27 {offsets = [0, 960], sizes = [16, 32], strides = [1, 1]} : vector<16x1024xf32> to vector<16x32xf32>
    %542 = vector.broadcast %540 : vector<16x1xf32> to vector<16x32xf32>
    %543 = arith.mulf %542, %541 : vector<16x32xf32>
    %544 = arith.addf %539, %543 : vector<16x32xf32>
    %545 = vector.extract_strided_slice %388 {offsets = [0, 31], sizes = [16, 1], strides = [1, 1]} : vector<16x32xf32> to vector<16x1xf32>
    %546 = vector.extract_strided_slice %27 {offsets = [0, 992], sizes = [16, 32], strides = [1, 1]} : vector<16x1024xf32> to vector<16x32xf32>
    %547 = vector.broadcast %545 : vector<16x1xf32> to vector<16x32xf32>
    %548 = arith.mulf %547, %546 : vector<16x32xf32>
    %549 = arith.addf %544, %548 : vector<16x32xf32>
    %550 = arith.truncf %549 : vector<16x32xf32> to vector<16x32xbf16>
    %cst_40 = arith.constant dense<0.000000e+00> : vector<8x32xf32>
    %551 = tpu.matmul %43, %550, %cst_40 {dimension_numbers = #tpu.dot_dimension_numbers<[1], [0], [0], [1], [0, 0, 1, 1], [], []>} : vector<8x16xbf16>, vector<16x32xbf16>, vector<8x32xf32> -> vector<8x32xf32>
    %cst_41 = arith.constant dense<0.000000e+00> : vector<8x32xf32>
    %552 = tpu.matmul %387, %44, %cst_41 {dimension_numbers = #tpu.dot_dimension_numbers<[1], [0], [0], [1], [0, 0, 1, 1], [], []>} : vector<8x32xbf16>, vector<32x32xbf16>, vector<8x32xf32> -> vector<8x32xf32>
    %553 = arith.addf %551, %552 : vector<8x32xf32>
    %554 = arith.addf %553, %46 : vector<8x32xf32>
    %cst_42 = arith.constant 0.000000e+00 : f32
    %555 = vector.broadcast %cst_42 : f32 to vector<8x32xf32>
    %556 = arith.maximumf %554, %555 : vector<8x32xf32>
    %cst_43 = arith.constant dense<0.000000e+00> : vector<32xf32>
    %557 = vector.multi_reduction <add>, %556, %cst_43 [0] : vector<8x32xf32> to vector<32xf32>
    %558 = vector.shape_cast %557 : vector<32xf32> to vector<1x32xf32>
    %cst_44 = arith.constant 8.000000e+00 : f32
    %559 = vector.broadcast %cst_44 : f32 to vector<1x32xf32>
    %560 = arith.divf %558, %559 : vector<1x32xf32>
    %561 = vector.broadcast %560 : vector<1x32xf32> to vector<8x32xf32>
    %562 = arith.subf %556, %561 : vector<8x32xf32>
    %563 = arith.mulf %562, %562 : vector<8x32xf32>
    %cst_45 = arith.constant dense<0.000000e+00> : vector<32xf32>
    %564 = vector.multi_reduction <add>, %563, %cst_45 [0] : vector<8x32xf32> to vector<32xf32>
    %565 = vector.shape_cast %564 : vector<32xf32> to vector<1x32xf32>
    %cst_46 = arith.constant 8.000000e+00 : f32
    %566 = vector.broadcast %cst_46 : f32 to vector<1x32xf32>
    %567 = arith.divf %565, %566 : vector<1x32xf32>
    %568 = vector.broadcast %4 : vector<1x32xf32> to vector<8x32xf32>
    %569 = arith.mulf %568, %562 : vector<8x32xf32>
    %cst_47 = arith.constant 9.99999974E-6 : f32
    %570 = vector.broadcast %cst_47 : f32 to vector<1x32xf32>
    %571 = arith.addf %567, %570 : vector<1x32xf32>
    %572 = math.rsqrt %571 : vector<1x32xf32>
    %573 = vector.broadcast %572 : vector<1x32xf32> to vector<8x32xf32>
    %574 = arith.mulf %569, %573 : vector<8x32xf32>
    %575 = vector.broadcast %5 : vector<1x32xf32> to vector<8x32xf32>
    %576 = arith.addf %574, %575 : vector<8x32xf32>
    %577 = arith.truncf %576 : vector<8x32xf32> to vector<8x32xbf16>
    %c64 = arith.constant 64 : index
    %c0_48 = arith.constant 0 : index
    %578 = vector.load %arg4[%c64, %c0_48] : memref<96x1024xbf16, #tpu.memory_space<vmem>>, vector<32x128xbf16>
    %cst_49 = arith.constant dense<0.000000e+00> : vector<8x128xf32>
    %579 = tpu.matmul %577, %578, %cst_49 {dimension_numbers = #tpu.dot_dimension_numbers<[1], [0], [0], [1], [0, 0, 1, 1], [], []>} : vector<8x32xbf16>, vector<32x128xbf16>, vector<8x128xf32> -> vector<8x128xf32>
    %580 = vector.broadcast %6 : vector<1x128xf32> to vector<8x128xf32>
    %581 = arith.addf %579, %580 : vector<8x128xf32>
    %582 = arith.negf %581 : vector<8x128xf32>
    %583 = math.exp %582 : vector<8x128xf32>
    %cst_50 = arith.constant 1.000000e+00 : f32
    %584 = vector.broadcast %cst_50 : f32 to vector<8x128xf32>
    %585 = arith.addf %584, %583 : vector<8x128xf32>
    %586 = arith.divf %584, %585 : vector<8x128xf32>
    %c0_51 = arith.constant 0 : index
    %c0_52 = arith.constant 0 : index
    %587 = vector.load %arg6[%c0_51, %c0_52] : memref<8x128xf32, #tpu.memory_space<vmem>>, vector<8x128xf32>
    tpu.vector_store %arg6[%c0_51, %c0_52], %586 {strides = array<i32>} : memref<8x128xf32, #tpu.memory_space<vmem>>, vector<8x128xf32>,
    return
  }
}

</mosaic_0001>

<bundles_post_ra>
// kernel: mpnn_forward.1
= control target key start
LH: loop header
LB: loop body
LE: loop exit
PB: predicated region body
PF: predicated region fallthrough
CT: control target
= control target key end

     0   :  { %11 = vsyncpa [#allocation3], 0  ;;  %s4395_s0 = inlined_call_operand.vmem [shape: f32[8,6], index: 0, kind: input, shape index: {}]   ;;  %s4396_s1 = inlined_call_operand.vmem [shape: f32[16,5], index: 1, kind: input, shape index: {}]   ;;  %s4397_s2 = inlined_call_operand.vmem [shape: s32[16,1], index: 2, kind: input, shape index: {}]   ;;  %s4398_s3 = inlined_call_operand.vmem [shape: s32[1,16], index: 3, kind: input, shape index: {}]   ;;  %s4399_s4 = inlined_call_operand.hbm [shape: bf16[96,1024], index: 4, kind: input, shape index: {}]   ;;  %s4400_s5 = inlined_call_operand.hbm [shape: f32[8,1024], index: 5, kind: input, shape index: {}]   ;;  %s4401_s6 = inlined_call_operand.vmem [shape: f32[8,128], index: 6, kind: output, shape index: {}]  }
   0x1   :  { %12 = vsyncpa [#allocation5], 0  ;;  %s3130_s21 = smov [#allocation2]  }
   0x2   :  { %s26_s22 = sshll.u32 %s3130_s21, 4  ;;  %s27_s22 = int_to_ptr.vmem [resolvable:$true] %s26_s22 }
   0x3   :  { %s3094_s23 = scalar_lea.vmem %s27_s22, 6144  ;;  %p3099_p1 = scmp.lt.s32.totalorder %s27_s22, %s27_s22 }
   0x4   :  { %p3095_p0 = scmp.ne.s32.totalorder %s27_s22, %s3094_s23  ;;  %p3100_p2 = scmp.lt.s32.totalorder %s3094_s23, %s3094_s23 }
   0x6   :  { %p3101_p3 = por %p3100_p2, %p3099_p1 }
   0x8   :  { %p3102_p4 = pnand %p3101_p3, %p3095_p0 }
   0xa   :  { %3105 = shalt.err (!%p3102_p4)
}
   0xb   :  { %s3131_s24 = smov 512   ;;  %s3132_s25 = smov 32  }
   0xc   :  { %32 = dma.hbm_to_vmem [thread:$0]  %s4399_s4, 6144, %s27_s22, [#allocation3], %s3131_s24, %s3131_s24, %s3132_s25  }
   0xd   :  { %s3133_s28 = smov [#allocation4]  }
   0xe   :  { %s39_s29 = sshll.u32 %s3133_s28, 4  ;;  %s40_s29 = int_to_ptr.vmem [resolvable:$true] %s39_s29 }
   0xf   :  { %s3114_s30 = scalar_lea.vmem %s40_s29, 1024  ;;  %p3119_p6 = scmp.lt.s32.totalorder %s40_s29, %s40_s29 }
  0x10   :  { %p3115_p5 = scmp.ne.s32.totalorder %s40_s29, %s3114_s30  ;;  %p3120_p7 = scmp.lt.s32.totalorder %s3114_s30, %s3114_s30 }
  0x12   :  { %p3121_p8 = por %p3120_p7, %p3119_p6 }
  0x14   :  { %p3122_p9 = pnand %p3121_p8, %p3115_p5 }
  0x16   :  { %3125 = shalt.err (!%p3122_p9)
}
  0x17   :  { %42 = dma.hbm_to_vmem [thread:$0]  %s4400_s5, 1024, %s40_s29, [#allocation5]  }
  0x18   :  { %3126 = dma.done.wait [#allocation3], 6144  }
  0x19   :  { %3127 = vsyncadd [#allocation3], 4294961152 }
  0x1a   :  { %3128 = dma.done.wait [#allocation5], 1024  }
  0x1b   :  { %3129 = vsyncadd [#allocation5], 4294966272  ;;  %vm120_vm0 = vcmask 1041408   ;;  %v4466_v0 = vmov 0.0   ;;  %vm67_vm1 = vcmask 1042432   ;;  %v3135_v1 = vmov 65535  }
  0x1c   :  { %2770 = vmatprep.subr.bf16.mxu1 %v4466_v0  ;;  %2764 = vmatprep.subr.bf16.mxu0 %v4466_v0  ;;  %v121_v2 = vsel %vm120_vm0, 4294967295, %v3135_v1  ;;  %vm3136_vm2 = vmmov 0   ;;  %v4420_v3 = vmov 0   ;;  %v115_v5 = vld [vmem:[#allocation2 + $0x20] sm:$0x7]  ;;  %v113_v7 = vld [vmem:[%s4396_s1 + $0x8] sm:$0xff]  ;;  %v179_v50 = vlaneseq }
  0x1d   :  { %2772 = vmatprep.mubr.msk.bf16.mxu1 %vm3136_vm2, %v4466_v0  ;;  %2766 = vmatprep.mubr.msk.bf16.mxu0 %vm3136_vm2, %v4466_v0  ;;  %v122_v4 = vsel %vm67_vm1, %v121_v2, 0  ;;  %v112_v6 = vld [vmem:[%s4396_s1] sm:$0xff]  ;;  %vm116_vm3 = vcmask 39936   ;;  %vm63_vm4 = vcmask 48128   ;;  %v438_v15 = vld [vmem:[%s4397_s2 + $0x8] sm:$0xff]  ;;  %v172_v24 = vld [vmem:[#allocation2 + $0x50] sm:$0xff] }
  0x1e   :  { %2885 = vset.pattern.permute.xlu0 %v4420_v3  ;;  %v124_v8 = vand.u32 %v122_v4, %v115_v5  ;;  %v62_v9 = vld [vmem:[#allocation2] sm:$0x7]  ;;  %v114_v12 = vpack.c.bf16 %v113_v7, %v112_v6  ;;  %v171_v18 = vld [vmem:[#allocation2 + $0x48] sm:$0xff]  ;;  %v176_v25 = vld [vmem:[#allocation2 + $0x70] sm:$0xff]  ;;  %vm259_vm5 = vcmask 130048   ;;  %vm469_vm6 = vcmask 1043456  }
  0x1f   :  { %v60_v10 = vld [vmem:[%s4395_s0] sm:$0xff]  ;;  %v69_v13 = vsel %vm67_vm1, %v62_v9, 0  ;;  %v175_v20 = vld [vmem:[#allocation2 + $0x68] sm:$0xff]  ;;  %v173_v26 = vld [vmem:[#allocation2 + $0x58] sm:$0xff]  ;;  %v2712_v27 = vcombine.low %v172_v24, %v176_v25  ;;  %v2713_v28 = vcombine.high %v172_v24, %v176_v25  ;;  %v436_v54 = vand.u32 127, %v179_v50  ;;  %s3169_s0 = smov 64  }
  0x20   :  { %v437_v11 = vld [vmem:[%s4397_s2] sm:$0xff]  ;;  %v61_v14 = vpack.c.bf16 %v60_v10, %v60_v10  ;;  %2771 = vmatpush3.bf16.msra.mxu1 %v124_v8  ;;  %2765 = vmatpush3.bf16.msra.mxu0 %v69_v13  ;;  %v2710_v22 = vcombine.low %v171_v18, %v175_v20  ;;  %v2711_v23 = vcombine.high %v171_v18, %v175_v20  ;;  %v177_v29 = vld [vmem:[#allocation2 + $0x78] sm:$0xff]  ;;  %vm465_vm9 = vcmask 64512   ;;  %s3170_s2 = smov 96  }
  0x21   :  { %440 = vperm.xlu0 %2885, %v437_v11   ;;  %v170_v16 = vld [vmem:[#allocation2 + $0x40] sm:$0xff]  ;;  %v2714_v30 = vcombine.low %v173_v26, %v177_v29  ;;  %v2715_v31 = vcombine.high %v173_v26, %v177_v29  ;;  %vm1105_vm10 = vcmask 261120   ;;  %v4448_v1 = vmov 1  }
  0x22   :  { %v174_v17 = vld [vmem:[#allocation2 + $0x60] sm:$0xff]  ;;  %320 = vmatprep.subr.bf16.mxu1 %v2711_v23  ;;  %2886 = vset.pattern.permute.xlu1 %v4448_v1  ;;  %v4462_v2 = vmov 2   ;;  %v3274_v4 = vshrl.u32 %v179_v50, 7  ;;  %v4460_v50 = vmov 11  }
  0x23   :  { %2773 = vmatmul.mubr.msk.bf16.vlgmr.msra.gmra.mxu1 %vm116_vm3, %v114_v12  ;;  %2767 = vmatmul.mubr.msk.bf16.vlgmr.msra.gmra.mxu0 %vm63_vm4, %v61_v14  ;;  %v2709_v19 = vcombine.high %v170_v16, %v174_v17  ;;  %v2708_v21 = vcombine.low %v170_v16, %v174_v17  ;;  %v51_v32 = vld [vmem:[#allocation4 + $0x1] ss:$0 sm:$0xff]  ;;  %v50_v36 = vld [vmem:[#allocation4] ss:$0 sm:$0xff] }
  0x24   :  { %295 = vmatprep.mubr.bf16.mxu0 %v4420_v3  ;;  %338 = vmatprep.mubr.bf16.mxu1 %v4420_v3  ;;  %v462_v52 = vld [vmem:[#allocation2 + $0xc0] sm:$0xf]  ;;  %v185_v9 = vsub.s32 1, %v3274_v4  ;;  %v193_v10 = vsub.s32 3, %v3274_v4  ;;  %v201_v24 = vsub.s32 5, %v3274_v4 }
  0x25   :  { %443 = vperm.xlu0 %2885, %v438_v15   ;;  %277 = vmatprep.subr.bf16.mxu0 %v2709_v19  ;;  %v463_v53 = vld [vmem:[#allocation2 + $0xe0] sm:$0xf] }
  0x26   :  { %278 = vmatpush1.bf16.msra.mxu0 %v2708_v21  ;;  %321 = vmatpush1.bf16.msra.mxu1 %v2710_v22  ;;  %v3245_v56 = vcombine.low %v462_v52, %v463_v53  ;;  %v460_v58 = vld [vmem:[#allocation2 + $0x80] sm:$0xf]  ;;  %v4410_v52 = vmov 13   ;;  %v4456_v53 = vmov 15  }
  0x27   :  { %363 = vmatprep.subr.bf16.mxu0 %v2713_v28  ;;  %406 = vmatprep.subr.bf16.mxu1 %v2715_v31  ;;  %v461_v59 = vld [vmem:[#allocation2 + $0xa0] sm:$0xf] }
  0x28   :  { %v3251_v60 = vcombine.low %v460_v58, %v461_v59  ;;  %v53_v5 = vld [vmem:[#allocation4 + $0x2] ss:$8 sm:$0xf]  ;;  %v4452_v58 = vmov 19   ;;  %v4430_v59 = vmov 20  }
  0x29   :  { %2887 = vset.pattern.permute.xlu0 %v4462_v2  ;;  %v54_v6 = vld [vmem:[#allocation4 + $0x2] ss:$8 sm:$0xf0] }
  0x2a   :  { %v3286_v13 = vor.u32 %v54_v6, %v53_v5  ;;  %v4434_v5 = vmov 25   ;;  %v4412_v6 = vmov 27  }
  0x2c   :  { %v3293_v16 = vrot.slane %v3286_v13, %v185_v9  ;;  %v3296_v17 = vrot.slane %v3286_v13, %v193_v10  ;;  %v3318_v29 = vrot.slane %v3286_v13, %v201_v24  ;;  %v4426_v9 = vmov 29  }
  0x2d   :  { %v4408_v10 = vmov 30   ;;  %v4404_v24 = vmov 16  }
  0x9c   :  { %v441_v49 = vpop.permute.xlu0 %440 }
  0x9d   :  { %vm445_vm7 = vcmp.eq.s32.totalorder %v436_v54, %v441_v49  ;;  %v4438_v49 = vmov 22  }
  0x9e   :  { %v447_v61 = vsel %vm445_vm7, 1.0, %v4466_v0 }
  0xa0   :  { %v444_v55 = vpop.permute.xlu0 %443 }
  0xa1   :  { %vm446_vm8 = vcmp.eq.s32.totalorder %v436_v54, %v444_v55  ;;  %v4424_v54 = vmov 4   ;;  %v4418_v55 = vmov 17  }
  0xa2   :  { %v448_v62 = vsel %vm446_vm8, 1.0, %v4466_v0 }
  0xa3   :  { %v3262_v63 = vpack.c.bf16 %v448_v62, %v447_v61  ;;  %v4414_v61 = vmov 21   ;;  %v4444_v62 = vmov 23  }
  0xe3   :  { %v160_v33 = vpop.f32.mrf.mxu1  ;;  %v105_v34 = vpop.f32.mrf.mxu0 }
  0xe4   :  { %v161_v38 = vadd.f32 %v160_v33, %v51_v32  ;;  %v106_v42 = vadd.f32 %v105_v34, %v50_v36 }
  0xe5   :  { %v2774_v35 = vpop.f32.mrf.mxu1  ;;  %v2768_v37 = vpop.f32.mrf.mxu0 }
  0xe6   :  { %v167_v45 = vmax.f32 %v161_v38, 0.0  ;;  %v111_v48 = vmax.f32 %v106_v42, 0.0 }
  0xe7   :  { %v163_v39 = vpop.f32.mrf.mxu1  ;;  %v108_v40 = vpop.f32.mrf.mxu0 }
  0xe8   :  { %v164_v41 = vadd.f32 %v163_v39, %v51_v32  ;;  %v464_v51 = vpack.c.bf16 %v111_v48, %v111_v48  ;;  %v4454_v39 = vmov 6   ;;  %v4446_v40 = vmov 3  }
  0xe9   :  { %v2775_v43 = vpop.f32.mrf.mxu1  ;;  %v2769_v44 = vpop.f32.mrf.mxu0  ;;  %v4450_v48 = vmov 9  }
  0xea   :  { %v168_v46 = vmax.f32 %v164_v41, 0.0  ;;  %v471_v57 = vsel %vm469_vm6, %v464_v51, 0  ;;  %v4442_v43 = vmov 10   ;;  %v4458_v44 = vmov 5  }
  0xec   :  { %v169_v47 = vpack.c.bf16 %v168_v46, %v167_v45  ;;  %v4440_v45 = vmov 14   ;;  %v4464_v46 = vmov 7  }
  0xee   :  { %2716 = vmatmul.mubr.msk.bf16.vlgmr.msra.gmra.mxu0 %vm259_vm5, %v169_v47  ;;  %2717 = vmatmul.mubr.msk.bf16.vlgmr.msra.gmra.mxu1 %vm259_vm5, %v169_v47 }
  0xef   :  { %364 = vmatpush1.bf16.msra.mxu0 %v2712_v27  ;;  %407 = vmatpush1.bf16.msra.mxu1 %v2714_v30 }
  0xf0   :  { %381 = vmatprep.mubr.bf16.mxu0 %v4420_v3  ;;  %424 = vmatprep.mubr.bf16.mxu1 %v4420_v3 }
  0xf1   :  { %2782 = vmatprep.subr.bf16.mxu1 %v4466_v0  ;;  %2776 = vmatprep.subr.bf16.mxu0 %v4466_v0 }
  0xf6   :  { %2718 = vmatmul.mubr.msk.bf16.vlgmr.msra.gmra.mxu0 %vm259_vm5, %v169_v47  ;;  %2719 = vmatmul.mubr.msk.bf16.vlgmr.msra.gmra.mxu1 %vm259_vm5, %v169_v47  ;;  %v4416_v47 = vmov 18  }
  0xf7   :  { %2783 = vmatpush3.bf16.msra.mxu1 %v3245_v56  ;;  %2777 = vmatpush3.bf16.msra.mxu0 %v471_v57  ;;  %v4428_v57 = vmov 12  }
  0xf8   :  { %2784 = vmatprep.subr.bf16.mxu1 %v4466_v0  ;;  %2778 = vmatprep.mubr.msk.bf16.mxu0 %vm3136_vm2, %v4466_v0 }
  0xf9   :  { %2786 = vmatprep.mubr.msk.bf16.mxu1 %vm3136_vm2, %v4466_v0  ;;  %2790 = vmatprep.subr.bf16.mxu0 %v4466_v0 }
  0xfb   :  { %2785 = vmatpush3.bf16.msra.mxu1 %v3251_v60 }
  0xfc   :  { %2796 = vmatprep.subr.bf16.mxu1 %v4466_v0 }
  0xfe   :  { %2779 = vmatmul.mubr.msk.bf16.vlgmr.msra.gmra.mxu0 %vm465_vm9, %v3262_v63  ;;  %2787 = vmatmul.mubr.msk.bf16.vlgmr.msra.gmra.mxu1 %vm1105_vm10, %v464_v51  ;;  %v4432_v51 = vmov 26  }
  0xff   :  { %2792 = vmatprep.mubr.msk.bf16.mxu0 %vm3136_vm2, %v4466_v0  ;;  %2798 = vmatprep.mubr.msk.bf16.mxu1 %vm3136_vm2, %v4466_v0 }
 0x1ae   :  { %v3276_v7 = vpop.f32.mrf.mxu0  ;;  %v3278_v8 = vpop.f32.mrf.mxu1 }
 0x1b0   :  { %v3282_v11 = vpop.f32.mrf.mxu0  ;;  %v3284_v12 = vpop.f32.mrf.mxu1 }
 0x1b2   :  { %v3288_v14 = vpop.f32.mrf.mxu0  ;;  %v3290_v15 = vpop.f32.mrf.mxu1 }
 0x1b4   :  { %v303_v18 = vpop.f32.mrf.mxu0  ;;  %v346_v19 = vpop.f32.mrf.mxu1 }
 0x1b5   :  { %v3299_v20 = vadd.f32 %v303_v18, %v3293_v16  ;;  %v3302_v21 = vadd.f32 %v346_v19, %v3296_v17  ;;  %v4422_v18 = vmov 31   ;;  %v4406_v19 = vmov 8  }
 0x1b6   :  { %v3304_v22 = vpop.f32.mrf.mxu0  ;;  %v3306_v23 = vpop.f32.mrf.mxu1 }
 0x1b8   :  { %v3309_v25 = vpop.f32.mrf.mxu0  ;;  %v3311_v26 = vpop.f32.mrf.mxu1 }
 0x1ba   :  { %v3313_v27 = vpop.f32.mrf.mxu0  ;;  %v3315_v28 = vpop.f32.mrf.mxu1 }
 0x1bc   :  { %v389_v30 = vpop.f32.mrf.mxu0  ;;  %v3320_v31 = vpop.f32.mrf.mxu1 }
 0x1bd   :  { %v3323_v32 = vadd.f32 %v389_v30, %v3318_v29  ;;  %v4402_v30 = vmov 24  }
 0x1be   :  { %v3325_v33 = vpop.f32.mrf.mxu0  ;;  %v3327_v34 = vpop.f32.mrf.mxu1 }
 0x1bf   :  { %549 = vperm.xlu0 %2887, %v3325_v33   ;;  %529 = vperm.xlu1 %2886, %v3325_v33  }
 0x1c0   :  { %v2780_v35 = vpop.f32.mrf.mxu0  ;;  %v2788_v36 = vpop.f32.mrf.mxu1 }
 0x1c2   :  { %v3331_v37 = vpop.f32.mrf.mxu0  ;;  %v1145_v38 = vpop.f32.mrf.mxu1 }
 0x1c3   :  { %2890 = vset.pattern.permute.xlu0 %v4454_v39  ;;  %2888 = vset.pattern.permute.xlu1 %v4446_v40  ;;  %v3431_v38 = vadd.f32 %v3282_v11, %v3293_v16 }
 0x1c4   :  { %v2789_v41 = vpop.f32.mrf.mxu1  ;;  %621 = vperm.xlu0 %2890, %v3325_v33   ;;  %569 = vperm.xlu1 %2888, %v3325_v33   ;;  %v2781_v42 = vpop.f32.mrf.mxu0 }
 0x1c5   :  { %4505 = vst [vmem:[#allocation8_spill] sm:$0xff] %v3431_v38 }
 0x1c8   :  { %2893 = vset.pattern.permute.xlu0 %v4442_v43  ;;  %2889 = vset.pattern.permute.xlu1 %v4458_v44 }
 0x1c9   :  { %693 = vperm.xlu0 %2893, %v3325_v33   ;;  %601 = vperm.xlu1 %2889, %v3325_v33  }
 0x1cd   :  { %2896 = vset.pattern.permute.xlu0 %v4440_v45  ;;  %2891 = vset.pattern.permute.xlu1 %v4464_v46 }
 0x1ce   :  { %765 = vperm.xlu0 %2896, %v3325_v33   ;;  %641 = vperm.xlu1 %2891, %v3325_v33  }
 0x1d2   :  { %2899 = vset.pattern.permute.xlu0 %v4416_v47  ;;  %2892 = vset.pattern.permute.xlu1 %v4450_v48 }
 0x1d3   :  { %837 = vperm.xlu0 %2899, %v3325_v33   ;;  %673 = vperm.xlu1 %2892, %v3325_v33  }
 0x1d7   :  { %2902 = vset.pattern.permute.xlu0 %v4438_v49  ;;  %2894 = vset.pattern.permute.xlu1 %v4460_v50 }
 0x1d8   :  { %909 = vperm.xlu0 %2902, %v3325_v33   ;;  %713 = vperm.xlu1 %2894, %v3325_v33  }
 0x1dc   :  { %2905 = vset.pattern.permute.xlu0 %v4432_v51  ;;  %2895 = vset.pattern.permute.xlu1 %v4410_v52 }
 0x1dd   :  { %981 = vperm.xlu0 %2905, %v3325_v33   ;;  %745 = vperm.xlu1 %2895, %v3325_v33  }
 0x1e1   :  { %2908 = vset.pattern.permute.xlu0 %v4420_v3  ;;  %2897 = vset.pattern.permute.xlu1 %v4456_v53 }
 0x1e2   :  { %516 = vperm.xlu0 %2908, %v3325_v33   ;;  %785 = vperm.xlu1 %2897, %v3325_v33  }
 0x1e6   :  { %2911 = vset.pattern.permute.xlu0 %v4424_v54  ;;  %2898 = vset.pattern.permute.xlu1 %v4418_v55 }
 0x1e7   :  { %589 = vperm.xlu0 %2911, %v3325_v33   ;;  %817 = vperm.xlu1 %2898, %v3325_v33  }
 0x1eb   :  { %2913 = vset.pattern.permute.xlu0 %v4428_v57  ;;  %2900 = vset.pattern.permute.xlu1 %v4452_v58 }
 0x1ec   :  { %733 = vperm.xlu0 %2913, %v3325_v33   ;;  %857 = vperm.xlu1 %2900, %v3325_v33  }
 0x1f0   :  { %2915 = vset.pattern.permute.xlu0 %v4430_v59  ;;  %2901 = vset.pattern.permute.xlu1 %v4414_v61 }
 0x1f1   :  { %877 = vperm.xlu0 %2915, %v3325_v33   ;;  %889 = vperm.xlu1 %2901, %v3325_v33  }
 0x1f5   :  { %2919 = vset.pattern.permute.xlu0 %v4446_v40  ;;  %2903 = vset.pattern.permute.xlu1 %v4444_v62 }
 0x1f6   :  { %929 = vperm.xlu1 %2903, %v3325_v33   ;;  %573 = vperm.xlu0 %2919, %v3331_v37  }
 0x1fa   :  { %2904 = vset.pattern.permute.xlu1 %v4434_v5  ;;  %2922 = vset.pattern.permute.xlu0 %v4464_v46 }
 0x1fb   :  { %961 = vperm.xlu1 %2904, %v3325_v33   ;;  %645 = vperm.xlu0 %2922, %v3331_v37  }
 0x1ff   :  { %2906 = vset.pattern.permute.xlu1 %v4412_v6  ;;  %2925 = vset.pattern.permute.xlu0 %v4460_v50 }
 0x200   :  { %1001 = vperm.xlu1 %2906, %v3325_v33   ;;  %717 = vperm.xlu0 %2925, %v3331_v37  }
 0x204   :  { %2907 = vset.pattern.permute.xlu1 %v4426_v9  ;;  %2928 = vset.pattern.permute.xlu0 %v4456_v53 }
 0x205   :  { %1033 = vperm.xlu1 %2907, %v3325_v33   ;;  %789 = vperm.xlu0 %2928, %v3331_v37  }
 0x209   :  { %2909 = vset.pattern.permute.xlu1 %v4408_v10  ;;  %2931 = vset.pattern.permute.xlu0 %v4452_v58 }
 0x20a   :  { %1053 = vperm.xlu1 %2909, %v3325_v33   ;;  %861 = vperm.xlu0 %2931, %v3331_v37  }
 0x20e   :  { %2910 = vset.pattern.permute.xlu1 %v4422_v18  ;;  %2934 = vset.pattern.permute.xlu0 %v4444_v62 }
 0x20f   :  { %1073 = vperm.xlu1 %2910, %v3325_v33   ;;  %933 = vperm.xlu0 %2934, %v3331_v37  }
 0x213   :  { %2912 = vset.pattern.permute.xlu1 %v4406_v19  ;;  %2937 = vset.pattern.permute.xlu0 %v4412_v6 }
 0x214   :  { %661 = vperm.xlu1 %2912, %v3325_v33   ;;  %1005 = vperm.xlu0 %2937, %v3331_v37  }
 0x218   :  { %2914 = vset.pattern.permute.xlu1 %v4404_v24  ;;  %2940 = vset.pattern.permute.xlu0 %v4408_v10 }
 0x219   :  { %805 = vperm.xlu1 %2914, %v3325_v33   ;;  %1057 = vperm.xlu0 %2940, %v3331_v37  }
 0x21d   :  { %2916 = vset.pattern.permute.xlu1 %v4402_v30  ;;  %2943 = vset.pattern.permute.xlu0 %v4406_v19 }
 0x21e   :  { %949 = vperm.xlu1 %2916, %v3325_v33   ;;  %665 = vperm.xlu0 %2943, %v3331_v37  }
 0x222   :  { %2917 = vset.pattern.permute.xlu1 %v4448_v1  ;;  %2945 = vset.pattern.permute.xlu0 %v4404_v24 }
 0x223   :  { %809 = vperm.xlu0 %2945, %v3331_v37   ;;  %533 = vperm.xlu1 %2917, %v3331_v37  }
 0x227   :  { %2947 = vset.pattern.permute.xlu0 %v4402_v30  ;;  %2918 = vset.pattern.permute.xlu1 %v4462_v2  ;;  %v4436_v30 = vmov 28  }
 0x228   :  { %953 = vperm.xlu0 %2947, %v3331_v37   ;;  %553 = vperm.xlu1 %2918, %v3331_v37  }
 0x22c   :  { %2920 = vset.pattern.permute.xlu1 %v4458_v44  ;;  %2948 = vset.pattern.permute.xlu0 %v4436_v30 }
 0x22d   :  { %605 = vperm.xlu1 %2920, %v3331_v37  }
 0x231   :  { %2921 = vset.pattern.permute.xlu1 %v4454_v39 }
 0x232   :  { %625 = vperm.xlu1 %2921, %v3331_v37  }
 0x236   :  { %2923 = vset.pattern.permute.xlu1 %v4450_v48 }
 0x237   :  { %677 = vperm.xlu1 %2923, %v3331_v37  }
 0x23a   :  { %v3423_v35 = vpop.permute.xlu0 %549  ;;  %v3425_v36 = vpop.permute.xlu1 %529 }
 0x23b   :  { %2924 = vset.pattern.permute.xlu1 %v4442_v43 }
 0x23c   :  { %697 = vperm.xlu1 %2924, %v3331_v37  }
 0x23f   :  { %v622_v41 = vpop.permute.xlu0 %621  ;;  %v3433_v42 = vpop.permute.xlu1 %569 }
 0x240   :  { %v628_v24 = vmul.f32 %v622_v41, %v3431_v38  ;;  %2926 = vset.pattern.permute.xlu1 %v4410_v52  ;;  %v3451_v52 = vadd.f32 %v3284_v12, %v3296_v17 }
 0x241   :  { %749 = vperm.xlu1 %2926, %v3331_v37  }
 0x242   :  { %632 = vrot.lane.b32.xlu0 %v628_v24, %s3169_s0  ;;  %4506 = vst [vmem:[#allocation9_spill] sm:$0xff] %v3451_v52 }
 0x244   :  { %v3440_v19 = vpop.permute.xlu1 %601  ;;  %v3442_v10 = vpop.permute.xlu0 %693 }
 0x245   :  { %2927 = vset.pattern.permute.xlu1 %v4440_v45 }
 0x246   :  { %769 = vperm.xlu1 %2927, %v3331_v37  }
 0x249   :  { %v642_v11 = vpop.permute.xlu1 %641  ;;  %v766_v41 = vpop.permute.xlu0 %765 }
 0x24a   :  { %2929 = vset.pattern.permute.xlu1 %v4418_v55  ;;  %v648_v16 = vmul.f32 %v642_v11, %v3431_v38  ;;  %v772_v24 = vmul.f32 %v766_v41, %v3451_v52 }
 0x24b   :  { %821 = vperm.xlu1 %2929, %v3331_v37  }
 0x24c   :  { %652 = vrot.lane.b32.xlu0 %v648_v16, %s3132_s25 }
 0x24e   :  { %v3455_v6 = vpop.permute.xlu1 %673  ;;  %v3466_v17 = vpop.permute.xlu0 %837 }
 0x24f   :  { %2930 = vset.pattern.permute.xlu1 %v4416_v47 }
 0x250   :  { %776 = vrot.lane.b32.xlu0 %v772_v24, %s3169_s0  ;;  %841 = vperm.xlu1 %2930, %v3331_v37  }
 0x253   :  { %v3460_v11 = vpop.permute.xlu1 %713  ;;  %v910_v24 = vpop.permute.xlu0 %909 }
 0x254   :  { %2932 = vset.pattern.permute.xlu1 %v4414_v61  ;;  %v3475_v61 = vadd.f32 %v3309_v25, %v3318_v29 }
 0x255   :  { %893 = vperm.xlu1 %2932, %v3331_v37  }
 0x256   :  { %v916_v47 = vmul.f32 %v910_v24, %v3475_v61  ;;  %v181_v24 = vsub.s32 0, %v3274_v4 }
 0x258   :  { %v3464_v12 = vpop.permute.xlu1 %745 }
 0x259   :  { %2933 = vset.pattern.permute.xlu1 %v4438_v49  ;;  %v752_v62 = vmul.f32 %v3464_v12, %v3451_v52 }
 0x25a   :  { %913 = vperm.xlu1 %2933, %v3331_v37  }
 0x25d   :  { %v786_v16 = vpop.permute.xlu1 %785 }
 0x25e   :  { %2935 = vset.pattern.permute.xlu1 %v4434_v5  ;;  %v792_v41 = vmul.f32 %v786_v16, %v3451_v52 }
 0x25f   :  { %965 = vperm.xlu1 %2935, %v3331_v37  }
 0x260   :  { %796 = vrot.lane.b32.xlu0 %v792_v41, %s3132_s25 }
 0x262   :  { %v3479_v55 = vpop.permute.xlu1 %817 }
 0x263   :  { %2936 = vset.pattern.permute.xlu1 %v4432_v51 }
 0x264   :  { %920 = vrot.lane.b32.xlu0 %v916_v47, %s3169_s0  ;;  %985 = vperm.xlu1 %2936, %v3331_v37  }
 0x267   :  { %v3484_v16 = vpop.permute.xlu1 %857 }
 0x268   :  { %2938 = vset.pattern.permute.xlu1 %v4426_v9 }
 0x269   :  { %1037 = vperm.xlu1 %2938, %v3331_v37  }
 0x26c   :  { %v3488_v25 = vpop.permute.xlu1 %889 }
 0x26d   :  { %2939 = vset.pattern.permute.xlu1 %v4420_v3 }
 0x26e   :  { %521 = vperm.xlu1 %2939, %v3331_v37  }
 0x271   :  { %v930_v29 = vpop.permute.xlu1 %929 }
 0x272   :  { %2941 = vset.pattern.permute.xlu1 %v4422_v18  ;;  %v936_v41 = vmul.f32 %v930_v29, %v3475_v61  ;;  %v182_v29 = vrot.slane %v3286_v13, %v181_v24 }
 0x273   :  { %1077 = vperm.xlu1 %2941, %v3331_v37  }
 0x274   :  { %940 = vrot.lane.b32.xlu0 %v936_v41, %s3132_s25  ;;  %v3510_v41 = vadd.f32 %v3276_v7, %v182_v29  ;;  %v189_v7 = vsub.s32 2, %v3274_v4 }
 0x276   :  { %v3496_v47 = vpop.permute.xlu1 %961  ;;  %4507 = vst [vmem:[#allocation10_spill] sm:$0xff] %v3510_v41  ;;  %v556_v24 = vmul.f32 %v3423_v35, %v3510_v41  ;;  %v608_v35 = vmul.f32 %v3440_v19, %v3431_v38 }
 0x277   :  { %2942 = vset.pattern.permute.xlu1 %v4424_v54  ;;  %v536_v54 = vmul.f32 %v3425_v36, %v3510_v41  ;;  %v576_v36 = vmul.f32 %v3433_v42, %v3510_v41 }
 0x278   :  { %593 = vperm.xlu1 %2942, %v3331_v37  }
 0x27b   :  { %v3501_v3 = vpop.permute.xlu1 %1001 }
 0x27c   :  { %2944 = vset.pattern.permute.xlu1 %v4428_v57  ;;  %v3518_v57 = vpop.permute.xlu0 %981 }
 0x27d   :  { %737 = vperm.xlu1 %2944, %v3331_v37  }
 0x280   :  { %v3506_v18 = vpop.permute.xlu1 %1033  ;;  %v3529_v51 = vpop.permute.xlu0 %516 }
 0x281   :  { %2946 = vset.pattern.permute.xlu1 %v4430_v59 }
 0x282   :  { %881 = vperm.xlu1 %2946, %v3331_v37  }
 0x285   :  { %v3515_v9 = vpop.permute.xlu1 %1053 }
 0x286   :  { %540 = vrot.lane.b32.xlu1 %v536_v54, %s3170_s2  ;;  %v190_v54 = vrot.slane %v3286_v13, %v189_v7 }
 0x287   :  { %2949 = vset.pattern.permute.xlu1 %v4436_v30 }
 0x288   :  { %v3538_v30 = vadd.f32 %v3278_v8, %v190_v54  ;;  %v197_v8 = vsub.s32 4, %v3274_v4 }
 0x28a   :  { %v3524_v59 = vpop.permute.xlu1 %1073  ;;  %560 = vrot.lane.b32.xlu1 %v556_v24, %s3169_s0  ;;  %4508 = vst [vmem:[#allocation11_spill] sm:$0xff] %v3538_v30  ;;  %v3541_v24 = vpop.permute.xlu0 %589  ;;  %v680_v42 = vmul.f32 %v3455_v6, %v3538_v30  ;;  %v700_v7 = vmul.f32 %v3442_v10, %v3538_v30  ;;  %v3559_v6 = vadd.f32 %v3288_v14, %v182_v29 }
 0x28b   :  { %v198_v45 = vrot.slane %v3286_v13, %v197_v8 }
 0x28c   :  { %4509 = vst [vmem:[#allocation12_spill] sm:$0xff] %v3559_v6 }
 0x28e   :  { %580 = vrot.lane.b32.xlu1 %v576_v36, %s3132_s25  ;;  %v3550_v36 = vpop.permute.xlu0 %733 }
 0x28f   :  { %v3533_v5 = vpop.permute.xlu1 %661 }
 0x292   :  { %612 = vrot.lane.b32.xlu1 %v608_v35, %s3170_s2  ;;  %v720_v35 = vmul.f32 %v3460_v11, %v3538_v30  ;;  %v3563_v10 = vpop.permute.xlu0 %877 }
 0x294   :  { %v3545_v49 = vpop.permute.xlu1 %805 }
 0x296   :  { %684 = vrot.lane.b32.xlu1 %v680_v42, %s3170_s2  ;;  %v574_v8 = vpop.permute.xlu0 %573 }
 0x299   :  { %v3552_v19 = vpop.permute.xlu1 %949 }
 0x29a   :  { %704 = vrot.lane.b32.xlu1 %v700_v7, %s3169_s0  ;;  %v3570_v7 = vadd.f32 %v3304_v22, %v198_v45  ;;  %v577_v22 = vmul.f32 %v574_v8, %v3559_v6 }
 0x29c   :  { %v824_v11 = vmul.f32 %v3479_v55, %v3570_v7  ;;  %v844_v12 = vmul.f32 %v3466_v17, %v3570_v7  ;;  %v864_v55 = vmul.f32 %v3484_v16, %v3570_v7 }
 0x29e   :  { %724 = vrot.lane.b32.xlu1 %v720_v35, %s3132_s25  ;;  %v534_v42 = vpop.permute.xlu1 %533  ;;  %v896_v35 = vmul.f32 %v3488_v25, %v3475_v61 }
 0x29f   :  { %v537_v43 = vmul.f32 %v534_v42, %v3559_v6  ;;  %v3589_v42 = vadd.f32 %v3290_v15, %v190_v54  ;;  %v205_v15 = vsub.s32 6, %v3274_v4 }
 0x2a1   :  { %542 = vrot.lane.b32.xlu0 %v537_v43, %s3170_s2 }
 0x2a2   :  { %756 = vrot.lane.b32.xlu1 %v752_v62, %s3170_s2 }
 0x2a3   :  { %v554_v14 = vpop.permute.xlu1 %553 }
 0x2a4   :  { %v557_v29 = vmul.f32 %v554_v14, %v3559_v6  ;;  %v646_v14 = vpop.permute.xlu0 %645 }
 0x2a5   :  { %v649_v54 = vmul.f32 %v646_v14, %v3299_v20  ;;  %v3614_v14 = vadd.f32 %v3313_v27, %v198_v45 }
 0x2a6   :  { %828 = vrot.lane.b32.xlu1 %v824_v11, %s3170_s2  ;;  %562 = vrot.lane.b32.xlu0 %v557_v29, %s3169_s0 }
 0x2a8   :  { %v606_v43 = vpop.permute.xlu1 %605 }
 0x2a9   :  { %v609_v29 = vmul.f32 %v606_v43, %v3299_v20 }
 0x2aa   :  { %848 = vrot.lane.b32.xlu1 %v844_v12, %s3169_s0  ;;  %582 = vrot.lane.b32.xlu0 %v577_v22, %s3132_s25  ;;  %v718_v12 = vpop.permute.xlu0 %717 }
 0x2ab   :  { %v721_v43 = vmul.f32 %v718_v12, %v3589_v42 }
 0x2ad   :  { %v626_v62 = vpop.permute.xlu1 %625 }
 0x2ae   :  { %868 = vrot.lane.b32.xlu1 %v864_v55, %s3132_s25  ;;  %v629_v8 = vmul.f32 %v626_v62, %v3299_v20  ;;  %v206_v55 = vrot.slane %v3286_v13, %v205_v15 }
 0x2b2   :  { %900 = vrot.lane.b32.xlu1 %v896_v35, %s3170_s2  ;;  %v678_v17 = vpop.permute.xlu1 %677  ;;  %v3607_v35 = vadd.f32 %v3306_v23, %v206_v55 }
 0x2b3   :  { %v681_v11 = vmul.f32 %v678_v17, %v3589_v42 }
 0x2b4   :  { %v968_v17 = vmul.f32 %v3496_v47, %v3607_v35  ;;  %v988_v12 = vmul.f32 %v3518_v57, %v3607_v35  ;;  %v209_v57 = vsub.s32 7, %v3274_v4 }
 0x2b5   :  { %686 = vrot.lane.b32.xlu0 %v681_v11, %s3170_s2 }
 0x2b6   :  { %614 = vrot.lane.b32.xlu1 %v609_v29, %s3170_s2  ;;  %v790_v29 = vpop.permute.xlu0 %789 }
 0x2b7   :  { %v698_v16 = vpop.permute.xlu1 %697  ;;  %v793_v47 = vmul.f32 %v790_v29, %v3302_v21 }
 0x2b8   :  { %v701_v25 = vmul.f32 %v698_v16, %v3589_v42 }
 0x2ba   :  { %634 = vrot.lane.b32.xlu1 %v629_v8, %s3169_s0  ;;  %706 = vrot.lane.b32.xlu0 %v701_v25, %s3169_s0  ;;  %v862_v45 = vpop.permute.xlu0 %861 }
 0x2bb   :  { %v865_v25 = vmul.f32 %v862_v45, %v3614_v14 }
 0x2bc   :  { %v750_v22 = vpop.permute.xlu1 %749 }
 0x2bd   :  { %v753_v23 = vmul.f32 %v750_v22, %v3302_v21  ;;  %v3636_v22 = vadd.f32 %v3315_v28, %v206_v55 }
 0x2be   :  { %654 = vrot.lane.b32.xlu1 %v649_v54, %s3132_s25  ;;  %726 = vrot.lane.b32.xlu0 %v721_v43, %s3132_s25 }
 0x2c1   :  { %v770_v62 = vpop.permute.xlu1 %769 }
 0x2c2   :  { %1025 = vperm.xlu1 %2949, %v3331_v37   ;;  %1021 = vperm.xlu0 %2948, %v3325_v33   ;;  %v773_v27 = vmul.f32 %v770_v62, %v3302_v21  ;;  %v934_v62 = vpop.permute.xlu0 %933 }
 0x2c6   :  { %972 = vrot.lane.b32.xlu1 %v968_v17, %s3170_s2  ;;  %v822_v11 = vpop.permute.xlu1 %821  ;;  %2952 = vset.pattern.permute.xlu0 %v4446_v40  ;;  %v1006_v55 = vpop.permute.xlu0 %1005 }
 0x2c7   :  { %v825_v16 = vmul.f32 %v822_v11, %v3614_v14  ;;  %2950 = vset.pattern.permute.xlu1 %v4448_v1 }
 0x2c9   :  { %830 = vrot.lane.b32.xlu0 %v825_v16, %s3170_s2  ;;  %v937_v16 = vmul.f32 %v934_v62, %v3323_v32 }
 0x2ca   :  { %758 = vrot.lane.b32.xlu1 %v753_v23, %s3170_s2  ;;  %v210_v23 = vrot.slane %v3286_v13, %v209_v57 }
 0x2cb   :  { %v842_v33 = vpop.permute.xlu1 %841 }
 0x2cc   :  { %v845_v37 = vmul.f32 %v842_v33, %v3614_v14  ;;  %v1008_v33 = vmul.f32 %v3501_v3, %v3607_v35  ;;  %v3653_v45 = vadd.f32 %v3311_v26, %v210_v23 }
 0x2ce   :  { %778 = vrot.lane.b32.xlu1 %v773_v27, %s3169_s0  ;;  %850 = vrot.lane.b32.xlu0 %v845_v37, %s3169_s0  ;;  %v1009_v37 = vmul.f32 %v1006_v55, %v3636_v22  ;;  %v1040_v13 = vmul.f32 %v3506_v18, %v3653_v45  ;;  %v1060_v26 = vmul.f32 %v3515_v9, %v3653_v45 }
 0x2d0   :  { %v894_v8 = vpop.permute.xlu1 %893 }
 0x2d1   :  { %v897_v54 = vmul.f32 %v894_v8, %v3323_v32 }
 0x2d2   :  { %798 = vrot.lane.b32.xlu1 %v793_v47, %s3132_s25  ;;  %870 = vrot.lane.b32.xlu0 %v865_v25, %s3132_s25  ;;  %v3656_v47 = vadd.f32 %v3320_v31, %v210_v23  ;;  %v1058_v25 = vpop.permute.xlu0 %1057 }
 0x2d4   :  { %v1061_v31 = vmul.f32 %v1058_v25, %v3656_v47 }
 0x2d5   :  { %v914_v15 = vpop.permute.xlu1 %913 }
 0x2d6   :  { %992 = vrot.lane.b32.xlu1 %v988_v12, %s3169_s0  ;;  %v917_v11 = vmul.f32 %v914_v15, %v3323_v32  ;;  %v1080_v15 = vmul.f32 %v3524_v59, %v3653_v45  ;;  %v524_v59 = vmul.f32 %v3529_v51, %v3510_v41 }
 0x2da   :  { %902 = vrot.lane.b32.xlu1 %v897_v54, %s3170_s2  ;;  %v966_v43 = vpop.permute.xlu1 %965  ;;  %v3673_v54 = vpop.permute.xlu0 %665 }
 0x2db   :  { %v969_v17 = vmul.f32 %v966_v43, %v3636_v22 }
 0x2dd   :  { %974 = vrot.lane.b32.xlu0 %v969_v17, %s3170_s2 }
 0x2de   :  { %922 = vrot.lane.b32.xlu1 %v917_v11, %s3169_s0  ;;  %v3677_v9 = vpop.permute.xlu0 %809 }
 0x2df   :  { %v986_v29 = vpop.permute.xlu1 %985 }
 0x2e0   :  { %v989_v28 = vmul.f32 %v986_v29, %v3636_v22 }
 0x2e2   :  { %942 = vrot.lane.b32.xlu1 %v937_v16, %s3132_s25  ;;  %994 = vrot.lane.b32.xlu0 %v989_v28, %s3169_s0  ;;  %v3681_v17 = vpop.permute.xlu0 %953 }
 0x2e4   :  { %v1038_v27 = vpop.permute.xlu1 %1037 }
 0x2e5   :  { %v1041_v8 = vmul.f32 %v1038_v27, %v3656_v47  ;;  %v596_v27 = vmul.f32 %v3541_v24, %v3431_v38 }
 0x2e6   :  { %1012 = vrot.lane.b32.xlu1 %v1008_v33, %s3132_s25  ;;  %1014 = vrot.lane.b32.xlu0 %v1009_v37, %s3132_s25  ;;  %v633_v57 = vpop.permute.xlu0 %632 }
 0x2e9   :  { %v522_v3 = vpop.permute.xlu1 %521 }
 0x2ea   :  { %1044 = vrot.lane.b32.xlu1 %v1040_v13, %s3170_s2  ;;  %1046 = vrot.lane.b32.xlu0 %v1041_v8, %s3170_s2  ;;  %v653_v16 = vpop.permute.xlu0 %652 }
 0x2ee   :  { %1064 = vrot.lane.b32.xlu1 %v1060_v26, %s3169_s0  ;;  %1066 = vrot.lane.b32.xlu0 %v1061_v31, %s3169_s0  ;;  %v1078_v12 = vpop.permute.xlu1 %1077  ;;  %v777_v13 = vpop.permute.xlu0 %776 }
 0x2ef   :  { %v1081_v18 = vmul.f32 %v1078_v12, %v3656_v47 }
 0x2f2   :  { %1084 = vrot.lane.b32.xlu1 %v1080_v15, %s3132_s25  ;;  %1086 = vrot.lane.b32.xlu0 %v1081_v18, %s3132_s25  ;;  %v797_v26 = vpop.permute.xlu0 %796 }
 0x2f3   :  { %v594_v43 = vpop.permute.xlu1 %593 }
 0x2f6   :  { %v3689_v15 = vpop.permute.xlu0 %920 }
 0x2f8   :  { %v3679_v62 = vpop.permute.xlu1 %737 }
 0x2fa   :  { %v3691_v1 = vpop.permute.xlu0 %940 }
 0x2fd   :  { %v3683_v11 = vpop.permute.xlu1 %881 }
 0x301   :  { %v541_v29 = vpop.permute.xlu1 %540 }
 0x302   :  { %v546_v55 = vadd.f32 %v541_v29, %v524_v59  ;;  %v668_v59 = vmul.f32 %v3533_v5, %v3538_v30 }
 0x305   :  { %v561_v28 = vpop.permute.xlu1 %560 }
 0x306   :  { %v566_v23 = vadd.f32 %v561_v28, %v546_v55 }
 0x309   :  { %v581_v33 = vpop.permute.xlu1 %580 }
 0x30a   :  { %v586_v37 = vadd.f32 %v581_v33, %v566_v23 }
 0x30c   :  { %v598_v8 = vadd.f32 %v596_v27, %v586_v37 }
 0x30d   :  { %v613_v25 = vpop.permute.xlu1 %612 }
 0x30e   :  { %v618_v31 = vadd.f32 %v613_v25, %v598_v8 }
 0x310   :  { %v638_v18 = vadd.f32 %v633_v57, %v618_v31 }
 0x311   :  { %v685_v12 = vpop.permute.xlu1 %684 }
 0x312   :  { %v658_v51 = vadd.f32 %v653_v16, %v638_v18  ;;  %v740_v16 = vmul.f32 %v3550_v36, %v3451_v52  ;;  %v525_v18 = vmul.f32 %v522_v3, %v3559_v6  ;;  %v812_v3 = vmul.f32 %v3545_v49, %v3570_v7 }
 0x313   :  { %v543_v24 = vpop.permute.xlu0 %542 }
 0x314   :  { %v670_v28 = vadd.f32 %v668_v59, %v658_v51  ;;  %v547_v48 = vadd.f32 %v543_v24, %v525_v18 }
 0x315   :  { %v705_v40 = vpop.permute.xlu1 %704 }
 0x316   :  { %v690_v23 = vadd.f32 %v685_v12, %v670_v28  ;;  %v597_v28 = vmul.f32 %v594_v43, %v3299_v20 }
 0x318   :  { %v563_v27 = vpop.permute.xlu0 %562  ;;  %v710_v37 = vadd.f32 %v705_v40, %v690_v23 }
 0x319   :  { %v725_v29 = vpop.permute.xlu1 %724  ;;  %v567_v51 = vadd.f32 %v563_v27, %v547_v48  ;;  %v669_v48 = vmul.f32 %v3673_v54, %v3589_v42 }
 0x31a   :  { %v730_v25 = vadd.f32 %v725_v29, %v710_v37 }
 0x31c   :  { %v583_v57 = vpop.permute.xlu0 %582  ;;  %v742_v58 = vadd.f32 %v740_v16, %v730_v25 }
 0x31d   :  { %v757_v55 = vpop.permute.xlu1 %756  ;;  %v587_v59 = vadd.f32 %v583_v57, %v567_v51 }
 0x31e   :  { %v762_v53 = vadd.f32 %v757_v55, %v742_v58 }
 0x31f   :  { %v599_v29 = vadd.f32 %v597_v28, %v587_v59 }
 0x320   :  { %v782_v23 = vadd.f32 %v777_v13, %v762_v53 }
 0x321   :  { %v829_v33 = vpop.permute.xlu1 %828 }
 0x322   :  { %v802_v50 = vadd.f32 %v797_v26, %v782_v23 }
 0x324   :  { %v814_v58 = vadd.f32 %v812_v3, %v802_v50 }
 0x325   :  { %v849_v8 = vpop.permute.xlu1 %848 }
 0x326   :  { %v834_v53 = vadd.f32 %v829_v33, %v814_v58 }
 0x327   :  { %v687_v39 = vpop.permute.xlu0 %686 }
 0x328   :  { %v854_v18 = vadd.f32 %v849_v8, %v834_v53 }
 0x329   :  { %v869_v31 = vpop.permute.xlu1 %868 }
 0x32c   :  { %v707_v40 = vpop.permute.xlu0 %706 }
 0x32d   :  { %v901_v5 = vpop.permute.xlu1 %900 }
 0x330   :  { %v727_v36 = vpop.permute.xlu0 %726 }
 0x331   :  { %v615_v12 = vpop.permute.xlu1 %614 }
 0x332   :  { %v619_v44 = vadd.f32 %v615_v12, %v599_v29  ;;  %v874_v12 = vadd.f32 %v869_v31, %v854_v18 }
 0x335   :  { %v635_v37 = vpop.permute.xlu1 %634 }
 0x336   :  { %v639_v2 = vadd.f32 %v635_v37, %v619_v44  ;;  %v741_v44 = vmul.f32 %v3679_v62, %v3302_v21 }
 0x339   :  { %v655_v46 = vpop.permute.xlu1 %654 }
 0x33a   :  { %v659_v24 = vadd.f32 %v655_v46, %v639_v2  ;;  %v884_v2 = vmul.f32 %v3563_v10, %v3475_v61  ;;  %v885_v10 = vmul.f32 %v3683_v11, %v3323_v32 }
 0x33c   :  { %v671_v55 = vadd.f32 %v669_v48, %v659_v24 }
 0x33d   :  { %v1022_v27 = vpop.permute.xlu0 %1021  ;;  %v1026_v43 = vpop.permute.xlu1 %1025 }
 0x33e   :  { %v691_v25 = vadd.f32 %v687_v39, %v671_v55  ;;  %v886_v39 = vadd.f32 %v884_v2, %v874_v12  ;;  %v1028_v2 = vmul.f32 %v1022_v27, %v3653_v45 }
 0x340   :  { %v711_v13 = vadd.f32 %v707_v40, %v691_v25  ;;  %v813_v40 = vmul.f32 %v3677_v9, %v3614_v14  ;;  %v906_v62 = vadd.f32 %v901_v5, %v886_v39  ;;  %v956_v9 = vmul.f32 %v3552_v19, %v3607_v35 }
 0x341   :  { %v831_v57 = vpop.permute.xlu0 %830  ;;  %v973_v16 = vpop.permute.xlu1 %972 }
 0x342   :  { %v731_v26 = vadd.f32 %v727_v36, %v711_v13  ;;  %v926_v31 = vadd.f32 %v3689_v15, %v906_v62  ;;  %v957_v15 = vmul.f32 %v3681_v17, %v3636_v22  ;;  %v2720_v17 = vld [vmem:[%s4398_s3] ss:$0 sm:$0xff] }
 0x343   :  { %vm457_vm11 = vcmp.eq.s32.totalorder %v3274_v4, %v2720_v17  ;;  %v3735_v4 = vld [vmem:[#allocation4 + $0x3] ss:$0 sm:$0xff]  ;;  %v4523_v17 = vmov 14  }
 0x344   :  { %v743_v59 = vadd.f32 %v741_v44, %v731_v26  ;;  %v946_v55 = vadd.f32 %v3691_v1, %v926_v31 }
 0x345   :  { %v851_v51 = vpop.permute.xlu0 %850  ;;  %v759_v49 = vpop.permute.xlu1 %758 }
 0x346   :  { %v763_v46 = vadd.f32 %v759_v49, %v743_v59  ;;  %v958_v26 = vadd.f32 %v956_v9, %v946_v55 }
 0x348   :  { %v978_v18 = vadd.f32 %v973_v16, %v958_v26 }
 0x349   :  { %v779_v54 = vpop.permute.xlu1 %778  ;;  %v871_v50 = vpop.permute.xlu0 %870 }
 0x34a   :  { %v783_v33 = vadd.f32 %v779_v54, %v763_v46 }
 0x34d   :  { %v799_v28 = vpop.permute.xlu1 %798 }
 0x34e   :  { %v803_v23 = vadd.f32 %v799_v28, %v783_v33 }
 0x34f   :  { %v975_v29 = vpop.permute.xlu0 %974 }
 0x350   :  { %v815_v8 = vadd.f32 %v813_v40, %v803_v23 }
 0x351   :  { %v993_v37 = vpop.permute.xlu1 %992 }
 0x352   :  { %v835_v36 = vadd.f32 %v831_v57, %v815_v8  ;;  %v998_v49 = vadd.f32 %v993_v37, %v978_v18 }
 0x354   :  { %v855_v3 = vadd.f32 %v851_v51, %v835_v36  ;;  %v995_v48 = vpop.permute.xlu0 %994 }
 0x355   :  { %v903_v24 = vpop.permute.xlu1 %902 }
 0x356   :  { %v875_v58 = vadd.f32 %v871_v50, %v855_v3  ;;  %v1029_v50 = vmul.f32 %v1026_v43, %v3656_v47  ;;  %v458_v43 = vsel %vm457_vm11, 1.0, %v4466_v0 }
 0x358   :  { %v887_v25 = vadd.f32 %v885_v10, %v875_v58  ;;  %v1015_v13 = vpop.permute.xlu0 %1014 }
 0x359   :  { %v923_v53 = vpop.permute.xlu1 %922 }
 0x35a   :  { %v907_v5 = vadd.f32 %v903_v24, %v887_v25 }
 0x35c   :  { %v927_v57 = vadd.f32 %v923_v53, %v907_v5  ;;  %v1047_v59 = vpop.permute.xlu0 %1046 }
 0x35d   :  { %v943_v44 = vpop.permute.xlu1 %942 }
 0x35e   :  { %v947_v51 = vadd.f32 %v943_v44, %v927_v57 }
 0x360   :  { %v959_v11 = vadd.f32 %v957_v15, %v947_v51  ;;  %v1067_v28 = vpop.permute.xlu0 %1066 }
 0x361   :  { %v1013_v12 = vpop.permute.xlu1 %1012 }
 0x362   :  { %v979_v1 = vadd.f32 %v975_v29, %v959_v11  ;;  %v1018_v54 = vadd.f32 %v1013_v12, %v998_v49  ;;  %v4510_v49 = vmov 7   ;;  %v4511_v11 = vmov 2  }
 0x363   :  { %v4512_v12 = vmov 11  }
 0x364   :  { %v999_v46 = vadd.f32 %v995_v48, %v979_v1  ;;  %v1030_v33 = vadd.f32 %v1028_v2, %v1018_v54  ;;  %v1087_v27 = vpop.permute.xlu0 %1086  ;;  %v3724_v48 = vpack.c.bf16 %v458_v43, %v458_v43  ;;  %v4513_v1 = vmov 5  }
 0x365   :  { %v1045_v19 = vpop.permute.xlu1 %1044  ;;  %v4514_v54 = vmov 15   ;;  %v4515_v2 = vmov 6   ;;  %v4533_v43 = vmov 26  }
 0x366   :  { %v1019_v39 = vadd.f32 %v1015_v13, %v999_v46  ;;  %v1050_v62 = vadd.f32 %v1045_v19, %v1030_v33  ;;  %v4516_v46 = vmov 19   ;;  %v4517_v19 = vmov 9  }
 0x367   :  { %v4520_v33 = vmov 27  }
 0x368   :  { %v1031_v40 = vadd.f32 %v1029_v50, %v1019_v39  ;;  %v4518_v50 = vmov 23   ;;  %v4519_v39 = vmov 10  }
 0x369   :  { %v1065_v16 = vpop.permute.xlu1 %1064 }
 0x36a   :  { %v1051_v23 = vadd.f32 %v1047_v59, %v1031_v40  ;;  %v1070_v8 = vadd.f32 %v1065_v16, %v1050_v62  ;;  %v4522_v40 = vmov 30   ;;  %v4524_v16 = vmov 8  }
 0x36b   :  { %v4526_v62 = vmov 16  }
 0x36c   :  { %v1071_v29 = vadd.f32 %v1067_v28, %v1051_v23  ;;  %v4521_v28 = vmov 13   ;;  %v4525_v23 = vmov 17  }
 0x36d   :  { %v1085_v37 = vpop.permute.xlu1 %1084 }
 0x36e   :  { %v1091_v36 = vadd.f32 %v1087_v27, %v1071_v29  ;;  %v1090_v31 = vadd.f32 %v1085_v37, %v1070_v8  ;;  %v4527_v29 = vmov 18   ;;  %v4528_v8 = vmov 24  }
 0x36f   :  { %v4529_v27 = vmov 21   ;;  %v4530_v37 = vmov 1  }
 0x370   :  { %v1092_v3 = vpack.c.bf16 %v1091_v36, %v1090_v31  ;;  %v4531_v36 = vmov 22   ;;  %v4532_v31 = vmov 25  }
 0x372   :  { %2791 = vmatpush3.bf16.msra.mxu0 %v1092_v3  ;;  %v4534_v3 = vmov 29  }
 0x373   :  { %2802 = vmatprep.subr.bf16.mxu0 %v4466_v0 }
 0x375   :  { %2793 = vmatmul.mubr.msk.bf16.vlgmr.msra.gmra.mxu0 %vm259_vm5, %v3724_v48 }
 0x376   :  { %2803 = vmatpush3.bf16.msra.mxu0 %v3245_v56  ;;  %2806 = vmatprep.mubr.msk.bf16.mxu0 %vm3136_vm2, %v4466_v0 }
 0x377   :  { %2804 = vmatprep.subr.bf16.mxu0 %v4466_v0 }
 0x37a   :  { %2805 = vmatpush3.bf16.msra.mxu0 %v3251_v60 }
 0x37b   :  { %2816 = vmatprep.subr.bf16.mxu0 %v4466_v0 }
 0x435   :  { %v1185_v24 = vpop.f32.mrf.mxu0 }
 0x436   :  { %v1186_v10 = vadd.f32 %v1185_v24, %v3327_v34  ;;  %v4535_v24 = vmov 0  }
 0x437   :  { %v2794_v58 = vpop.f32.mrf.mxu0 }
 0x438   :  { %v1191_v55 = vadd.f32 %v1186_v10, %v3735_v4  ;;  %v4536_v10 = vmov 31   ;;  %v4537_v58 = vmov 4  }
 0x439   :  { %v1188_v25 = vpop.f32.mrf.mxu0 }
 0x43a   :  { %v1192_v53 = vmax.f32 %v1191_v55, 0.0  ;;  %v4538_v55 = vmov 12   ;;  %v4539_v25 = vmov 20  }
 0x43b   :  { %v2795_v9 = vpop.f32.mrf.mxu0 }
 0x43c   :  { %v1193_v5 = vpack.c.bf16 %v1192_v53, %v1192_v53  ;;  %v4540_v53 = vmov 3   ;;  %v4541_v9 = vmov 28  }
 0x43e   :  { %2807 = vmatmul.mubr.msk.bf16.vlgmr.msra.gmra.mxu0 %vm1105_vm10, %v1193_v5  ;;  %v1195_v13 = vsel %vm469_vm6, %v1193_v5, 0 }
 0x43f   :  { %2797 = vmatpush3.bf16.msra.mxu1 %v1195_v13  ;;  %2818 = vmatprep.mubr.msk.bf16.mxu0 %vm3136_vm2, %v4466_v0 }
 0x440   :  { %2810 = vmatprep.subr.bf16.mxu1 %v4466_v0 }
 0x442   :  { %2799 = vmatmul.mubr.msk.bf16.vlgmr.msra.gmra.mxu1 %vm465_vm9, %v3262_v63 }
 0x443   :  { %2812 = vmatprep.mubr.msk.bf16.mxu1 %vm3136_vm2, %v4466_v0 }
 0x4fe   :  { %v3748_v34 = vpop.f32.mrf.mxu0 }
 0x500   :  { %v2808_v26 = vpop.f32.mrf.mxu0 }
 0x502   :  { %v3750_v57 = vpop.f32.mrf.mxu1  ;;  %v1856_v44 = vpop.f32.mrf.mxu0 }
 0x503   :  { %1293 = vperm.xlu0 %2952, %v3750_v57   ;;  %1253 = vperm.xlu1 %2950, %v3750_v57  }
 0x504   :  { %v2800_v15 = vpop.f32.mrf.mxu1  ;;  %v2809_v18 = vpop.f32.mrf.mxu0 }
 0x506   :  { %v3754_v51 = vpop.f32.mrf.mxu1 }
 0x507   :  { %2955 = vset.pattern.permute.xlu0 %v4510_v49  ;;  %2951 = vset.pattern.permute.xlu1 %v4511_v11 }
 0x508   :  { %1365 = vperm.xlu0 %2955, %v3750_v57   ;;  %1273 = vperm.xlu1 %2951, %v3750_v57   ;;  %v2801_v59 = vpop.f32.mrf.mxu1 }
 0x50c   :  { %2958 = vset.pattern.permute.xlu0 %v4512_v12  ;;  %2953 = vset.pattern.permute.xlu1 %v4513_v1 }
 0x50d   :  { %1437 = vperm.xlu0 %2958, %v3750_v57   ;;  %1325 = vperm.xlu1 %2953, %v3750_v57  }
 0x511   :  { %2961 = vset.pattern.permute.xlu0 %v4514_v54  ;;  %2954 = vset.pattern.permute.xlu1 %v4515_v2 }
 0x512   :  { %1509 = vperm.xlu0 %2961, %v3750_v57   ;;  %1345 = vperm.xlu1 %2954, %v3750_v57  }
 0x516   :  { %2964 = vset.pattern.permute.xlu0 %v4516_v46  ;;  %2956 = vset.pattern.permute.xlu1 %v4517_v19 }
 0x517   :  { %1581 = vperm.xlu0 %2964, %v3750_v57   ;;  %1397 = vperm.xlu1 %2956, %v3750_v57  }
 0x51b   :  { %2967 = vset.pattern.permute.xlu0 %v4518_v50  ;;  %2957 = vset.pattern.permute.xlu1 %v4519_v39 }
 0x51c   :  { %1653 = vperm.xlu0 %2967, %v3750_v57   ;;  %1417 = vperm.xlu1 %2957, %v3750_v57  }
 0x520   :  { %2970 = vset.pattern.permute.xlu0 %v4520_v33  ;;  %2959 = vset.pattern.permute.xlu1 %v4521_v28 }
 0x521   :  { %1725 = vperm.xlu0 %2970, %v3750_v57   ;;  %1469 = vperm.xlu1 %2959, %v3750_v57  }
 0x525   :  { %2973 = vset.pattern.permute.xlu0 %v4522_v40  ;;  %2960 = vset.pattern.permute.xlu1 %v4523_v17 }
 0x526   :  { %1777 = vperm.xlu0 %2973, %v3750_v57   ;;  %1489 = vperm.xlu1 %2960, %v3750_v57  }
 0x52a   :  { %2976 = vset.pattern.permute.xlu0 %v4524_v16  ;;  %2962 = vset.pattern.permute.xlu1 %v4525_v23 }
 0x52b   :  { %1385 = vperm.xlu0 %2976, %v3750_v57   ;;  %1541 = vperm.xlu1 %2962, %v3750_v57  }
 0x52f   :  { %2978 = vset.pattern.permute.xlu0 %v4526_v62  ;;  %2963 = vset.pattern.permute.xlu1 %v4527_v29 }
 0x530   :  { %1529 = vperm.xlu0 %2978, %v3750_v57   ;;  %1561 = vperm.xlu1 %2963, %v3750_v57  }
 0x534   :  { %2980 = vset.pattern.permute.xlu0 %v4528_v8  ;;  %2965 = vset.pattern.permute.xlu1 %v4529_v27 }
 0x535   :  { %1673 = vperm.xlu0 %2980, %v3750_v57   ;;  %1613 = vperm.xlu1 %2965, %v3750_v57  }
 0x539   :  { %2981 = vset.pattern.permute.xlu0 %v4530_v37  ;;  %2966 = vset.pattern.permute.xlu1 %v4531_v36 }
 0x53a   :  { %1633 = vperm.xlu1 %2966, %v3750_v57   ;;  %1257 = vperm.xlu0 %2981, %v3754_v51  }
 0x53e   :  { %2968 = vset.pattern.permute.xlu1 %v4532_v31  ;;  %2984 = vset.pattern.permute.xlu0 %v4513_v1 }
 0x53f   :  { %1685 = vperm.xlu1 %2968, %v3750_v57   ;;  %1329 = vperm.xlu0 %2984, %v3754_v51  }
 0x543   :  { %2969 = vset.pattern.permute.xlu1 %v4533_v43  ;;  %2987 = vset.pattern.permute.xlu0 %v4517_v19 }
 0x544   :  { %1705 = vperm.xlu1 %2969, %v3750_v57   ;;  %1401 = vperm.xlu0 %2987, %v3754_v51  }
 0x548   :  { %2971 = vset.pattern.permute.xlu1 %v4534_v3  ;;  %2990 = vset.pattern.permute.xlu0 %v4521_v28 }
 0x549   :  { %1757 = vperm.xlu1 %2971, %v3750_v57   ;;  %1473 = vperm.xlu0 %2990, %v3754_v51  }
 0x54d   :  { %2972 = vset.pattern.permute.xlu1 %v4535_v24  ;;  %2993 = vset.pattern.permute.xlu0 %v4525_v23 }
 0x54e   :  { %1240 = vperm.xlu1 %2972, %v3750_v57   ;;  %1545 = vperm.xlu0 %2993, %v3754_v51  }
 0x552   :  { %2974 = vset.pattern.permute.xlu1 %v4536_v10  ;;  %2996 = vset.pattern.permute.xlu0 %v4529_v27 }
 0x553   :  { %1797 = vperm.xlu1 %2974, %v3750_v57   ;;  %1617 = vperm.xlu0 %2996, %v3754_v51  }
 0x557   :  { %2975 = vset.pattern.permute.xlu1 %v4537_v58  ;;  %2999 = vset.pattern.permute.xlu0 %v4532_v31 }
 0x558   :  { %1313 = vperm.xlu1 %2975, %v3750_v57   ;;  %1689 = vperm.xlu0 %2999, %v3754_v51  }
 0x55c   :  { %2977 = vset.pattern.permute.xlu1 %v4538_v55  ;;  %3002 = vset.pattern.permute.xlu0 %v4534_v3 }
 0x55d   :  { %1457 = vperm.xlu1 %2977, %v3750_v57   ;;  %1761 = vperm.xlu0 %3002, %v3754_v51  }
 0x561   :  { %2979 = vset.pattern.permute.xlu1 %v4539_v25  ;;  %3005 = vset.pattern.permute.xlu0 %v4536_v10 }
 0x562   :  { %1601 = vperm.xlu1 %2979, %v3750_v57   ;;  %1801 = vperm.xlu0 %3005, %v3754_v51  }
 0x566   :  { %2982 = vset.pattern.permute.xlu1 %v4511_v11  ;;  %3008 = vset.pattern.permute.xlu0 %v4538_v55 }
 0x567   :  { %1277 = vperm.xlu1 %2982, %v3754_v51   ;;  %1461 = vperm.xlu0 %3008, %v3754_v51  }
 0x56b   :  { %2983 = vset.pattern.permute.xlu1 %v4540_v53  ;;  %3010 = vset.pattern.permute.xlu0 %v4539_v25 }
 0x56c   :  { %1297 = vperm.xlu1 %2983, %v3754_v51   ;;  %1605 = vperm.xlu0 %3010, %v3754_v51  }
 0x570   :  { %2985 = vset.pattern.permute.xlu1 %v4515_v2  ;;  %3013 = vset.pattern.permute.xlu0 %v4541_v9 }
 0x571   :  { %1349 = vperm.xlu1 %2985, %v3754_v51  }
 0x575   :  { %2986 = vset.pattern.permute.xlu1 %v4510_v49 }
 0x576   :  { %1369 = vperm.xlu1 %2986, %v3754_v51  }
 0x57a   :  { %2988 = vset.pattern.permute.xlu1 %v4519_v39 }
 0x57b   :  { %1421 = vperm.xlu1 %2988, %v3754_v51  }
 0x57e   :  { %v1294_v5 = vpop.permute.xlu0 %1293  ;;  %v1254_v13 = vpop.permute.xlu1 %1253 }
 0x57f   :  { %v1260_v26 = vmul.f32 %v1254_v13, %v3510_v41  ;;  %2989 = vset.pattern.permute.xlu1 %v4512_v12  ;;  %v1300_v59 = vmul.f32 %v1294_v5, %v3510_v41 }
 0x580   :  { %1441 = vperm.xlu1 %2989, %v3754_v51  }
 0x581   :  { %1264 = vrot.lane.b32.xlu0 %v1260_v26, %s3170_s2 }
 0x583   :  { %v3851_v44 = vpop.permute.xlu0 %1365  ;;  %v1274_v15 = vpop.permute.xlu1 %1273 }
 0x584   :  { %v1280_v18 = vmul.f32 %v1274_v15, %v3510_v41  ;;  %2991 = vset.pattern.permute.xlu1 %v4523_v17 }
 0x585   :  { %1493 = vperm.xlu1 %2991, %v3754_v51  }
 0x586   :  { %1284 = vrot.lane.b32.xlu0 %v1280_v18, %s3169_s0 }
 0x588   :  { %v1438_v13 = vpop.permute.xlu0 %1437  ;;  %v1326_v0 = vpop.permute.xlu1 %1325 }
 0x589   :  { %2992 = vset.pattern.permute.xlu1 %v4514_v54 }
 0x58a   :  { %1513 = vperm.xlu1 %2992, %v3754_v51   ;;  %1304 = vrot.lane.b32.xlu0 %v1300_v59, %s3132_s25  ;;  %v1444_v59 = vmul.f32 %v1438_v13, %v3538_v30 }
 0x58d   :  { %v3861_v26 = vpop.permute.xlu0 %1509  ;;  %v1346_v25 = vpop.permute.xlu1 %1345 }
 0x58e   :  { %2994 = vset.pattern.permute.xlu1 %v4527_v29 }
 0x58f   :  { %1565 = vperm.xlu1 %2994, %v3754_v51  }
 0x592   :  { %v1582_v15 = vpop.permute.xlu0 %1581  ;;  %v1398_v55 = vpop.permute.xlu1 %1397 }
 0x593   :  { %2995 = vset.pattern.permute.xlu1 %v4516_v46 }
 0x594   :  { %1585 = vperm.xlu1 %2995, %v3754_v51  }
 0x597   :  { %v3867_v5 = vpop.permute.xlu0 %1653  ;;  %v1418_v18 = vpop.permute.xlu1 %1417 }
 0x598   :  { %v1424_v10 = vmul.f32 %v1418_v18, %v3538_v30  ;;  %2997 = vset.pattern.permute.xlu1 %v4531_v36 }
 0x599   :  { %1637 = vperm.xlu1 %2997, %v3754_v51  }
 0x59a   :  { %1428 = vrot.lane.b32.xlu0 %v1424_v10, %s3169_s0 }
 0x59c   :  { %v3874_v29 = vpop.permute.xlu0 %1725  ;;  %v1470_v3 = vpop.permute.xlu1 %1469 }
 0x59d   :  { %2998 = vset.pattern.permute.xlu1 %v4518_v50 }
 0x59e   :  { %1657 = vperm.xlu1 %2998, %v3754_v51   ;;  %1448 = vrot.lane.b32.xlu0 %v1444_v59, %s3132_s25  ;;  %v1588_v59 = vmul.f32 %v1582_v15, %v3570_v7 }
 0x5a1   :  { %v3879_v46 = vpop.permute.xlu0 %1777  ;;  %v1490_v18 = vpop.permute.xlu1 %1489 }
 0x5a2   :  { %3000 = vset.pattern.permute.xlu1 %v4533_v43 }
 0x5a3   :  { %1709 = vperm.xlu1 %3000, %v3754_v51  }
 0x5a6   :  { %v3883_v36 = vpop.permute.xlu0 %1385  ;;  %v1542_v10 = vpop.permute.xlu1 %1541 }
 0x5a7   :  { %3001 = vset.pattern.permute.xlu1 %v4520_v33 }
 0x5a8   :  { %1729 = vperm.xlu1 %3001, %v3754_v51  }
 0x5ab   :  { %v3887_v13 = vpop.permute.xlu0 %1529  ;;  %v1562_v50 = vpop.permute.xlu1 %1561 }
 0x5ac   :  { %v1568_v54 = vmul.f32 %v1562_v50, %v3570_v7  ;;  %3003 = vset.pattern.permute.xlu1 %v4535_v24 }
 0x5ad   :  { %1245 = vperm.xlu1 %3003, %v3754_v51  }
 0x5ae   :  { %1572 = vrot.lane.b32.xlu0 %v1568_v54, %s3169_s0 }
 0x5b0   :  { %v3894_v43 = vpop.permute.xlu0 %1673  ;;  %v1614_v31 = vpop.permute.xlu1 %1613 }
 0x5b1   :  { %3004 = vset.pattern.permute.xlu1 %v4522_v40 }
 0x5b2   :  { %1781 = vperm.xlu1 %3004, %v3754_v51   ;;  %1592 = vrot.lane.b32.xlu0 %v1588_v59, %s3132_s25 }
 0x5b5   :  { %v1634_v33 = vpop.permute.xlu1 %1633  ;;  %v1258_v17 = vpop.permute.xlu0 %1257 }
 0x5b6   :  { %3006 = vset.pattern.permute.xlu1 %v4537_v58 }
 0x5b7   :  { %1317 = vperm.xlu1 %3006, %v3754_v51  }
 0x5ba   :  { %v3901_v50 = vpop.permute.xlu1 %1685  ;;  %v1330_v54 = vpop.permute.xlu0 %1329 }
 0x5bb   :  { %v1333_v15 = vmul.f32 %v1330_v54, %v3299_v20  ;;  %3007 = vset.pattern.permute.xlu1 %v4524_v16  ;;  %v1332_v54 = vmul.f32 %v1326_v0, %v3431_v38  ;;  %v1404_v0 = vmul.f32 %v1398_v55, %v3538_v30 }
 0x5bc   :  { %1389 = vperm.xlu1 %3007, %v3754_v51  }
 0x5bd   :  { %1338 = vrot.lane.b32.xlu0 %v1333_v15, %s3170_s2  ;;  %v1352_v15 = vmul.f32 %v1346_v25, %v3431_v38  ;;  %v1496_v25 = vmul.f32 %v1490_v18, %v3451_v52  ;;  %v1640_v18 = vmul.f32 %v1634_v33, %v3475_v61 }
 0x5bf   :  { %v3907_v40 = vpop.permute.xlu1 %1705 }
 0x5c0   :  { %3009 = vset.pattern.permute.xlu1 %v4526_v62  ;;  %v1372_v62 = vmul.f32 %v3851_v44, %v3431_v38  ;;  %v1548_v44 = vmul.f32 %v1542_v10, %v3570_v7  ;;  %v1402_v10 = vpop.permute.xlu0 %1401 }
 0x5c1   :  { %1533 = vperm.xlu1 %3009, %v3754_v51  }
 0x5c4   :  { %v3911_v59 = vpop.permute.xlu1 %1757 }
 0x5c5   :  { %3011 = vset.pattern.permute.xlu1 %v4528_v8 }
 0x5c6   :  { %1677 = vperm.xlu1 %3011, %v3754_v51  }
 0x5c9   :  { %v3916_v58 = vpop.permute.xlu1 %1240 }
 0x5ca   :  { %1336 = vrot.lane.b32.xlu1 %v1332_v54, %s3170_s2  ;;  %v1476_v54 = vmul.f32 %v1470_v3, %v3451_v52 }
 0x5cb   :  { %3012 = vset.pattern.permute.xlu1 %v4541_v9 }
 0x5ce   :  { %v3921_v24 = vpop.permute.xlu1 %1797  ;;  %1356 = vrot.lane.b32.xlu1 %v1352_v15, %s3169_s0 }
 0x5d2   :  { %1376 = vrot.lane.b32.xlu1 %v1372_v62, %s3132_s25  ;;  %v1516_v62 = vmul.f32 %v3861_v26, %v3451_v52  ;;  %v1660_v26 = vmul.f32 %v3867_v5, %v3475_v61 }
 0x5d3   :  { %v3927_v8 = vpop.permute.xlu1 %1313 }
 0x5d6   :  { %1408 = vrot.lane.b32.xlu1 %v1404_v0, %s3170_s2  ;;  %v1620_v0 = vmul.f32 %v1614_v31, %v3475_v61  ;;  %v1261_v31 = vmul.f32 %v1258_v17, %v3559_v6 }
 0x5d8   :  { %v3932_v9 = vpop.permute.xlu1 %1457 }
 0x5da   :  { %1480 = vrot.lane.b32.xlu1 %v1476_v54, %s3170_s2 }
 0x5dd   :  { %v3936_v15 = vpop.permute.xlu1 %1601 }
 0x5de   :  { %1500 = vrot.lane.b32.xlu1 %v1496_v25, %s3169_s0 }
 0x5e2   :  { %1520 = vrot.lane.b32.xlu1 %v1516_v62, %s3132_s25  ;;  %v1278_v55 = vpop.permute.xlu1 %1277 }
 0x5e6   :  { %1552 = vrot.lane.b32.xlu1 %v1548_v44, %s3170_s2 }
 0x5e7   :  { %v1298_v3 = vpop.permute.xlu1 %1297 }
 0x5ea   :  { %1624 = vrot.lane.b32.xlu1 %v1620_v0, %s3170_s2  ;;  %v1474_v0 = vpop.permute.xlu0 %1473 }
 0x5eb   :  { %v1477_v5 = vmul.f32 %v1474_v0, %v3302_v21 }
 0x5ec   :  { %v1350_v54 = vpop.permute.xlu1 %1349 }
 0x5ed   :  { %v1353_v25 = vmul.f32 %v1350_v54, %v3299_v20 }
 0x5ee   :  { %1644 = vrot.lane.b32.xlu1 %v1640_v18, %s3169_s0  ;;  %v1281_v18 = vmul.f32 %v1278_v55, %v3559_v6  ;;  %v1546_v55 = vpop.permute.xlu0 %1545 }
 0x5ef   :  { %1358 = vrot.lane.b32.xlu0 %v1353_v25, %s3169_s0  ;;  %v1301_v25 = vmul.f32 %v1298_v3, %v3559_v6 }
 0x5f1   :  { %v1370_v62 = vpop.permute.xlu1 %1369 }
 0x5f2   :  { %v1373_v44 = vmul.f32 %v1370_v62, %v3299_v20  ;;  %1664 = vrot.lane.b32.xlu1 %v1660_v26, %s3132_s25  ;;  %v1618_v0 = vpop.permute.xlu0 %1617 }
 0x5f4   :  { %1378 = vrot.lane.b32.xlu0 %v1373_v44, %s3132_s25 }
 0x5f6   :  { %v1422_v33 = vpop.permute.xlu1 %1421  ;;  %1266 = vrot.lane.b32.xlu1 %v1261_v31, %s3170_s2  ;;  %v1712_v31 = vmul.f32 %v3907_v40, %v3607_v35  ;;  %v1549_v40 = vmul.f32 %v1546_v55, %v3614_v14  ;;  %v1732_v55 = vmul.f32 %v3874_v29, %v3607_v35  ;;  %v1784_v29 = vmul.f32 %v3879_v46, %v3653_v45 }
 0x5f7   :  { %v1425_v3 = vmul.f32 %v1422_v33, %v3589_v42  ;;  %v1692_v33 = vmul.f32 %v3901_v50, %v3607_v35 }
 0x5f8   :  { %1749 = vperm.xlu0 %3013, %v3754_v51   ;;  %v1405_v51 = vmul.f32 %v1402_v10, %v3589_v42 }
 0x5fa   :  { %1286 = vrot.lane.b32.xlu1 %v1281_v18, %s3169_s0  ;;  %v1621_v18 = vmul.f32 %v1618_v0, %v3323_v32 }
 0x5fb   :  { %v1442_v54 = vpop.permute.xlu1 %1441 }
 0x5fc   :  { %1482 = vrot.lane.b32.xlu0 %v1477_v5, %s3170_s2  ;;  %v1445_v10 = vmul.f32 %v1442_v54, %v3589_v42 }
 0x5fd   :  { %3014 = vset.pattern.permute.xlu0 %v4530_v37 }
 0x5fe   :  { %1306 = vrot.lane.b32.xlu1 %v1301_v25, %s3132_s25 }
 0x600   :  { %v1494_v17 = vpop.permute.xlu1 %1493 }
 0x601   :  { %v1497_v26 = vmul.f32 %v1494_v17, %v3302_v21 }
 0x602   :  { %1745 = vperm.xlu1 %3012, %v3750_v57  }
 0x603   :  { %1502 = vrot.lane.b32.xlu0 %v1497_v26, %s3169_s0 }
 0x605   :  { %v1514_v62 = vpop.permute.xlu1 %1513 }
 0x606   :  { %v1517_v44 = vmul.f32 %v1514_v62, %v3302_v21  ;;  %1410 = vrot.lane.b32.xlu1 %v1405_v51, %s3170_s2  ;;  %v1690_v62 = vpop.permute.xlu0 %1689 }
 0x607   :  { %3015 = vset.pattern.permute.xlu1 %v4511_v11 }
 0x608   :  { %1522 = vrot.lane.b32.xlu0 %v1517_v44, %s3132_s25 }
 0x60a   :  { %v1566_v57 = vpop.permute.xlu1 %1565  ;;  %1430 = vrot.lane.b32.xlu1 %v1425_v3, %s3169_s0  ;;  %v1693_v3 = vmul.f32 %v1690_v62, %v3636_v22 }
 0x60b   :  { %v1569_v54 = vmul.f32 %v1566_v57, %v3614_v14 }
 0x60c   :  { %1716 = vrot.lane.b32.xlu0 %v1712_v31, %s3169_s0  ;;  %v1764_v31 = vmul.f32 %v3911_v59, %v3653_v45  ;;  %v1804_v59 = vmul.f32 %v3921_v24, %v3653_v45 }
 0x60e   :  { %1450 = vrot.lane.b32.xlu1 %v1445_v10, %s3132_s25 }
 0x60f   :  { %v1586_v5 = vpop.permute.xlu1 %1585 }
 0x610   :  { %1626 = vrot.lane.b32.xlu0 %v1621_v18, %s3170_s2  ;;  %v1589_v50 = vmul.f32 %v1586_v5, %v3614_v14  ;;  %v1762_v5 = vpop.permute.xlu0 %1761 }
 0x612   :  { %1696 = vrot.lane.b32.xlu1 %v1692_v33, %s3170_s2  ;;  %v1765_v33 = vmul.f32 %v1762_v5, %v3656_v47 }
 0x614   :  { %v1638_v25 = vpop.permute.xlu1 %1637 }
 0x615   :  { %v1641_v17 = vmul.f32 %v1638_v25, %v3323_v32  ;;  %v1802_v25 = vpop.permute.xlu0 %1801 }
 0x616   :  { %1554 = vrot.lane.b32.xlu1 %v1549_v40, %s3170_s2 }
 0x617   :  { %1646 = vrot.lane.b32.xlu0 %v1641_v17, %s3169_s0 }
 0x619   :  { %v1658_v26 = vpop.permute.xlu1 %1657  ;;  %v4019_v24 = vpop.permute.xlu0 %1461 }
 0x61a   :  { %v1661_v51 = vmul.f32 %v1658_v26, %v3323_v32  ;;  %1574 = vrot.lane.b32.xlu1 %v1569_v54, %s3169_s0  ;;  %v1805_v54 = vmul.f32 %v1802_v25, %v3656_v47 }
 0x61c   :  { %1666 = vrot.lane.b32.xlu0 %v1661_v51, %s3132_s25 }
 0x61e   :  { %v1710_v44 = vpop.permute.xlu1 %1709  ;;  %1594 = vrot.lane.b32.xlu1 %v1589_v50, %s3132_s25  ;;  %v4025_v50 = vpop.permute.xlu0 %1605 }
 0x61f   :  { %v1713_v0 = vmul.f32 %v1710_v44, %v3636_v22 }
 0x620   :  { %1736 = vrot.lane.b32.xlu0 %v1732_v55, %s3132_s25 }
 0x622   :  { %1698 = vrot.lane.b32.xlu1 %v1693_v3, %s3170_s2  ;;  %v1265_v62 = vpop.permute.xlu0 %1264 }
 0x623   :  { %v1730_v57 = vpop.permute.xlu1 %1729 }
 0x624   :  { %1768 = vrot.lane.b32.xlu0 %v1764_v31, %s3170_s2  ;;  %v1733_v10 = vmul.f32 %v1730_v57, %v3636_v22  ;;  %v1248_v57 = vmul.f32 %v3916_v58, %v3510_v41  ;;  %v1392_v58 = vmul.f32 %v3883_v36, %v3538_v30 }
 0x626   :  { %1718 = vrot.lane.b32.xlu1 %v1713_v0, %s3169_s0  ;;  %v1285_v3 = vpop.permute.xlu0 %1284  ;;  %v1270_v0 = vadd.f32 %v1265_v62, %v1248_v57 }
 0x628   :  { %v1246_v18 = vpop.permute.xlu1 %1245  ;;  %1788 = vrot.lane.b32.xlu0 %v1784_v29, %s3169_s0  ;;  %v1290_v5 = vadd.f32 %v1285_v3, %v1270_v0 }
 0x62a   :  { %1738 = vrot.lane.b32.xlu1 %v1733_v10, %s3132_s25  ;;  %v1305_v29 = vpop.permute.xlu0 %1304 }
 0x62c   :  { %1808 = vrot.lane.b32.xlu0 %v1804_v59, %s3132_s25  ;;  %v1310_v59 = vadd.f32 %v1305_v29, %v1290_v5 }
 0x62d   :  { %v1782_v40 = vpop.permute.xlu1 %1781 }
 0x62e   :  { %1770 = vrot.lane.b32.xlu1 %v1765_v33, %s3170_s2  ;;  %v1785_v46 = vmul.f32 %v1782_v40, %v3656_v47  ;;  %v1429_v33 = vpop.permute.xlu0 %1428 }
 0x632   :  { %v1318_v17 = vpop.permute.xlu1 %1317  ;;  %1790 = vrot.lane.b32.xlu1 %v1785_v46, %s3169_s0  ;;  %v1320_v46 = vmul.f32 %v3927_v8, %v3431_v38  ;;  %v1449_v11 = vpop.permute.xlu0 %1448 }
 0x634   :  { %v1322_v25 = vadd.f32 %v1320_v46, %v1310_v59 }
 0x636   :  { %1810 = vrot.lane.b32.xlu1 %v1805_v54, %s3132_s25  ;;  %v1573_v23 = vpop.permute.xlu0 %1572 }
 0x637   :  { %v4021_v26 = vpop.permute.xlu1 %1389 }
 0x63a   :  { %v1593_v3 = vpop.permute.xlu0 %1592 }
 0x63c   :  { %v4023_v51 = vpop.permute.xlu1 %1533 }
 0x63e   :  { %v1339_v5 = vpop.permute.xlu0 %1338 }
 0x641   :  { %v4027_v55 = vpop.permute.xlu1 %1677 }
 0x645   :  { %v1337_v44 = vpop.permute.xlu1 %1336 }
 0x646   :  { %v1342_v37 = vadd.f32 %v1337_v44, %v1322_v25 }
 0x649   :  { %v1357_v31 = vpop.permute.xlu1 %1356 }
 0x64a   :  { %v1362_v16 = vadd.f32 %v1357_v31, %v1342_v37  ;;  %v1464_v37 = vmul.f32 %v3932_v9, %v3451_v52 }
 0x64d   :  { %v1377_v10 = vpop.permute.xlu1 %1376 }
 0x64e   :  { %v1382_v12 = vadd.f32 %v1377_v10, %v1362_v16 }
 0x650   :  { %v1394_v57 = vadd.f32 %v1392_v58, %v1382_v12  ;;  %v1249_v12 = vmul.f32 %v1246_v18, %v3559_v6 }
 0x651   :  { %v1409_v40 = vpop.permute.xlu1 %1408 }
 0x652   :  { %v1414_v29 = vadd.f32 %v1409_v40, %v1394_v57 }
 0x654   :  { %v1434_v39 = vadd.f32 %v1429_v33, %v1414_v29 }
 0x655   :  { %v1481_v54 = vpop.permute.xlu1 %1480 }
 0x656   :  { %v1454_v46 = vadd.f32 %v1449_v11, %v1434_v39  ;;  %v1321_v11 = vmul.f32 %v1318_v17, %v3299_v20 }
 0x658   :  { %v1466_v16 = vadd.f32 %v1464_v37, %v1454_v46  ;;  %v1536_v46 = vmul.f32 %v3887_v13, %v3570_v7 }
 0x659   :  { %v1501_v27 = vpop.permute.xlu1 %1500 }
 0x65a   :  { %v1486_v25 = vadd.f32 %v1481_v54, %v1466_v16 }
 0x65c   :  { %v1506_v40 = vadd.f32 %v1501_v27, %v1486_v25  ;;  %v1393_v27 = vmul.f32 %v4021_v26, %v3589_v42 }
 0x65d   :  { %v1521_v62 = vpop.permute.xlu1 %1520 }
 0x65e   :  { %v1526_v39 = vadd.f32 %v1521_v62, %v1506_v40 }
 0x660   :  { %v1538_v16 = vadd.f32 %v1536_v46, %v1526_v39 }
 0x661   :  { %v1553_v0 = vpop.permute.xlu1 %1552  ;;  %v1359_v8 = vpop.permute.xlu0 %1358 }
 0x665   :  { %v1625_v41 = vpop.permute.xlu1 %1624 }
 0x666   :  { %v1379_v31 = vpop.permute.xlu0 %1378 }
 0x669   :  { %v1645_v59 = vpop.permute.xlu1 %1644 }
 0x66d   :  { %v1665_v44 = vpop.permute.xlu1 %1664 }
 0x671   :  { %v1267_v10 = vpop.permute.xlu1 %1266 }
 0x672   :  { %v1271_v57 = vadd.f32 %v1267_v10, %v1249_v12  ;;  %v1558_v10 = vadd.f32 %v1553_v0, %v1538_v16 }
 0x673   :  { %v4037_v36 = vpop.permute.xlu0 %1749 }
 0x675   :  { %v1287_v58 = vpop.permute.xlu1 %1286 }
 0x676   :  { %v1291_v33 = vadd.f32 %v1287_v58, %v1271_v57  ;;  %v1578_v58 = vadd.f32 %v1573_v23, %v1558_v10 }
 0x677   :  { %v1483_v38 = vpop.permute.xlu0 %1482 }
 0x678   :  { %v1598_v13 = vadd.f32 %v1593_v3, %v1578_v58 }
 0x679   :  { %v1307_v29 = vpop.permute.xlu1 %1306 }
 0x67a   :  { %v1311_v30 = vadd.f32 %v1307_v29, %v1291_v33 }
 0x67b   :  { %v1503_v9 = vpop.permute.xlu0 %1502 }
 0x67c   :  { %v1323_v37 = vadd.f32 %v1321_v11, %v1311_v30  ;;  %v1465_v30 = vmul.f32 %v4019_v24, %v3302_v21 }
 0x67d   :  { %v1746_v54 = vpop.permute.xlu1 %1745 }
 0x67e   :  { %v1343_v52 = vadd.f32 %v1339_v5, %v1323_v37 }
 0x67f   :  { %v1523_v28 = vpop.permute.xlu0 %1522 }
 0x680   :  { %v1363_v18 = vadd.f32 %v1359_v8, %v1343_v52  ;;  %v1608_v52 = vmul.f32 %v3936_v15, %v3475_v61  ;;  %v1609_v15 = vmul.f32 %v4025_v50, %v3323_v32 }
 0x681   :  { %v1411_v6 = vpop.permute.xlu1 %1410 }
 0x682   :  { %v1383_v25 = vadd.f32 %v1379_v31, %v1363_v18  ;;  %v1610_v0 = vadd.f32 %v1608_v52, %v1598_v13 }
 0x683   :  { %v1717_v17 = vpop.permute.xlu0 %1716 }
 0x684   :  { %v1395_v12 = vadd.f32 %v1393_v27, %v1383_v25  ;;  %v1630_v23 = vadd.f32 %v1625_v41, %v1610_v0 }
 0x685   :  { %v1431_v62 = vpop.permute.xlu1 %1430 }
 0x686   :  { %v1415_v40 = vadd.f32 %v1411_v6, %v1395_v12  ;;  %v1537_v6 = vmul.f32 %v4023_v51, %v3614_v14  ;;  %v1650_v3 = vadd.f32 %v1645_v59, %v1630_v23 }
 0x687   :  { %v1627_v29 = vpop.permute.xlu0 %1626 }
 0x688   :  { %v1435_v57 = vadd.f32 %v1431_v62, %v1415_v40  ;;  %v1670_v12 = vadd.f32 %v1665_v44, %v1650_v3 }
 0x689   :  { %v1451_v33 = vpop.permute.xlu1 %1450 }
 0x68a   :  { %v1455_v5 = vadd.f32 %v1451_v33, %v1435_v57  ;;  %v1681_v33 = vmul.f32 %v4027_v55, %v3636_v22 }
 0x68b   :  { %v1647_v39 = vpop.permute.xlu0 %1646 }
 0x68c   :  { %v1467_v8 = vadd.f32 %v1465_v30, %v1455_v5 }
 0x68d   :  { %v1697_v26 = vpop.permute.xlu1 %1696 }
 0x68e   :  { %v1487_v31 = vadd.f32 %v1483_v38, %v1467_v8 }
 0x68f   :  { %v1667_v27 = vpop.permute.xlu0 %1666 }
 0x690   :  { %v1507_v11 = vadd.f32 %v1503_v9, %v1487_v31  ;;  %v1680_v9 = vmul.f32 %v3894_v43, %v3607_v35  ;;  %v1752_v43 = vmul.f32 %v1746_v54, %v3653_v45  ;;  %v4542_v54 = vmov 0.0  }
 0x691   :  { %v1555_v46 = vpop.permute.xlu1 %1554 }
 0x692   :  { %v1527_v37 = vadd.f32 %v1523_v28, %v1507_v11  ;;  %v1682_v41 = vadd.f32 %v1680_v9, %v1670_v12 }
 0x693   :  { %v1737_v58 = vpop.permute.xlu0 %1736 }
 0x694   :  { %v1539_v16 = vadd.f32 %v1537_v6, %v1527_v37  ;;  %v1702_v40 = vadd.f32 %v1697_v26, %v1682_v41 }
 0x695   :  { %v1575_v24 = vpop.permute.xlu1 %1574 }
 0x696   :  { %v1559_v18 = vadd.f32 %v1555_v46, %v1539_v16  ;;  %v1722_v5 = vadd.f32 %v1717_v17, %v1702_v40  ;;  %v4543_v40 = vmov 13  }
 0x697   :  { %v1769_v13 = vpop.permute.xlu0 %1768 }
 0x698   :  { %v1579_v10 = vadd.f32 %v1575_v24, %v1559_v18  ;;  %v1742_v52 = vadd.f32 %v1737_v58, %v1722_v5  ;;  %v4549_v5 = vmov 25  }
 0x699   :  { %v1595_v25 = vpop.permute.xlu1 %1594 }
 0x69a   :  { %v1599_v38 = vadd.f32 %v1595_v25, %v1579_v10  ;;  %v1754_v26 = vadd.f32 %v1752_v43, %v1742_v52  ;;  %v4552_v52 = vmov 18   ;;  %v4554_v43 = vmov 19  }
 0x69b   :  { %v1789_v31 = vpop.permute.xlu0 %1788 }
 0x69c   :  { %v1611_v62 = vadd.f32 %v1609_v15, %v1599_v38  ;;  %v1774_v55 = vadd.f32 %v1769_v13, %v1754_v26  ;;  %v4548_v13 = vmov 14   ;;  %v4559_v26 = vmov 24  }
 0x69d   :  { %v1699_v51 = vpop.permute.xlu1 %1698 }
 0x69e   :  { %v1631_v28 = vadd.f32 %v1627_v29, %v1611_v62  ;;  %v1753_v29 = vmul.f32 %v4037_v36, %v3656_v47  ;;  %v1794_v17 = vadd.f32 %v1789_v31, %v1774_v55  ;;  %v4556_v31 = vmov 22  }
 0x69f   :  { %v1809_v37 = vpop.permute.xlu0 %1808  ;;  %v4563_v55 = vmov 0  }
 0x6a0   :  { %v1651_v57 = vadd.f32 %v1647_v39, %v1631_v28  ;;  %v1814_v3 = vadd.f32 %v1809_v37, %v1794_v17  ;;  %v4566_v37 = vmov 12   ;;  %v4567_v17 = vmov 20  }
 0x6a1   :  { %v1719_v59 = vpop.permute.xlu1 %1718 }
 0x6a2   :  { %v1671_v30 = vadd.f32 %v1667_v27, %v1651_v57  ;;  %v4544_v57 = vmov 10  }
 0x6a4   :  { %v1683_v50 = vadd.f32 %v1681_v33, %v1671_v30  ;;  %v4546_v33 = vmov 11   ;;  %v4547_v30 = vmov 21  }
 0x6a5   :  { %v1739_v44 = vpop.permute.xlu1 %1738 }
 0x6a6   :  { %v1703_v8 = vadd.f32 %v1699_v51, %v1683_v50  ;;  %v4550_v50 = vmov 15  }
 0x6a8   :  { %v1723_v0 = vadd.f32 %v1719_v59, %v1703_v8  ;;  %v4545_v59 = vmov 17   ;;  %v4553_v8 = vmov 31  }
 0x6a9   :  { %v1771_v11 = vpop.permute.xlu1 %1770 }
 0x6aa   :  { %v1743_v39 = vadd.f32 %v1739_v44, %v1723_v0  ;;  %v4551_v44 = vmov 29   ;;  %v4555_v0 = vmov 8  }
 0x6ac   :  { %v1755_v46 = vadd.f32 %v1753_v29, %v1743_v39  ;;  %v4558_v29 = vmov 23   ;;  %v4560_v39 = vmov 26  }
 0x6ad   :  { %v1791_v6 = vpop.permute.xlu1 %1790 }
 0x6ae   :  { %v1775_v23 = vadd.f32 %v1771_v11, %v1755_v46  ;;  %v4557_v11 = vmov 16   ;;  %v4561_v46 = vmov 2  }
 0x6b0   :  { %v1795_v16 = vadd.f32 %v1791_v6, %v1775_v23  ;;  %v4562_v6 = vmov 27   ;;  %v4564_v23 = vmov 30  }
 0x6b1   :  { %v1811_v24 = vpop.permute.xlu1 %1810 }
 0x6b2   :  { %v1815_v18 = vadd.f32 %v1811_v24, %v1795_v16  ;;  %v4568_v16 = vmov 1   ;;  %v4570_v24 = vld [vmem:[#allocation10_spill] sm:$0xff] }
 0x6b4   :  { %v1816_v27 = vpack.c.bf16 %v1815_v18, %v1814_v3 }
 0x6b6   :  { %2811 = vmatpush3.bf16.msra.mxu1 %v1816_v27 }
 0x6b7   :  { %2822 = vmatprep.subr.bf16.mxu1 %v4542_v54 }
 0x6b9   :  { %2813 = vmatmul.mubr.msk.bf16.vlgmr.msra.gmra.mxu1 %vm259_vm5, %v3724_v48 }
 0x6ba   :  { %2823 = vmatpush3.bf16.msra.mxu1 %v3245_v56  ;;  %2826 = vmatprep.mubr.msk.bf16.mxu1 %vm3136_vm2, %v4542_v54 }
 0x6bb   :  { %2824 = vmatprep.subr.bf16.mxu1 %v4542_v54 }
 0x6be   :  { %2825 = vmatpush3.bf16.msra.mxu1 %v3251_v60 }
 0x6bf   :  { %2836 = vmatprep.subr.bf16.mxu1 %v4542_v54 }
 0x779   :  { %v1893_v36 = vpop.f32.mrf.mxu1 }
 0x77a   :  { %v1894_v10 = vadd.f32 %v1893_v36, %v3748_v34 }
 0x77b   :  { %v2814_v25 = vpop.f32.mrf.mxu1 }
 0x77c   :  { %v1899_v15 = vadd.f32 %v1894_v10, %v3735_v4  ;;  %v4571_v10 = vld [vmem:[#allocation11_spill] sm:$0xff] }
 0x77d   :  { %v1896_v12 = vpop.f32.mrf.mxu1 }
 0x77e   :  { %v1900_v38 = vmax.f32 %v1899_v15, 0.0 }
 0x77f   :  { %v2815_v9 = vpop.f32.mrf.mxu1 }
 0x780   :  { %v1901_v62 = vpack.c.bf16 %v1900_v38, %v1900_v38 }
 0x782   :  { %2827 = vmatmul.mubr.msk.bf16.vlgmr.msra.gmra.mxu1 %vm1105_vm10, %v1901_v62  ;;  %v1903_v56 = vsel %vm469_vm6, %v1901_v62, 0 }
 0x783   :  { %2817 = vmatpush3.bf16.msra.mxu0 %v1903_v56  ;;  %2840 = vmatprep.mubr.msk.bf16.mxu1 %vm3136_vm2, %v4542_v54 }
 0x784   :  { %2830 = vmatprep.subr.bf16.mxu0 %v4542_v54 }
 0x786   :  { %2819 = vmatmul.mubr.msk.bf16.vlgmr.msra.gmra.mxu0 %vm465_vm9, %v3262_v63 }
 0x787   :  { %2832 = vmatprep.mubr.msk.bf16.mxu0 %vm3136_vm2, %v4542_v54 }
 0x842   :  { %v4080_v60 = vpop.f32.mrf.mxu1 }
 0x844   :  { %v2828_v4 = vpop.f32.mrf.mxu1 }
 0x846   :  { %v4082_v34 = vpop.f32.mrf.mxu0  ;;  %v2564_v58 = vpop.f32.mrf.mxu1 }
 0x847   :  { %1981 = vperm.xlu1 %3015, %v4082_v34   ;;  %1961 = vperm.xlu0 %3014, %v4082_v34  }
 0x848   :  { %v2820_v51 = vpop.f32.mrf.mxu0  ;;  %v2829_v41 = vpop.f32.mrf.mxu1 }
 0x84a   :  { %v4086_v28 = vpop.f32.mrf.mxu0 }
 0x84b   :  { %3016 = vset.pattern.permute.xlu1 %v4540_v53  ;;  %3017 = vset.pattern.permute.xlu0 %v4513_v1 }
 0x84c   :  { %2001 = vperm.xlu1 %3016, %v4082_v34   ;;  %2033 = vperm.xlu0 %3017, %v4082_v34   ;;  %v2821_v63 = vpop.f32.mrf.mxu0 }
 0x850   :  { %3018 = vset.pattern.permute.xlu1 %v4515_v2  ;;  %3020 = vset.pattern.permute.xlu0 %v4517_v19 }
 0x851   :  { %2053 = vperm.xlu1 %3018, %v4082_v34   ;;  %2105 = vperm.xlu0 %3020, %v4082_v34  }
 0x855   :  { %3019 = vset.pattern.permute.xlu1 %v4510_v49  ;;  %3023 = vset.pattern.permute.xlu0 %v4543_v40 }
 0x856   :  { %2073 = vperm.xlu1 %3019, %v4082_v34   ;;  %2177 = vperm.xlu0 %3023, %v4082_v34  }
 0x85a   :  { %3021 = vset.pattern.permute.xlu1 %v4544_v57  ;;  %3026 = vset.pattern.permute.xlu0 %v4545_v59 }
 0x85b   :  { %2125 = vperm.xlu1 %3021, %v4082_v34   ;;  %2249 = vperm.xlu0 %3026, %v4082_v34  }
 0x85f   :  { %3022 = vset.pattern.permute.xlu1 %v4546_v33  ;;  %3029 = vset.pattern.permute.xlu0 %v4547_v30 }
 0x860   :  { %2145 = vperm.xlu1 %3022, %v4082_v34   ;;  %2321 = vperm.xlu0 %3029, %v4082_v34  }
 0x864   :  { %3024 = vset.pattern.permute.xlu1 %v4548_v13  ;;  %3032 = vset.pattern.permute.xlu0 %v4549_v5 }
 0x865   :  { %2197 = vperm.xlu1 %3024, %v4082_v34   ;;  %2393 = vperm.xlu0 %3032, %v4082_v34  }
 0x869   :  { %3025 = vset.pattern.permute.xlu1 %v4550_v50  ;;  %3035 = vset.pattern.permute.xlu0 %v4551_v44 }
 0x86a   :  { %2217 = vperm.xlu1 %3025, %v4082_v34   ;;  %2465 = vperm.xlu0 %3035, %v4082_v34  }
 0x86e   :  { %3027 = vset.pattern.permute.xlu1 %v4552_v52  ;;  %3038 = vset.pattern.permute.xlu0 %v4553_v8 }
 0x86f   :  { %2269 = vperm.xlu1 %3027, %v4082_v34   ;;  %2505 = vperm.xlu0 %3038, %v4082_v34  }
 0x873   :  { %3028 = vset.pattern.permute.xlu1 %v4554_v43  ;;  %3040 = vset.pattern.permute.xlu0 %v4555_v0 }
 0x874   :  { %2289 = vperm.xlu1 %3028, %v4082_v34   ;;  %2093 = vperm.xlu0 %3040, %v4082_v34  }
 0x878   :  { %3030 = vset.pattern.permute.xlu1 %v4556_v31  ;;  %3042 = vset.pattern.permute.xlu0 %v4557_v11 }
 0x879   :  { %2341 = vperm.xlu1 %3030, %v4082_v34   ;;  %2237 = vperm.xlu0 %3042, %v4082_v34  }
 0x87d   :  { %3031 = vset.pattern.permute.xlu1 %v4558_v29  ;;  %3044 = vset.pattern.permute.xlu0 %v4559_v26 }
 0x87e   :  { %2361 = vperm.xlu1 %3031, %v4082_v34   ;;  %2381 = vperm.xlu0 %3044, %v4082_v34  }
 0x882   :  { %3033 = vset.pattern.permute.xlu1 %v4560_v39  ;;  %3046 = vset.pattern.permute.xlu0 %v4561_v46 }
 0x883   :  { %2413 = vperm.xlu1 %3033, %v4082_v34   ;;  %1985 = vperm.xlu0 %3046, %v4086_v28  }
 0x887   :  { %3034 = vset.pattern.permute.xlu1 %v4562_v6  ;;  %3049 = vset.pattern.permute.xlu0 %v4515_v2  ;;  %v4565_v2 = vmov 4  }
 0x888   :  { %2433 = vperm.xlu1 %3034, %v4082_v34   ;;  %2057 = vperm.xlu0 %3049, %v4086_v28  }
 0x88c   :  { %3036 = vset.pattern.permute.xlu1 %v4563_v55  ;;  %3052 = vset.pattern.permute.xlu0 %v4544_v57 }
 0x88d   :  { %1948 = vperm.xlu1 %3036, %v4082_v34   ;;  %2129 = vperm.xlu0 %3052, %v4086_v28  }
 0x891   :  { %3037 = vset.pattern.permute.xlu1 %v4564_v23  ;;  %3055 = vset.pattern.permute.xlu0 %v4548_v13 }
 0x892   :  { %2485 = vperm.xlu1 %3037, %v4082_v34   ;;  %2201 = vperm.xlu0 %3055, %v4086_v28  }
 0x896   :  { %3039 = vset.pattern.permute.xlu1 %v4565_v2  ;;  %3058 = vset.pattern.permute.xlu0 %v4552_v52 }
 0x897   :  { %2021 = vperm.xlu1 %3039, %v4082_v34   ;;  %2273 = vperm.xlu0 %3058, %v4086_v28  }
 0x89b   :  { %3041 = vset.pattern.permute.xlu1 %v4566_v37  ;;  %3061 = vset.pattern.permute.xlu0 %v4556_v31 }
 0x89c   :  { %2165 = vperm.xlu1 %3041, %v4082_v34   ;;  %2345 = vperm.xlu0 %3061, %v4086_v28  }
 0x8a0   :  { %3043 = vset.pattern.permute.xlu1 %v4567_v17  ;;  %3064 = vset.pattern.permute.xlu0 %v4560_v39 }
 0x8a1   :  { %2309 = vperm.xlu1 %3043, %v4082_v34   ;;  %2417 = vperm.xlu0 %3064, %v4086_v28  }
 0x8a5   :  { %3045 = vset.pattern.permute.xlu1 %v4568_v16  ;;  %3067 = vset.pattern.permute.xlu0 %v4563_v55 }
 0x8a6   :  { %1953 = vperm.xlu0 %3067, %v4086_v28   ;;  %1965 = vperm.xlu1 %3045, %v4086_v28  }
 0x8aa   :  { %3070 = vset.pattern.permute.xlu0 %v4565_v2  ;;  %3047 = vset.pattern.permute.xlu1 %v4540_v53  ;;  %v4569_v53 = vmov 28   ;;  %v4573_v2 = vld [vmem:[#allocation9_spill] sm:$0xff] }
 0x8ab   :  { %2025 = vperm.xlu0 %3070, %v4086_v28   ;;  %2005 = vperm.xlu1 %3047, %v4086_v28  }
 0x8af   :  { %3072 = vset.pattern.permute.xlu0 %v4566_v37  ;;  %3048 = vset.pattern.permute.xlu1 %v4513_v1 }
 0x8b0   :  { %2169 = vperm.xlu0 %3072, %v4086_v28   ;;  %2037 = vperm.xlu1 %3048, %v4086_v28  }
 0x8b4   :  { %3074 = vset.pattern.permute.xlu0 %v4567_v17  ;;  %3050 = vset.pattern.permute.xlu1 %v4510_v49 }
 0x8b5   :  { %2313 = vperm.xlu0 %3074, %v4086_v28   ;;  %2077 = vperm.xlu1 %3050, %v4086_v28  }
 0x8b9   :  { %3051 = vset.pattern.permute.xlu1 %v4517_v19  ;;  %3077 = vset.pattern.permute.xlu0 %v4569_v53 }
 0x8ba   :  { %2109 = vperm.xlu1 %3051, %v4086_v28  }
 0x8be   :  { %3053 = vset.pattern.permute.xlu1 %v4546_v33 }
 0x8bf   :  { %2149 = vperm.xlu1 %3053, %v4086_v28  }
 0x8c2   :  { %v1982_v1 = vpop.permute.xlu1 %1981  ;;  %v1962_v38 = vpop.permute.xlu0 %1961 }
 0x8c3   :  { %v1988_v3 = vmul.f32 %v1982_v1, %v4570_v24  ;;  %3054 = vset.pattern.permute.xlu1 %v4543_v40 }
 0x8c4   :  { %2181 = vperm.xlu1 %3054, %v4086_v28  }
 0x8c5   :  { %1992 = vrot.lane.b32.xlu0 %v1988_v3, %s3169_s0 }
 0x8c7   :  { %v2002_v49 = vpop.permute.xlu1 %2001  ;;  %v2034_v62 = vpop.permute.xlu0 %2033 }
 0x8c8   :  { %v2008_v19 = vmul.f32 %v2002_v49, %v4570_v24  ;;  %3056 = vset.pattern.permute.xlu1 %v4550_v50 }
 0x8c9   :  { %2221 = vperm.xlu1 %3056, %v4086_v28  }
 0x8ca   :  { %2012 = vrot.lane.b32.xlu0 %v2008_v19, %s3132_s25 }
 0x8cc   :  { %v2054_v18 = vpop.permute.xlu1 %2053  ;;  %v2106_v58 = vpop.permute.xlu0 %2105 }
 0x8cd   :  { %3057 = vset.pattern.permute.xlu1 %v4545_v59  ;;  %v2112_v55 = vmul.f32 %v2106_v58, %v4571_v10 }
 0x8ce   :  { %2253 = vperm.xlu1 %3057, %v4086_v28  }
 0x8d1   :  { %v2074_v27 = vpop.permute.xlu1 %2073  ;;  %v2178_v40 = vpop.permute.xlu0 %2177 }
 0x8d2   :  { %3059 = vset.pattern.permute.xlu1 %v4554_v43  ;;  %v2184_v37 = vmul.f32 %v2178_v40, %v4573_v2 }
 0x8d3   :  { %2293 = vperm.xlu1 %3059, %v4086_v28  }
 0x8d6   :  { %v2126_v36 = vpop.permute.xlu1 %2125  ;;  %v2250_v59 = vpop.permute.xlu0 %2249 }
 0x8d7   :  { %v2132_v25 = vmul.f32 %v2126_v36, %v4571_v10  ;;  %3060 = vset.pattern.permute.xlu1 %v4547_v30 }
 0x8d8   :  { %2325 = vperm.xlu1 %3060, %v4086_v28  }
 0x8d9   :  { %2136 = vrot.lane.b32.xlu0 %v2132_v25, %s3169_s0 }
 0x8db   :  { %v2146_v15 = vpop.permute.xlu1 %2145  ;;  %v2322_v30 = vpop.permute.xlu0 %2321 }
 0x8dc   :  { %v2152_v12 = vmul.f32 %v2146_v15, %v4571_v10  ;;  %3062 = vset.pattern.permute.xlu1 %v4558_v29  ;;  %v2328_v36 = vmul.f32 %v2322_v30, %v3475_v61 }
 0x8dd   :  { %2365 = vperm.xlu1 %3062, %v4086_v28  }
 0x8de   :  { %2156 = vrot.lane.b32.xlu0 %v2152_v12, %s3132_s25 }
 0x8e0   :  { %v2198_v9 = vpop.permute.xlu1 %2197 }
 0x8e1   :  { %3063 = vset.pattern.permute.xlu1 %v4549_v5  ;;  %v4221_v5 = vpop.permute.xlu0 %2393 }
 0x8e2   :  { %2397 = vperm.xlu1 %3063, %v4086_v28  }
 0x8e5   :  { %v2218_v56 = vpop.permute.xlu1 %2217  ;;  %v4230_v43 = vpop.permute.xlu0 %2465 }
 0x8e6   :  { %3065 = vset.pattern.permute.xlu1 %v4562_v6  ;;  %v2224_v49 = vmul.f32 %v2218_v56, %v4573_v2 }
 0x8e7   :  { %2437 = vperm.xlu1 %3065, %v4086_v28  }
 0x8ea   :  { %v2270_v4 = vpop.permute.xlu1 %2269 }
 0x8eb   :  { %v2276_v51 = vmul.f32 %v2270_v4, %v3570_v7  ;;  %3066 = vset.pattern.permute.xlu1 %v4551_v44  ;;  %v1968_v44 = vmul.f32 %v1962_v38, %v4570_v24 }
 0x8ec   :  { %2469 = vperm.xlu1 %3066, %v4086_v28  }
 0x8ed   :  { %2280 = vrot.lane.b32.xlu0 %v2276_v51, %s3169_s0  ;;  %v4574_v51 = vld [vmem:[#allocation12_spill] sm:$0xff] }
 0x8ef   :  { %v2290_v41 = vpop.permute.xlu1 %2289 }
 0x8f0   :  { %v2296_v63 = vmul.f32 %v2290_v41, %v3570_v7  ;;  %3068 = vset.pattern.permute.xlu1 %v4564_v23 }
 0x8f1   :  { %2489 = vperm.xlu1 %3068, %v4086_v28  }
 0x8f2   :  { %2300 = vrot.lane.b32.xlu0 %v2296_v63, %s3132_s25 }
 0x8f4   :  { %v2342_v57 = vpop.permute.xlu1 %2341 }
 0x8f5   :  { %3069 = vset.pattern.permute.xlu1 %v4553_v8  ;;  %v2348_v38 = vmul.f32 %v2342_v57, %v3475_v61 }
 0x8f6   :  { %2509 = vperm.xlu1 %3069, %v4086_v28  }
 0x8f9   :  { %v2362_v33 = vpop.permute.xlu1 %2361 }
 0x8fa   :  { %3071 = vset.pattern.permute.xlu1 %v4555_v0  ;;  %v4572_v0 = vld [vmem:[#allocation8_spill] sm:$0xff]  ;;  %v2368_v56 = vmul.f32 %v2362_v33, %v3475_v61 }
 0x8fb   :  { %2097 = vperm.xlu1 %3071, %v4086_v28   ;;  %v2040_v31 = vmul.f32 %v2034_v62, %v4572_v0  ;;  %v2060_v29 = vmul.f32 %v2054_v18, %v4572_v0  ;;  %v2080_v46 = vmul.f32 %v2074_v27, %v4572_v0  ;;  %v2256_v18 = vmul.f32 %v2250_v59, %v3570_v7 }
 0x8fe   :  { %v4217_v13 = vpop.permute.xlu1 %2413 }
 0x8ff   :  { %3073 = vset.pattern.permute.xlu1 %v4557_v11 }
 0x900   :  { %2241 = vperm.xlu1 %3073, %v4086_v28  }
 0x903   :  { %v4223_v50 = vpop.permute.xlu1 %2433 }
 0x904   :  { %3075 = vset.pattern.permute.xlu1 %v4559_v26  ;;  %v4239_v26 = vpop.permute.xlu0 %2505 }
 0x905   :  { %2385 = vperm.xlu1 %3075, %v4086_v28  }
 0x908   :  { %v4228_v52 = vpop.permute.xlu1 %1948  ;;  %v4245_v6 = vpop.permute.xlu0 %2093 }
 0x909   :  { %1972 = vrot.lane.b32.xlu1 %v1968_v44, %s3170_s2 }
 0x90a   :  { %3076 = vset.pattern.permute.xlu1 %v4569_v53  ;;  %v2204_v53 = vmul.f32 %v2198_v9, %v4573_v2 }
 0x90c   :  { %v4253_v17 = vpop.permute.xlu0 %2237 }
 0x90d   :  { %v4235_v11 = vpop.permute.xlu1 %2485  ;;  %2044 = vrot.lane.b32.xlu1 %v2040_v31, %s3170_s2 }
 0x910   :  { %v4259_v1 = vpop.permute.xlu0 %2381 }
 0x911   :  { %2064 = vrot.lane.b32.xlu1 %v2060_v29, %s3169_s0 }
 0x912   :  { %v4242_v39 = vpop.permute.xlu1 %2021 }
 0x914   :  { %v1986_v27 = vpop.permute.xlu0 %1985 }
 0x915   :  { %2084 = vrot.lane.b32.xlu1 %v2080_v46, %s3132_s25  ;;  %v1989_v40 = vmul.f32 %v1986_v27, %v4574_v51 }
 0x917   :  { %v4249_v23 = vpop.permute.xlu1 %2165 }
 0x918   :  { %v2058_v12 = vpop.permute.xlu0 %2057 }
 0x919   :  { %2116 = vrot.lane.b32.xlu1 %v2112_v55, %s3170_s2  ;;  %v2061_v9 = vmul.f32 %v2058_v12, %v3299_v20 }
 0x91c   :  { %v4255_v16 = vpop.permute.xlu1 %2309  ;;  %v2130_v57 = vpop.permute.xlu0 %2129 }
 0x91d   :  { %2188 = vrot.lane.b32.xlu1 %v2184_v37, %s3170_s2  ;;  %v2133_v55 = vmul.f32 %v2130_v57, %v3589_v42  ;;  %v2420_v37 = vmul.f32 %v4217_v13, %v3607_v35 }
 0x920   :  { %v2202_v44 = vpop.permute.xlu0 %2201 }
 0x921   :  { %2208 = vrot.lane.b32.xlu1 %v2204_v53, %s3169_s0  ;;  %v1966_v3 = vpop.permute.xlu1 %1965 }
 0x922   :  { %v1969_v41 = vmul.f32 %v1966_v3, %v4574_v51 }
 0x924   :  { %v2274_v53 = vpop.permute.xlu0 %2273 }
 0x925   :  { %2228 = vrot.lane.b32.xlu1 %v2224_v49, %s3132_s25  ;;  %v2400_v49 = vmul.f32 %v4221_v5, %v3607_v35 }
 0x926   :  { %v2006_v19 = vpop.permute.xlu1 %2005 }
 0x927   :  { %v2009_v59 = vmul.f32 %v2006_v19, %v4574_v51 }
 0x928   :  { %v2346_v27 = vpop.permute.xlu0 %2345 }
 0x929   :  { %2260 = vrot.lane.b32.xlu1 %v2256_v18, %s3170_s2 }
 0x92b   :  { %v2038_v25 = vpop.permute.xlu1 %2037 }
 0x92c   :  { %v2041_v15 = vmul.f32 %v2038_v25, %v3299_v20 }
 0x92d   :  { %2332 = vrot.lane.b32.xlu1 %v2328_v36, %s3170_s2  ;;  %v2349_v36 = vmul.f32 %v2346_v27, %v3323_v32 }
 0x92e   :  { %2046 = vrot.lane.b32.xlu0 %v2041_v15, %s3170_s2  ;;  %v2277_v15 = vmul.f32 %v2274_v53, %v3614_v14 }
 0x930   :  { %v2078_v62 = vpop.permute.xlu1 %2077 }
 0x931   :  { %2352 = vrot.lane.b32.xlu1 %v2348_v38, %s3169_s0  ;;  %v2081_v4 = vmul.f32 %v2078_v62, %v3299_v20 }
 0x932   :  { %2066 = vrot.lane.b32.xlu0 %v2061_v9, %s3169_s0  ;;  %v2440_v9 = vmul.f32 %v4223_v50, %v3607_v35  ;;  %v2492_v50 = vmul.f32 %v4235_v11, %v3653_v45 }
 0x935   :  { %2372 = vrot.lane.b32.xlu1 %v2368_v56, %s3132_s25  ;;  %v2110_v58 = vpop.permute.xlu1 %2109 }
 0x936   :  { %2086 = vrot.lane.b32.xlu0 %v2081_v4, %s3132_s25  ;;  %v2113_v29 = vmul.f32 %v2110_v58, %v3589_v42  ;;  %v2472_v4 = vmul.f32 %v4230_v43, %v3653_v45  ;;  %v2418_v58 = vpop.permute.xlu0 %2417  ;;  %v2512_v43 = vmul.f32 %v4239_v26, %v3653_v45 }
 0x939   :  { %1974 = vrot.lane.b32.xlu1 %v1969_v41, %s3170_s2  ;;  %v2421_v41 = vmul.f32 %v2418_v58, %v3636_v22 }
 0x93a   :  { %2457 = vperm.xlu0 %3077, %v4086_v28   ;;  %v2150_v63 = vpop.permute.xlu1 %2149  ;;  %v2205_v28 = vmul.f32 %v2202_v44, %v3302_v21  ;;  %v4333_v57 = vpop.permute.xlu0 %1953 }
 0x93b   :  { %v2153_v3 = vmul.f32 %v2150_v63, %v3589_v42 }
 0x93d   :  { %1994 = vrot.lane.b32.xlu1 %v1989_v40, %s3169_s0 }
 0x93e   :  { %3078 = vset.pattern.permute.xlu0 %v4553_v8 }
 0x93f   :  { %v2182_v33 = vpop.permute.xlu1 %2181 }
 0x940   :  { %v2185_v30 = vmul.f32 %v2182_v33, %v3302_v21 }
 0x941   :  { %2014 = vrot.lane.b32.xlu1 %v2009_v59, %s3132_s25 }
 0x942   :  { %2190 = vrot.lane.b32.xlu0 %v2185_v30, %s3170_s2  ;;  %v4339_v30 = vpop.permute.xlu0 %2025 }
 0x944   :  { %v2222_v31 = vpop.permute.xlu1 %2221 }
 0x945   :  { %2453 = vperm.xlu1 %3076, %v4082_v34   ;;  %v2225_v8 = vmul.f32 %v2222_v31, %v3302_v21 }
 0x946   :  { %2210 = vrot.lane.b32.xlu0 %v2205_v28, %s3169_s0  ;;  %v4346_v31 = vpop.permute.xlu0 %2169 }
 0x949   :  { %2118 = vrot.lane.b32.xlu1 %v2113_v29, %s3170_s2  ;;  %v2254_v46 = vpop.permute.xlu1 %2253 }
 0x94a   :  { %2230 = vrot.lane.b32.xlu0 %v2225_v8, %s3132_s25  ;;  %v2257_v13 = vmul.f32 %v2254_v46, %v3614_v14  ;;  %v4351_v8 = vpop.permute.xlu0 %2313 }
 0x94d   :  { %2138 = vrot.lane.b32.xlu1 %v2133_v55, %s3169_s0 }
 0x94e   :  { %2424 = vrot.lane.b32.xlu0 %v2420_v37, %s3169_s0  ;;  %v2294_v34 = vpop.permute.xlu1 %2293  ;;  %v1993_v55 = vpop.permute.xlu0 %1992  ;;  %v1956_v37 = vmul.f32 %v4228_v52, %v4570_v24 }
 0x94f   :  { %v2297_v38 = vmul.f32 %v2294_v34, %v3614_v14 }
 0x951   :  { %2158 = vrot.lane.b32.xlu1 %v2153_v3, %s3132_s25 }
 0x953   :  { %v2326_v19 = vpop.permute.xlu1 %2325 }
 0x954   :  { %v2329_v18 = vmul.f32 %v2326_v19, %v3323_v32 }
 0x955   :  { %2404 = vrot.lane.b32.xlu1 %v2400_v49, %s3170_s2  ;;  %v2013_v49 = vpop.permute.xlu0 %2012 }
 0x956   :  { %2334 = vrot.lane.b32.xlu0 %v2329_v18, %s3170_s2  ;;  %v2028_v18 = vmul.f32 %v4242_v39, %v4572_v0  ;;  %v2172_v0 = vmul.f32 %v4249_v23, %v4573_v2  ;;  %v2316_v23 = vmul.f32 %v4255_v16, %v3475_v61 }
 0x958   :  { %v2366_v25 = vpop.permute.xlu1 %2365 }
 0x959   :  { %2262 = vrot.lane.b32.xlu1 %v2257_v13, %s3170_s2  ;;  %v2369_v5 = vmul.f32 %v2366_v25, %v3323_v32 }
 0x95a   :  { %2354 = vrot.lane.b32.xlu0 %v2349_v36, %s3169_s0 }
 0x95d   :  { %2282 = vrot.lane.b32.xlu1 %v2277_v15, %s3169_s0  ;;  %v2398_v12 = vpop.permute.xlu1 %2397 }
 0x95e   :  { %2374 = vrot.lane.b32.xlu0 %v2369_v5, %s3132_s25  ;;  %v2401_v56 = vmul.f32 %v2398_v12, %v3636_v22  ;;  %v2100_v12 = vmul.f32 %v4245_v6, %v4571_v10  ;;  %v2244_v10 = vmul.f32 %v4253_v17, %v3570_v7  ;;  %v2388_v7 = vmul.f32 %v4259_v1, %v3607_v35 }
 0x961   :  { %2302 = vrot.lane.b32.xlu1 %v2297_v38, %s3132_s25  ;;  %v2137_v38 = vpop.permute.xlu0 %2136 }
 0x962   :  { %2444 = vrot.lane.b32.xlu0 %v2440_v9, %s3132_s25  ;;  %v2438_v62 = vpop.permute.xlu1 %2437 }
 0x963   :  { %v2441_v40 = vmul.f32 %v2438_v62, %v3636_v22 }
 0x965   :  { %2406 = vrot.lane.b32.xlu1 %v2401_v56, %s3170_s2  ;;  %v2157_v56 = vpop.permute.xlu0 %2156 }
 0x966   :  { %2476 = vrot.lane.b32.xlu0 %v2472_v4, %s3170_s2 }
 0x967   :  { %v2470_v63 = vpop.permute.xlu1 %2469 }
 0x968   :  { %v2473_v33 = vmul.f32 %v2470_v63, %v3656_v47 }
 0x969   :  { %2426 = vrot.lane.b32.xlu1 %v2421_v41, %s3169_s0  ;;  %v2281_v41 = vpop.permute.xlu0 %2280 }
 0x96a   :  { %2496 = vrot.lane.b32.xlu0 %v2492_v50, %s3169_s0 }
 0x96c   :  { %v2490_v59 = vpop.permute.xlu1 %2489 }
 0x96d   :  { %2446 = vrot.lane.b32.xlu1 %v2441_v40, %s3132_s25  ;;  %v2493_v44 = vmul.f32 %v2490_v59, %v3656_v47  ;;  %v2301_v6 = vpop.permute.xlu0 %2300 }
 0x96e   :  { %2516 = vrot.lane.b32.xlu0 %v2512_v43, %s3132_s25 }
 0x971   :  { %2478 = vrot.lane.b32.xlu1 %v2473_v33, %s3170_s2  ;;  %v2510_v11 = vpop.permute.xlu1 %2509 }
 0x972   :  { %v2513_v26 = vmul.f32 %v2510_v11, %v3656_v47 }
 0x975   :  { %2498 = vrot.lane.b32.xlu1 %v2493_v44, %s3169_s0 }
 0x976   :  { %v4343_v28 = vpop.permute.xlu1 %2097 }
 0x979   :  { %2518 = vrot.lane.b32.xlu1 %v2513_v26, %s3132_s25 }
 0x97b   :  { %v4349_v29 = vpop.permute.xlu1 %2241 }
 0x980   :  { %v4353_v46 = vpop.permute.xlu1 %2385 }
 0x984   :  { %v1973_v34 = vpop.permute.xlu1 %1972 }
 0x985   :  { %v1978_v53 = vadd.f32 %v1973_v34, %v1956_v37 }
 0x987   :  { %v1998_v3 = vadd.f32 %v1993_v55, %v1978_v53 }
 0x988   :  { %v2045_v19 = vpop.permute.xlu1 %2044 }
 0x989   :  { %v2018_v27 = vadd.f32 %v2013_v49, %v1998_v3 }
 0x98b   :  { %v2030_v13 = vadd.f32 %v2028_v18, %v2018_v27 }
 0x98c   :  { %v2065_v36 = vpop.permute.xlu1 %2064 }
 0x98d   :  { %v2050_v25 = vadd.f32 %v2045_v19, %v2030_v13 }
 0x98f   :  { %v2070_v15 = vadd.f32 %v2065_v36, %v2050_v25 }
 0x990   :  { %v2085_v5 = vpop.permute.xlu1 %2084 }
 0x991   :  { %v2090_v9 = vadd.f32 %v2085_v5, %v2070_v15  ;;  %v1957_v5 = vmul.f32 %v4333_v57, %v4574_v51 }
 0x993   :  { %v2102_v24 = vadd.f32 %v2100_v12, %v2090_v9 }
 0x994   :  { %v2117_v52 = vpop.permute.xlu1 %2116 }
 0x995   :  { %v2122_v62 = vadd.f32 %v2117_v52, %v2102_v24  ;;  %v2029_v24 = vmul.f32 %v4339_v30, %v3299_v20  ;;  %v2173_v20 = vmul.f32 %v4346_v31, %v3302_v21  ;;  %v2317_v21 = vmul.f32 %v4351_v8, %v3323_v32 }
 0x997   :  { %v2142_v4 = vadd.f32 %v2137_v38, %v2122_v62 }
 0x998   :  { %v2189_v58 = vpop.permute.xlu1 %2188 }
 0x999   :  { %v2162_v39 = vadd.f32 %v2157_v56, %v2142_v4 }
 0x99b   :  { %v2174_v63 = vadd.f32 %v2172_v0, %v2162_v39  ;;  %v2101_v39 = vmul.f32 %v4343_v28, %v3589_v42  ;;  %v2245_v42 = vmul.f32 %v4349_v29, %v3614_v14  ;;  %v2389_v14 = vmul.f32 %v4353_v46, %v3636_v22 }
 0x99c   :  { %v2209_v50 = vpop.permute.xlu1 %2208 }
 0x99d   :  { %v2194_v40 = vadd.f32 %v2189_v58, %v2174_v63 }
 0x99f   :  { %v2214_v43 = vadd.f32 %v2209_v50, %v2194_v40 }
 0x9a0   :  { %v2229_v59 = vpop.permute.xlu1 %2228  ;;  %v2047_v26 = vpop.permute.xlu0 %2046 }
 0x9a1   :  { %v2234_v33 = vadd.f32 %v2229_v59, %v2214_v43 }
 0x9a3   :  { %v2246_v11 = vadd.f32 %v2244_v10, %v2234_v33 }
 0x9a4   :  { %v2261_v44 = vpop.permute.xlu1 %2260  ;;  %v2067_v53 = vpop.permute.xlu0 %2066 }
 0x9a5   :  { %v2266_v55 = vadd.f32 %v2261_v44, %v2246_v11 }
 0x9a7   :  { %v2286_v37 = vadd.f32 %v2281_v41, %v2266_v55 }
 0x9a8   :  { %v2333_v34 = vpop.permute.xlu1 %2332  ;;  %v2087_v17 = vpop.permute.xlu0 %2086 }
 0x9a9   :  { %v2306_v2 = vadd.f32 %v2301_v6, %v2286_v37 }
 0x9ab   :  { %v2318_v3 = vadd.f32 %v2316_v23, %v2306_v2 }
 0x9ac   :  { %v2353_v49 = vpop.permute.xlu1 %2352 }
 0x9ad   :  { %v2338_v19 = vadd.f32 %v2333_v34, %v2318_v3 }
 0x9af   :  { %v2358_v18 = vadd.f32 %v2353_v49, %v2338_v19 }
 0x9b0   :  { %v2373_v27 = vpop.permute.xlu1 %2372 }
 0x9b1   :  { %v2378_v13 = vadd.f32 %v2373_v27, %v2358_v18 }
 0x9b3   :  { %v2390_v36 = vadd.f32 %v2388_v7, %v2378_v13 }
 0x9b4   :  { %v1975_v25 = vpop.permute.xlu1 %1974 }
 0x9b5   :  { %v2458_v15 = vpop.permute.xlu0 %2457  ;;  %v1979_v61 = vadd.f32 %v1975_v25, %v1957_v5 }
 0x9b8   :  { %v1995_v12 = vpop.permute.xlu1 %1994 }
 0x9b9   :  { %v2191_v16 = vpop.permute.xlu0 %2190  ;;  %v1999_v38 = vadd.f32 %v1995_v12, %v1979_v61 }
 0x9bc   :  { %v2015_v9 = vpop.permute.xlu1 %2014 }
 0x9bd   :  { %v2019_v52 = vadd.f32 %v2015_v9, %v1999_v38  ;;  %v2211_v62 = vpop.permute.xlu0 %2210 }
 0x9bf   :  { %v2031_v56 = vadd.f32 %v2029_v24, %v2019_v52 }
 0x9c0   :  { %v2454_v35 = vpop.permute.xlu1 %2453 }
 0x9c1   :  { %v2051_v1 = vadd.f32 %v2047_v26, %v2031_v56  ;;  %v2231_v4 = vpop.permute.xlu0 %2230  ;;  %v2460_v32 = vmul.f32 %v2454_v35, %v3653_v45  ;;  %v2636_v45 = vld [vmem:[#allocation2 + $0x140] sm:$0xf] }
 0x9c2   :  { %v2637_v35 = vld [vmem:[#allocation2 + $0x160] sm:$0xf] }
 0x9c3   :  { %v2071_v58 = vadd.f32 %v2067_v53, %v2051_v1 }
 0x9c4   :  { %v2119_v0 = vpop.permute.xlu1 %2118 }
 0x9c5   :  { %v2091_v51 = vadd.f32 %v2087_v17, %v2071_v58  ;;  %v2425_v41 = vpop.permute.xlu0 %2424 }
 0x9c7   :  { %v2103_v57 = vadd.f32 %v2101_v39, %v2091_v51 }
 0x9c8   :  { %v2139_v63 = vpop.permute.xlu1 %2138 }
 0x9c9   :  { %v2123_v50 = vadd.f32 %v2119_v0, %v2103_v57  ;;  %v2335_v59 = vpop.permute.xlu0 %2334 }
 0x9cb   :  { %v2143_v40 = vadd.f32 %v2139_v63, %v2123_v50 }
 0x9cc   :  { %v2159_v43 = vpop.permute.xlu1 %2158 }
 0x9cd   :  { %v2163_v30 = vadd.f32 %v2159_v43, %v2143_v40  ;;  %v2355_v44 = vpop.permute.xlu0 %2354 }
 0x9cf   :  { %v2175_v10 = vadd.f32 %v2173_v20, %v2163_v30  ;;  %v3085_v20 = vld [vmem:[#allocation4 + $0x3] ss:$0 sm:$0xff] }
 0x9d0   :  { %v2405_v6 = vpop.permute.xlu1 %2404 }
 0x9d1   :  { %v2195_v33 = vadd.f32 %v2191_v16, %v2175_v10  ;;  %v2375_v23 = vpop.permute.xlu0 %2374  ;;  %v2410_v18 = vadd.f32 %v2405_v6, %v2390_v36  ;;  %v2461_v36 = vmul.f32 %v2458_v15, %v3656_v47  ;;  %v2733_v47 = vcombine.low %v2636_v45, %v2637_v35  ;;  %v2634_v15 = vld [vmem:[#allocation2 + $0x100] sm:$0xf] }
 0x9d3   :  { %v2215_v11 = vadd.f32 %v2211_v62, %v2195_v33  ;;  %v2430_v29 = vadd.f32 %v2425_v41, %v2410_v18  ;;  %2837 = vmatpush3.bf16.msra.mxu1 %v2733_v47  ;;  %v2635_v41 = vld [vmem:[#allocation2 + $0x120] sm:$0xf] }
 0x9d4   :  { %v2263_v26 = vpop.permute.xlu1 %2262  ;;  %2838 = vmatprep.subr.bf16.mxu1 %v4542_v54  ;;  %v2732_v63 = vcombine.low %v2634_v15, %v2635_v41 }
 0x9d5   :  { %v2235_v28 = vadd.f32 %v2231_v4, %v2215_v11  ;;  %v2445_v49 = vpop.permute.xlu0 %2444 }
 0x9d6   :  { %v2450_v61 = vadd.f32 %v2445_v49, %v2430_v29 }
 0x9d7   :  { %v2247_v55 = vadd.f32 %v2245_v42, %v2235_v28  ;;  %2839 = vmatpush3.bf16.msra.mxu1 %v2732_v63 }
 0x9d8   :  { %v2283_v37 = vpop.permute.xlu1 %2282  ;;  %v2462_v24 = vadd.f32 %v2460_v32, %v2450_v61 }
 0x9d9   :  { %v2267_v34 = vadd.f32 %v2263_v26, %v2247_v55  ;;  %v2477_v25 = vpop.permute.xlu0 %2476 }
 0x9da   :  { %v2482_v1 = vadd.f32 %v2477_v25, %v2462_v24 }
 0x9db   :  { %v2287_v2 = vadd.f32 %v2283_v37, %v2267_v34 }
 0x9dc   :  { %v2303_v53 = vpop.permute.xlu1 %2302 }
 0x9dd   :  { %v2307_v31 = vadd.f32 %v2303_v53, %v2287_v2  ;;  %v2497_v38 = vpop.permute.xlu0 %2496 }
 0x9de   :  { %v2502_v4 = vadd.f32 %v2497_v38, %v2482_v1 }
 0x9df   :  { %v2319_v3 = vadd.f32 %v2317_v21, %v2307_v31 }
 0x9e0   :  { %v2407_v19 = vpop.permute.xlu1 %2406 }
 0x9e1   :  { %v2339_v27 = vadd.f32 %v2335_v59, %v2319_v3  ;;  %v2517_v46 = vpop.permute.xlu0 %2516 }
 0x9e2   :  { %v2522_v39 = vadd.f32 %v2517_v46, %v2502_v4 }
 0x9e3   :  { %v2359_v7 = vadd.f32 %v2355_v44, %v2339_v27 }
 0x9e4   :  { %v2427_v17 = vpop.permute.xlu1 %2426 }
 0x9e5   :  { %v2379_v13 = vadd.f32 %v2375_v23, %v2359_v7  ;;  %v58_v7 = vld [vmem:[#allocation4 + $0x5] ss:$0 sm:$0xff] }
 0x9e7   :  { %v2391_v5 = vadd.f32 %v2389_v14, %v2379_v13  ;;  %v59_v13 = vld [vmem:[#allocation4 + $0x6] ss:$0 sm:$0xff] }
 0x9e8   :  { %v2447_v12 = vpop.permute.xlu1 %2446 }
 0x9e9   :  { %v2411_v16 = vadd.f32 %v2407_v19, %v2391_v5  ;;  %v57_v19 = vld [vmem:[#allocation4 + $0x4] ss:$0 sm:$0xff] }
 0x9eb   :  { %v2431_v8 = vadd.f32 %v2427_v17, %v2411_v16 }
 0x9ec   :  { %v2479_v9 = vpop.permute.xlu1 %2478 }
 0x9ed   :  { %v2451_v52 = vadd.f32 %v2447_v12, %v2431_v8 }
 0x9ef   :  { %v2463_v62 = vadd.f32 %v2461_v36, %v2451_v52 }
 0x9f0   :  { %v2499_v56 = vpop.permute.xlu1 %2498 }
 0x9f1   :  { %v2483_v22 = vadd.f32 %v2479_v9, %v2463_v62 }
 0x9f3   :  { %v2503_v58 = vadd.f32 %v2499_v56, %v2483_v22 }
 0x9f4   :  { %v2519_v0 = vpop.permute.xlu1 %2518 }
 0x9f5   :  { %v2523_v51 = vadd.f32 %v2519_v0, %v2503_v58 }
 0x9f7   :  { %v2524_v57 = vpack.c.bf16 %v2523_v51, %v2522_v39 }
 0x9f9   :  { %2831 = vmatpush3.bf16.msra.mxu0 %v2524_v57 }
 0x9fc   :  { %2833 = vmatmul.mubr.msk.bf16.vlgmr.msra.gmra.mxu0 %vm259_vm5, %v3724_v48 }
 0xabc   :  { %v2601_v50 = vpop.f32.mrf.mxu0 }
 0xabd   :  { %v2602_v40 = vadd.f32 %v2601_v50, %v4080_v60 }
 0xabe   :  { %v2834_v43 = vpop.f32.mrf.mxu0 }
 0xabf   :  { %v2607_v30 = vadd.f32 %v3085_v20, %v2602_v40 }
 0xac0   :  { %v2604_v59 = vpop.f32.mrf.mxu0 }
 0xac1   :  { %v2608_v10 = vmax.f32 %v2607_v30, 0.0 }
 0xac2   :  { %v2835_v6 = vpop.f32.mrf.mxu0 }
 0xac3   :  { %v2609_v48 = vsel %vm1105_vm10, %v2608_v10, 0.0 }
 0xac4   :  { %v2610_v33 = vrot.slane %v2609_v48, 4 }
 0xac6   :  { %v2611_v11 = vadd.f32 %v2610_v33, %v2609_v48 }
 0xac8   :  { %v2612_v44 = vrot.slane %v2611_v11, 2 }
 0xaca   :  { %v2613_v26 = vadd.f32 %v2612_v44, %v2611_v11 }
 0xacc   :  { %v2614_v54 = vrot.slane %v2613_v26, 1 }
 0xace   :  { %v2615_v42 = vadd.f32 %v2614_v54, %v2613_v26 }
 0xad0   :  { %v2617_v28 = vmul.f32 0.125, %v2615_v42 }
 0xad2   :  { %v2618_v55 = vsub.f32 %v2608_v10, %v2617_v28 }
 0xad4   :  { %v2619_v37 = vmul.f32 %v2618_v55, %v2618_v55  ;;  %v2628_v18 = vmul.f32 %v2618_v55, %v57_v19 }
 0xad6   :  { %v2620_v34 = vsel %vm1105_vm10, %v2619_v37, 0.0 }
 0xad7   :  { %v2621_v60 = vrot.slane %v2620_v34, 4 }
 0xad9   :  { %v2622_v23 = vadd.f32 %v2621_v60, %v2620_v34 }
 0xadb   :  { %v2623_v2 = vrot.slane %v2622_v23, 2 }
 0xadd   :  { %v2624_v53 = vadd.f32 %v2623_v2, %v2622_v23 }
 0xadf   :  { %v2625_v21 = vrot.slane %v2624_v53, 1 }
 0xae1   :  { %v2626_v31 = vadd.f32 %v2625_v21, %v2624_v53 }
 0xae3   :  { %v2627_v3 = vmul.f32 0.125, %v2626_v31 }
 0xae5   :  { %v2629_v49 = vadd.f32 1e-05, %v2627_v3 }
 0xae7   :  { %3079 = vrsqrt.f32 %v2629_v49 }
 0xaf4   :  { %v3080_v27 = vpop.eup %3079 }
 0xaf5   :  { %v2631_v17 = vmul.f32 %v3080_v27, %v2628_v18 }
 0xaf7   :  { %v2632_v14 = vadd.f32 %v2631_v17, %v58_v7 }
 0xaf9   :  { %v2633_v29 = vpack.c.bf16 %v2632_v14, %v2632_v14 }
 0xafb   :  { %2841 = vmatmul.mubr.msk.bf16.vlgmr.msra.gmra.mxu1 %vm1105_vm10, %v2633_v29 }
 0xbbb   :  { %v2687_v25 = vpop.f32.mrf.mxu1 }
 0xbbc   :  { %v2688_v5 = vadd.f32 %v2687_v25, %v59_v13 }
 0xbbd   :  { %v2842_v12 = vpop.f32.mrf.mxu1 }
 0xbbe   :  { %v2735_v61 = vmul.f32 -1.442695, %v2688_v5 }
 0xbbf   :  { %v2690_v16 = vpop.f32.mrf.mxu1 }
 0xbc0   :  { %3081 = vpow2.f32 %v2735_v61 }
 0xbc1   :  { %v2843_v32 = vpop.f32.mrf.mxu1 }
 0xbcd   :  { %v3082_v8 = vpop.eup %3081 }
 0xbce   :  { %v2696_v38 = vadd.f32 1.0, %v3082_v8 }
 0xbd0   :  { %3083 = vrcp.f32 %v2696_v38 }
 0xbdd   :  { %v3084_v9 = vpop.eup %3083 }
 0xbde   :  { %2699 = vst [vmem:[%s4401_s6] sm:$0xff] %v3084_v9 }
 0xbdf   :  { %2704 = vsyncpa [#allocation3], 1 }
 0xbe0   :  { %2705 = vsyncpa [#allocation5], 1 }

</bundles_post_ra>
